<compile_context>
chip_gen: v5e
topology: v5e:2x2
jax: 0.10.0
libtpu: 0.0.40
codegen_flags: <defaults>
</compile_context>

<pallas_src>
import math

import numpy as np
import jax
import jax.numpy as jnp
from jax.experimental import pallas as pl
from jax.experimental.pallas import tpu as pltpu

# ------------------------- small, module-consistent config -------------------------
B = 4                            # batch
IN_CH = 8                        # in_channels
MID = (32, 4, 16, 16, 16, 16)    # mid_channels (len == 6)
OUT_CH = 16                      # out_channels
T3 = OUT_CH // 2                 # transconv3_shape = 8
T2 = T3 // 2                     # transconv2_shape = 4
T1 = T2 // 2                     # transconv1_shape = 2
BN_EPS = 1e-5
OUT_PAD = 128                    # lane-dense padded width of the kernel output slab

# derived static column widths (channel-major slabs)
_S1 = MID[2] * T1                # upsample_1 out width = 16*2  = 32
_S2 = (MID[3] // 2) * T2         # upsample_2 out width = 8*4   = 32
_S3 = (MID[4] // 2) * T3         # upsample_3 out width = 8*8   = 64
_S4 = (MID[5] // 2) * OUT_CH     # upsample_4 out width = 8*16  = 128


# ================================ fused Pallas kernel ================================
def _fused_forward_kernel(
    x_ref, lin0_w_ref, bb0_ref, res_w_ref, res_v_ref, lin1_w_ref, bb1_ref,
    us_w_ref, us_b_ref,
    u1_tcw, u1_tcb, u1_c1, u1_c2, u1_m0, u1_bn1, u1_bn2,
    u2_tcw, u2_tcb, u2_c1, u2_c2, u2_m0, u2_bn1, u2_bn2,
    u3_tcw, u3_tcb, u3_c1, u3_c2, u3_m0, u3_bn1, u3_bn2,
    out_w_ref, out_b_ref,
    o_ref,
):
    f32 = jnp.float32

    def mm(a, b):
        return jnp.dot(a, b, preferred_element_type=f32)

    def bn_feat(y, gamma, beta, relu):
        # BatchNorm1d on a 2-D (B, C) slab: per-column batch statistics.
        mean = jnp.mean(y, axis=0, keepdims=True)
        var = jnp.mean(jnp.square(y - mean), axis=0, keepdims=True)
        y = (y - mean) * jax.lax.rsqrt(var + BN_EPS)
        y = y * gamma + beta
        return jnp.maximum(y, 0.0) if relu else y

    def bn_chan_relu(y, m0, gb):
        # BatchNorm1d on a (B, C*L) channel-major slab: per-channel stats over (B, L),
        # computed with the precomputed group-averaging matrix m0 (no in-kernel reshape).
        mean = jnp.sum(mm(y, m0), axis=0, keepdims=True)
        d = y - mean
        var = jnp.sum(mm(d * d, m0), axis=0, keepdims=True)
        y = d * jax.lax.rsqrt(var + BN_EPS) * gb[0:1, :] + gb[1:2, :]
        return jnp.maximum(y, 0.0)

    def up_block(xin, xskip, split, tcw_ref, tcb_ref, c1_ref, c2_ref, m0_ref, bn1_ref, bn2_ref):
        # `up`: ConvTranspose1d(k=2,s=2) (+ F.pad folded into the matrix) then double_conv.
        # The skip concat is folded away by splitting the transconv matrix rows.
        tcw = tcw_ref[...]
        if xskip is None:
            t = mm(xin, tcw) + tcb_ref[...]
        else:
            t = mm(xin, tcw[:split, :]) + mm(xskip, tcw[split:, :]) + tcb_ref[...]
        m0 = m0_ref[...]
        h1 = bn_chan_relu(mm(t, c1_ref[...]), m0, bn1_ref[...])
        h2 = bn_chan_relu(mm(h1, c2_ref[...]), m0, bn2_ref[...])
        return h2

    c0 = MID[0]

    # ------------------------------ backbone MLP ------------------------------------
    bb0 = bb0_ref[...]
    h = mm(x_ref[...], lin0_w_ref[...]) + bb0[0:1, :]
    h = bn_feat(h, bb0[1:2, :], bb0[2:3, :], relu=True)

    res_w = res_w_ref[...]
    res_v = res_v_ref[...]
    for i in range(5):
        # TODO(synk): `residual` is undefined in the provided source; assumed y = x + Linear(x).
        w = res_w[c0 * i:c0 * (i + 1), :]
        h = bn_feat(h + mm(h, w) + res_v[3 * i:3 * i + 1, :],
                    res_v[3 * i + 1:3 * i + 2, :], res_v[3 * i + 2:3 * i + 3, :], relu=True)

    bb1 = bb1_ref[...]
    h = mm(h, lin1_w_ref[...]) + bb1[0:1, :]
    h = bn_feat(h, bb1[1:2, :], bb1[2:3, :], relu=False)          # (B, 15*m1)

    # -------------- upsample_1..4 fused into one lane-dense block-diag matmul --------
    us = mm(h, us_w_ref[...]) + us_b_ref[...]                     # (B, 256)
    x1u = us[:, 0:_S1]
    x2u = us[:, _S1:_S1 + _S2]
    x3u = us[:, _S1 + _S2:_S1 + _S2 + _S3]
    x4u = us[:, _S1 + _S2 + _S3:_S1 + _S2 + _S3 + _S4]

    # ---------------------------- decoder (up blocks) -------------------------------
    u1 = up_block(x1u, None, 0, u1_tcw, u1_tcb, u1_c1, u1_c2, u1_m0, u1_bn1, u1_bn2)
    u2 = up_block(u1, x2u, _S2, u2_tcw, u2_tcb, u2_c1, u2_c2, u2_m0, u2_bn1, u2_bn2)
    u3 = up_block(u2, x3u, _S3, u3_tcw, u3_tcb, u3_c1, u3_c2, u3_m0, u3_bn1, u3_bn2)

    # ------------------------- outconv (k=1) on cat(u3, x4u) ------------------------
    ow = out_w_ref[...]
    y = mm(u3, ow[:_S4, :]) + mm(x4u, ow[_S4:, :]) + out_b_ref[...]
    o_ref[...] = y.astype(o_ref.dtype)


def _full_block_spec(a):
    nd = a.ndim
    return pl.BlockSpec(a.shape, lambda i, _nd=nd: (0,) * _nd)


def forward(x, flat):
    """Single fused pallas_call for the whole network.  Returns (B, 2, OUT_CH)."""
    args = (x,) + tuple(flat)
    out = pl.pallas_call(
        _fused_forward_kernel,
        out_shape=jax.ShapeDtypeStruct((x.shape[0], OUT_PAD), jnp.float32),
        grid=(1,),
        in_specs=[_full_block_spec(a) for a in args],
        out_specs=pl.BlockSpec((x.shape[0], OUT_PAD), lambda i: (0, 0)),
        compiler_params=pltpu.CompilerParams(dimension_semantics=("arbitrary",)),
    )(*args)
    return out[:, :2 * OUT_CH].reshape(x.shape[0], 2, OUT_CH)


# =========================== host-side weight packing ================================
def _np(a):
    return np.asarray(a, dtype=np.float32)


def _transconv_len1_matrix(W, b):
    """ConvTranspose1d on a length-1 input: (B,Cin) @ M -> (B, Cout*K) channel-major."""
    Cin, Cout, K = W.shape
    return W.reshape(Cin, Cout * K), np.repeat(b, K)


def _transconv_k2s2_pad_matrix(W, b, Lin, out_len):
    """ConvTranspose1d(k=2, s=2) + F.pad(out_len) folded into one (Cin*Lin, Cout*out_len) matrix."""
    Cin, Cout, K = W.shape                      # K == 2, stride == 2
    Lraw = 2 * (Lin - 1) + K
    M = np.zeros((Cin * Lin, Cout * Lraw), np.float32)
    for ci in range(Cin):
        for co in range(Cout):
            for l in range(Lin):
                for k in range(K):
                    M[ci * Lin + l, co * Lraw + 2 * l + k] = W[ci, co, k]
    bias = np.tile(b[:, None], (1, Lraw))       # (Cout, Lraw)
    M = M.reshape(Cin * Lin, Cout, Lraw)
    # F.pad(y, [diff//2, diff - diff//2]) (negative -> crop), applied after bias -> pad value 0
    diff = out_len - Lraw
    left, right = diff // 2, diff - diff // 2
    lo, hi = max(0, -left), Lraw - max(0, -right)
    M, bias = M[..., lo:hi], bias[..., lo:hi]
    padl, padr = max(0, left), max(0, right)
    M = np.pad(M, ((0, 0), (0, 0), (padl, padr)))
    bias = np.pad(bias, ((0, 0), (padl, padr)))
    return M.reshape(Cin * Lin, Cout * out_len), bias.reshape(Cout * out_len)


def _conv_k3p1_matrix(W, L):
    """Conv1d(k=3, pad=1, no bias) as a (Cin*L, Cout*L) matrix (channel-major cols)."""
    Cout, Cin, K = W.shape
    M = np.zeros((Cin * L, Cout * L), np.float32)
    for co in range(Cout):
        for ci in range(Cin):
            for lo in range(L):
                for k in range(K):
                    li = lo + k - 1
                    if 0 <= li < L:
                        M[ci * L + li, co * L + lo] = W[co, ci, k]
    return M


def _conv_k1_matrix(W, b, L):
    """Conv1d(k=1) with bias as a (Cin*L, Cout*L) matrix."""
    Cout, Cin, _ = W.shape
    M = np.zeros((Cin * L, Cout * L), np.float32)
    for co in range(Cout):
        for ci in range(Cin):
            for l in range(L):
                M[ci * L + l, co * L + l] = W[co, ci, 0]
    return M, np.repeat(b, L)


def prepare_params(p):
    """One-time packing of torch-layout parameters into matmul-ready slabs (kernel arg order)."""
    _, m1, m2, m3, m4, m5 = MID
    n = _np
    flat = []
    # backbone
    flat.append(n(p['lin0_w']))
    flat.append(np.stack([n(p['lin0_b']), n(p['bn0_g']), n(p['bn0_b'])]))
    flat.append(np.concatenate([n(w) for w in p['res_w']], axis=0))
    flat.append(np.concatenate(
        [np.stack([n(p['res_b'][i]), n(p['resbn_g'][i]), n(p['resbn_b'][i])]) for i in range(5)],
        axis=0))
    flat.append(n(p['lin1_w']))
    flat.append(np.stack([n(p['lin1_b']), n(p['bn1_g']), n(p['bn1_b'])]))

    # upsample_1..4 fused into one block-diagonal (15*m1, 256) weight + (1, 256) bias
    mats, biases = [], []
    for wk, bk in (('us1_w', 'us1_b'), ('us2_w', 'us2_b'), ('us3_w', 'us3_b'), ('us4_w', 'us4_b')):
        M, bias = _transconv_len1_matrix(n(p[wk]), n(p[bk]))
        mats.append(M)
        biases.append(bias)
    rows = sum(M.shape[0] for M in mats)
    cols = sum(M.shape[1] for M in mats)
    us_w = np.zeros((rows, cols), np.float32)
    us_b = np.zeros((cols,), np.float32)
    r = c = 0
    for M, bias in zip(mats, biases):
        us_w[r:r + M.shape[0], c:c + M.shape[1]] = M
        us_b[c:c + M.shape[1]] = bias
        r += M.shape[0]
        c += M.shape[1]
    flat.append(us_w)
    flat.append(us_b.reshape(1, -1))

    def pack_up(d, Lin, Lout, cout):
        tcw, tcb = _transconv_k2s2_pad_matrix(n(d['up_w']), n(d['up_b']), Lin, Lout)
        c1 = _conv_k3p1_matrix(n(d['c1_w']), Lout)
        c2 = _conv_k3p1_matrix(n(d['c2_w']), Lout)
        grp = np.kron(np.eye(cout, dtype=np.float32),
                      np.ones((Lout, Lout), np.float32)) / float(B * Lout)
        bn1 = np.stack([np.repeat(n(d['bn1_g']), Lout), np.repeat(n(d['bn1_b']), Lout)])
        bn2 = np.stack([np.repeat(n(d['bn2_g']), Lout), np.repeat(n(d['bn2_b']), Lout)])
        return [tcw, tcb.reshape(1, -1), c1, c2, grp, bn1, bn2]

    flat += pack_up(p['up1'], T1, T2, m3 // 2)
    flat += pack_up(p['up2'], T2, T3, m4 // 2)
    flat += pack_up(p['up3'], T3, OUT_CH, m5 // 2)

    # outconv, zero-padded to a lane-dense 128-wide output slab
    ow, ob = _conv_k1_matrix(n(p['out_w']), n(p['out_b']), OUT_CH)
    ow = np.pad(ow, ((0, 0), (0, OUT_PAD - ow.shape[1])))
    ob = np.pad(ob, (0, OUT_PAD - ob.shape[0]))
    flat.append(ow)
    flat.append(ob.reshape(1, -1))

    return tuple(jnp.asarray(a) for a in flat)


# ------------------------------- parameter init --------------------------------------
def init_params(key):
    keys = iter(jax.random.split(key, 128))

    def uni(fan_in, shape):
        bound = 1.0 / math.sqrt(fan_in)
        return jax.random.uniform(next(keys), shape, jnp.float32, -bound, bound)

    m0, m1, m2, m3, m4, m5 = MID
    p = {}
    # backbone
    p['lin0_w'] = uni(IN_CH, (IN_CH, m0))
    p['lin0_b'] = uni(IN_CH, (m0,))
    p['bn0_g'] = jnp.ones((m0,), jnp.float32)
    p['bn0_b'] = jnp.zeros((m0,), jnp.float32)
    p['res_w'] = [uni(m0, (m0, m0)) for _ in range(5)]
    p['res_b'] = [uni(m0, (m0,)) for _ in range(5)]
    p['resbn_g'] = [jnp.ones((m0,), jnp.float32) for _ in range(5)]
    p['resbn_b'] = [jnp.zeros((m0,), jnp.float32) for _ in range(5)]
    nflat = m1 * 15
    p['lin1_w'] = uni(m0, (m0, nflat))
    p['lin1_b'] = uni(m0, (nflat,))
    p['bn1_g'] = jnp.ones((nflat,), jnp.float32)
    p['bn1_b'] = jnp.zeros((nflat,), jnp.float32)

    # upsample transposed convs (torch weight layout: (Cin, Cout, K))
    def ct(cin, cout, k):
        return uni(cin * k, (cin, cout, k)), uni(cin * k, (cout,))
    p['us1_w'], p['us1_b'] = ct(m1 * 8, m2, T1)
    p['us2_w'], p['us2_b'] = ct(m1 * 4, m3 // 2, T2)
    p['us3_w'], p['us3_b'] = ct(m1 * 2, m4 // 2, T3)
    p['us4_w'], p['us4_b'] = ct(m1, m5 // 2, OUT_CH)

    # `up` blocks: ConvTranspose1d(in,in,2,2) + double_conv(in,out)
    def up_params(cin, cout):
        d = {}
        d['up_w'], d['up_b'] = ct(cin, cin, 2)
        d['c1_w'] = uni(cin * 3, (cout, cin, 3))      # Conv1d weight (Cout, Cin, K)
        d['bn1_g'] = jnp.ones((cout,), jnp.float32)
        d['bn1_b'] = jnp.zeros((cout,), jnp.float32)
        d['c2_w'] = uni(cout * 3, (cout, cout, 3))
        d['bn2_g'] = jnp.ones((cout,), jnp.float32)
        d['bn2_b'] = jnp.zeros((cout,), jnp.float32)
        return d
    p['up1'] = up_params(m2, m3 // 2)
    p['up2'] = up_params(m3, m4 // 2)
    p['up3'] = up_params(m4, m5 // 2)

    # outconv: Conv1d(m5, 2, k=1)
    p['out_w'] = uni(m5, (2, m5, 1))
    p['out_b'] = uni(m5, (2,))
    return p


# --------------------------- pure-JAX reference (for checking) -----------------------
def reference_forward(x, p):
    _, m1, _, _, _, _ = MID

    def bn_feat(y, g, b, relu):
        mean = y.mean(0, keepdims=True)
        var = ((y - mean) ** 2).mean(0, keepdims=True)
        y = (y - mean) / jnp.sqrt(var + BN_EPS) * g + b
        return jnp.maximum(y, 0.0) if relu else y

    def bn_chan(y, g, b):
        mean = y.mean(axis=(0, 2), keepdims=True)
        var = ((y - mean) ** 2).mean(axis=(0, 2), keepdims=True)
        y = (y - mean) / jnp.sqrt(var + BN_EPS) * g[None, :, None] + b[None, :, None]
        return jnp.maximum(y, 0.0)

    def tconv_len1(z, W, bias):
        return jnp.einsum('bi,iok->bok', z, W) + bias[None, :, None]

    def tconv_k2s2(z, W, bias):
        y = jnp.einsum('bil,iok->bolk', z, W)
        Bn, Co, L, K = y.shape
        return y.reshape(Bn, Co, L * K) + bias[None, :, None]

    def conv_k3(z, W):
        L = z.shape[-1]
        zp = jnp.pad(z, ((0, 0), (0, 0), (1, 1)))
        return sum(jnp.einsum('bil,oi->bol', zp[:, :, k:k + L], W[:, :, k]) for k in range(3))

    def pad_len(z, out_len):
        L = z.shape[-1]
        diff = out_len - L
        left, right = diff // 2, diff - diff // 2
        lo, hi = max(0, -left), L - max(0, -right)
        z = z[:, :, lo:hi]
        return jnp.pad(z, ((0, 0), (0, 0), (max(0, left), max(0, right))))

    def up_blk(z, d, out_len):
        z = pad_len(tconv_k2s2(z, d['up_w'], d['up_b']), out_len)
        z = bn_chan(conv_k3(z, d['c1_w']), d['bn1_g'], d['bn1_b'])
        z = bn_chan(conv_k3(z, d['c2_w']), d['bn2_g'], d['bn2_b'])
        return z

    h = bn_feat(x @ p['lin0_w'] + p['lin0_b'], p['bn0_g'], p['bn0_b'], True)
    for i in range(5):
        h = bn_feat(h + h @ p['res_w'][i] + p['res_b'][i], p['resbn_g'][i], p['resbn_b'][i], True)
    h = bn_feat(h @ p['lin1_w'] + p['lin1_b'], p['bn1_g'], p['bn1_b'], False)

    x1 = tconv_len1(h[:, 0:m1 * 8], p['us1_w'], p['us1_b'])
    x2 = tconv_len1(h[:, m1 * 8:m1 * 12], p['us2_w'], p['us2_b'])
    x3 = tconv_len1(h[:, m1 * 12:m1 * 14], p['us3_w'], p['us3_b'])
    x4 = tconv_len1(h[:, m1 * 14:m1 * 15], p['us4_w'], p['us4_b'])

    x2 = jnp.concatenate((up_blk(x1, p['up1'], T2), x2), axis=1)
    x3 = jnp.concatenate((up_blk(x2, p['up2'], T3), x3), axis=1)
    x4 = jnp.concatenate((up_blk(x3, p['up3'], OUT_CH), x4), axis=1)
    return jnp.einsum('bil,oi->bol', x4, p['out_w'][:, :, 0]) + p['out_b'][None, :, None]


# --------------------------------------- main ----------------------------------------
if __name__ == "__main__":
    key = jax.random.PRNGKey(0)
    kx, kp = jax.random.split(key)
    x = jax.random.normal(kx, (B, IN_CH), jnp.float32)

    params = init_params(kp)
    flat = prepare_params(params)            # one-time, host-side weight packing

    fwd = jax.jit(forward)
    out = jax.block_until_ready(fwd(x, flat))

    assert out.shape == (B, 2, OUT_CH), out.shape
    assert bool(jnp.all(jnp.isfinite(out)))

    # correctness check against a pure-JAX reference of the module
    ref = np.asarray(reference_forward(x, params))
    got = np.asarray(out)
    assert np.allclose(got, ref, rtol=1e-2, atol=1e-2), float(np.max(np.abs(got - ref)))

    print("KERNEL_OK")
</pallas_src>

<mosaic_0001>
module attributes {stable_mosaic.version = 11 : i64} {
  func.func @_fused_forward_kernel(%arg0: i32, %arg1: memref<4x8xf32, #tpu.memory_space<vmem>>, %arg2: memref<8x32xf32, #tpu.memory_space<vmem>>, %arg3: memref<3x32xf32, #tpu.memory_space<vmem>>, %arg4: memref<160x32xf32, #tpu.memory_space<vmem>>, %arg5: memref<15x32xf32, #tpu.memory_space<vmem>>, %arg6: memref<32x60xf32, #tpu.memory_space<vmem>>, %arg7: memref<3x60xf32, #tpu.memory_space<vmem>>, %arg8: memref<60x256xf32, #tpu.memory_space<vmem>>, %arg9: memref<1x256xf32, #tpu.memory_space<vmem>>, %arg10: memref<32x64xf32, #tpu.memory_space<vmem>>, %arg11: memref<1x64xf32, #tpu.memory_space<vmem>>, %arg12: memref<64x32xf32, #tpu.memory_space<vmem>>, %arg13: memref<32x32xf32, #tpu.memory_space<vmem>>, %arg14: memref<32x32xf32, #tpu.memory_space<vmem>>, %arg15: memref<2x32xf32, #tpu.memory_space<vmem>>, %arg16: memref<2x32xf32, #tpu.memory_space<vmem>>, %arg17: memref<64x128xf32, #tpu.memory_space<vmem>>, %arg18: memref<1x128xf32, #tpu.memory_space<vmem>>, %arg19: memref<128x64xf32, #tpu.memory_space<vmem>>, %arg20: memref<64x64xf32, #tpu.memory_space<vmem>>, %arg21: memref<64x64xf32, #tpu.memory_space<vmem>>, %arg22: memref<2x64xf32, #tpu.memory_space<vmem>>, %arg23: memref<2x64xf32, #tpu.memory_space<vmem>>, %arg24: memref<128x256xf32, #tpu.memory_space<vmem>>, %arg25: memref<1x256xf32, #tpu.memory_space<vmem>>, %arg26: memref<256x128xf32, #tpu.memory_space<vmem>>, %arg27: memref<128x128xf32, #tpu.memory_space<vmem>>, %arg28: memref<128x128xf32, #tpu.memory_space<vmem>>, %arg29: memref<2x128xf32, #tpu.memory_space<vmem>>, %arg30: memref<2x128xf32, #tpu.memory_space<vmem>>, %arg31: memref<256x128xf32, #tpu.memory_space<vmem>>, %arg32: memref<1x128xf32, #tpu.memory_space<vmem>>, %arg33: memref<4x128xf32, #tpu.memory_space<vmem>>) attributes {dimension_semantics = [#tpu.dimension_semantics<arbitrary>], iteration_bounds = array<i64: 1>, scalar_prefetch = 0 : i64, scratch_operands = 0 : i64, tpu.core_type = #tpu.core_type<tc>, window_params = [{pipeline_mode = #tpu.pipeline_mode<synchronous>, transform_indices = @transform_0, window_bounds = array<i64: 4, 8>}, {pipeline_mode = #tpu.pipeline_mode<synchronous>, transform_indices = @transform_1, window_bounds = array<i64: 8, 32>}, {pipeline_mode = #tpu.pipeline_mode<synchronous>, transform_indices = @transform_2, window_bounds = array<i64: 3, 32>}, {pipeline_mode = #tpu.pipeline_mode<synchronous>, transform_indices = @transform_3, window_bounds = array<i64: 160, 32>}, {pipeline_mode = #tpu.pipeline_mode<synchronous>, transform_indices = @transform_4, window_bounds = array<i64: 15, 32>}, {pipeline_mode = #tpu.pipeline_mode<synchronous>, transform_indices = @transform_5, window_bounds = array<i64: 32, 60>}, {pipeline_mode = #tpu.pipeline_mode<synchronous>, transform_indices = @transform_6, window_bounds = array<i64: 3, 60>}, {pipeline_mode = #tpu.pipeline_mode<synchronous>, transform_indices = @transform_7, window_bounds = array<i64: 60, 256>}, {pipeline_mode = #tpu.pipeline_mode<synchronous>, transform_indices = @transform_8, window_bounds = array<i64: 1, 256>}, {pipeline_mode = #tpu.pipeline_mode<synchronous>, transform_indices = @transform_9, window_bounds = array<i64: 32, 64>}, {pipeline_mode = #tpu.pipeline_mode<synchronous>, transform_indices = @transform_10, window_bounds = array<i64: 1, 64>}, {pipeline_mode = #tpu.pipeline_mode<synchronous>, transform_indices = @transform_11, window_bounds = array<i64: 64, 32>}, {pipeline_mode = #tpu.pipeline_mode<synchronous>, transform_indices = @transform_12, window_bounds = array<i64: 32, 32>}, {pipeline_mode = #tpu.pipeline_mode<synchronous>, transform_indices = @transform_13, window_bounds = array<i64: 32, 32>}, {pipeline_mode = #tpu.pipeline_mode<synchronous>, transform_indices = @transform_14, window_bounds = array<i64: 2, 32>}, {pipeline_mode = #tpu.pipeline_mode<synchronous>, transform_indices = @transform_15, window_bounds = array<i64: 2, 32>}, {pipeline_mode = #tpu.pipeline_mode<synchronous>, transform_indices = @transform_16, window_bounds = array<i64: 64, 128>}, {pipeline_mode = #tpu.pipeline_mode<synchronous>, transform_indices = @transform_17, window_bounds = array<i64: 1, 128>}, {pipeline_mode = #tpu.pipeline_mode<synchronous>, transform_indices = @transform_18, window_bounds = array<i64: 128, 64>}, {pipeline_mode = #tpu.pipeline_mode<synchronous>, transform_indices = @transform_19, window_bounds = array<i64: 64, 64>}, {pipeline_mode = #tpu.pipeline_mode<synchronous>, transform_indices = @transform_20, window_bounds = array<i64: 64, 64>}, {pipeline_mode = #tpu.pipeline_mode<synchronous>, transform_indices = @transform_21, window_bounds = array<i64: 2, 64>}, {pipeline_mode = #tpu.pipeline_mode<synchronous>, transform_indices = @transform_22, window_bounds = array<i64: 2, 64>}, {pipeline_mode = #tpu.pipeline_mode<synchronous>, transform_indices = @transform_23, window_bounds = array<i64: 128, 256>}, {pipeline_mode = #tpu.pipeline_mode<synchronous>, transform_indices = @transform_24, window_bounds = array<i64: 1, 256>}, {pipeline_mode = #tpu.pipeline_mode<synchronous>, transform_indices = @transform_25, window_bounds = array<i64: 256, 128>}, {pipeline_mode = #tpu.pipeline_mode<synchronous>, transform_indices = @transform_26, window_bounds = array<i64: 128, 128>}, {pipeline_mode = #tpu.pipeline_mode<synchronous>, transform_indices = @transform_27, window_bounds = array<i64: 128, 128>}, {pipeline_mode = #tpu.pipeline_mode<synchronous>, transform_indices = @transform_28, window_bounds = array<i64: 2, 128>}, {pipeline_mode = #tpu.pipeline_mode<synchronous>, transform_indices = @transform_29, window_bounds = array<i64: 2, 128>}, {pipeline_mode = #tpu.pipeline_mode<synchronous>, transform_indices = @transform_30, window_bounds = array<i64: 256, 128>}, {pipeline_mode = #tpu.pipeline_mode<synchronous>, transform_indices = @transform_31, window_bounds = array<i64: 1, 128>}, {pipeline_mode = #tpu.pipeline_mode<synchronous>, transform_indices = @transform_32, window_bounds = array<i64: 4, 128>}]} {
    %c0 = arith.constant 0 : index
    %c0_0 = arith.constant 0 : index
    %0 = vector.load %arg3[%c0, %c0_0] : memref<3x32xf32, #tpu.memory_space<vmem>>, vector<3x32xf32>
    %c0_1 = arith.constant 0 : index
    %c0_2 = arith.constant 0 : index
    %1 = vector.load %arg1[%c0_1, %c0_2] : memref<4x8xf32, #tpu.memory_space<vmem>>, vector<4x8xf32>
    %c0_3 = arith.constant 0 : index
    %c0_4 = arith.constant 0 : index
    %2 = vector.load %arg2[%c0_3, %c0_4] : memref<8x32xf32, #tpu.memory_space<vmem>>, vector<8x32xf32>
    %cst = arith.constant dense<0.000000e+00> : vector<4x32xf32>
    %3 = tpu.matmul %1, %2, %cst {dimension_numbers = #tpu.dot_dimension_numbers<[1], [0], [0], [1], [0, 0, 1, 1], [], []>} : vector<4x8xf32>, vector<8x32xf32>, vector<4x32xf32> -> vector<4x32xf32>
    %4 = vector.extract_strided_slice %0 {offsets = [0, 0], sizes = [1, 32], strides = [1, 1]} : vector<3x32xf32> to vector<1x32xf32>
    %5 = vector.broadcast %4 : vector<1x32xf32> to vector<4x32xf32>
    %6 = arith.addf %3, %5 : vector<4x32xf32>
    %7 = vector.extract_strided_slice %0 {offsets = [1, 0], sizes = [1, 32], strides = [1, 1]} : vector<3x32xf32> to vector<1x32xf32>
    %8 = vector.extract_strided_slice %0 {offsets = [2, 0], sizes = [1, 32], strides = [1, 1]} : vector<3x32xf32> to vector<1x32xf32>
    %cst_5 = arith.constant dense<0.000000e+00> : vector<32xf32>
    %9 = vector.multi_reduction <add>, %6, %cst_5 [0] : vector<4x32xf32> to vector<32xf32>
    %10 = vector.shape_cast %9 : vector<32xf32> to vector<1x32xf32>
    %cst_6 = arith.constant 4.000000e+00 : f32
    %11 = vector.broadcast %cst_6 : f32 to vector<1x32xf32>
    %12 = arith.divf %10, %11 : vector<1x32xf32>
    %13 = vector.broadcast %12 : vector<1x32xf32> to vector<4x32xf32>
    %14 = arith.subf %6, %13 : vector<4x32xf32>
    %15 = arith.mulf %14, %14 : vector<4x32xf32>
    %cst_7 = arith.constant dense<0.000000e+00> : vector<32xf32>
    %16 = vector.multi_reduction <add>, %15, %cst_7 [0] : vector<4x32xf32> to vector<32xf32>
    %17 = vector.shape_cast %16 : vector<32xf32> to vector<1x32xf32>
    %cst_8 = arith.constant 4.000000e+00 : f32
    %18 = vector.broadcast %cst_8 : f32 to vector<1x32xf32>
    %19 = arith.divf %17, %18 : vector<1x32xf32>
    %20 = vector.broadcast %12 : vector<1x32xf32> to vector<4x32xf32>
    %21 = arith.subf %6, %20 : vector<4x32xf32>
    %cst_9 = arith.constant 9.99999974E-6 : f32
    %22 = vector.broadcast %cst_9 : f32 to vector<1x32xf32>
    %23 = arith.addf %19, %22 : vector<1x32xf32>
    %24 = math.rsqrt %23 : vector<1x32xf32>
    %25 = vector.broadcast %24 : vector<1x32xf32> to vector<4x32xf32>
    %26 = arith.mulf %21, %25 : vector<4x32xf32>
    %27 = vector.broadcast %7 : vector<1x32xf32> to vector<4x32xf32>
    %28 = arith.mulf %26, %27 : vector<4x32xf32>
    %29 = vector.broadcast %8 : vector<1x32xf32> to vector<4x32xf32>
    %30 = arith.addf %28, %29 : vector<4x32xf32>
    %cst_10 = arith.constant 0.000000e+00 : f32
    %31 = vector.broadcast %cst_10 : f32 to vector<4x32xf32>
    %32 = arith.maximumf %30, %31 : vector<4x32xf32>
    %c0_11 = arith.constant 0 : index
    %c0_12 = arith.constant 0 : index
    %33 = vector.load %arg4[%c0_11, %c0_12] : memref<160x32xf32, #tpu.memory_space<vmem>>, vector<160x32xf32>
    %c0_13 = arith.constant 0 : index
    %c0_14 = arith.constant 0 : index
    %34 = vector.load %arg5[%c0_13, %c0_14] : memref<15x32xf32, #tpu.memory_space<vmem>>, vector<15x32xf32>
    %35 = vector.extract_strided_slice %33 {offsets = [0, 0], sizes = [32, 32], strides = [1, 1]} : vector<160x32xf32> to vector<32x32xf32>
    %cst_15 = arith.constant dense<0.000000e+00> : vector<4x32xf32>
    %36 = tpu.matmul %32, %35, %cst_15 {dimension_numbers = #tpu.dot_dimension_numbers<[1], [0], [0], [1], [0, 0, 1, 1], [], []>} : vector<4x32xf32>, vector<32x32xf32>, vector<4x32xf32> -> vector<4x32xf32>
    %37 = arith.addf %32, %36 : vector<4x32xf32>
    %38 = vector.extract_strided_slice %34 {offsets = [0, 0], sizes = [1, 32], strides = [1, 1]} : vector<15x32xf32> to vector<1x32xf32>
    %39 = vector.broadcast %38 : vector<1x32xf32> to vector<4x32xf32>
    %40 = arith.addf %37, %39 : vector<4x32xf32>
    %41 = vector.extract_strided_slice %34 {offsets = [1, 0], sizes = [1, 32], strides = [1, 1]} : vector<15x32xf32> to vector<1x32xf32>
    %42 = vector.extract_strided_slice %34 {offsets = [2, 0], sizes = [1, 32], strides = [1, 1]} : vector<15x32xf32> to vector<1x32xf32>
    %cst_16 = arith.constant dense<0.000000e+00> : vector<32xf32>
    %43 = vector.multi_reduction <add>, %40, %cst_16 [0] : vector<4x32xf32> to vector<32xf32>
    %44 = vector.shape_cast %43 : vector<32xf32> to vector<1x32xf32>
    %cst_17 = arith.constant 4.000000e+00 : f32
    %45 = vector.broadcast %cst_17 : f32 to vector<1x32xf32>
    %46 = arith.divf %44, %45 : vector<1x32xf32>
    %47 = vector.broadcast %46 : vector<1x32xf32> to vector<4x32xf32>
    %48 = arith.subf %40, %47 : vector<4x32xf32>
    %49 = arith.mulf %48, %48 : vector<4x32xf32>
    %cst_18 = arith.constant dense<0.000000e+00> : vector<32xf32>
    %50 = vector.multi_reduction <add>, %49, %cst_18 [0] : vector<4x32xf32> to vector<32xf32>
    %51 = vector.shape_cast %50 : vector<32xf32> to vector<1x32xf32>
    %cst_19 = arith.constant 4.000000e+00 : f32
    %52 = vector.broadcast %cst_19 : f32 to vector<1x32xf32>
    %53 = arith.divf %51, %52 : vector<1x32xf32>
    %54 = vector.broadcast %46 : vector<1x32xf32> to vector<4x32xf32>
    %55 = arith.subf %40, %54 : vector<4x32xf32>
    %cst_20 = arith.constant 9.99999974E-6 : f32
    %56 = vector.broadcast %cst_20 : f32 to vector<1x32xf32>
    %57 = arith.addf %53, %56 : vector<1x32xf32>
    %58 = math.rsqrt %57 : vector<1x32xf32>
    %59 = vector.broadcast %58 : vector<1x32xf32> to vector<4x32xf32>
    %60 = arith.mulf %55, %59 : vector<4x32xf32>
    %61 = vector.broadcast %41 : vector<1x32xf32> to vector<4x32xf32>
    %62 = arith.mulf %60, %61 : vector<4x32xf32>
    %63 = vector.broadcast %42 : vector<1x32xf32> to vector<4x32xf32>
    %64 = arith.addf %62, %63 : vector<4x32xf32>
    %cst_21 = arith.constant 0.000000e+00 : f32
    %65 = vector.broadcast %cst_21 : f32 to vector<4x32xf32>
    %66 = arith.maximumf %64, %65 : vector<4x32xf32>
    %67 = vector.extract_strided_slice %33 {offsets = [32, 0], sizes = [32, 32], strides = [1, 1]} : vector<160x32xf32> to vector<32x32xf32>
    %cst_22 = arith.constant dense<0.000000e+00> : vector<4x32xf32>
    %68 = tpu.matmul %66, %67, %cst_22 {dimension_numbers = #tpu.dot_dimension_numbers<[1], [0], [0], [1], [0, 0, 1, 1], [], []>} : vector<4x32xf32>, vector<32x32xf32>, vector<4x32xf32> -> vector<4x32xf32>
    %69 = arith.addf %66, %68 : vector<4x32xf32>
    %70 = vector.extract_strided_slice %34 {offsets = [3, 0], sizes = [1, 32], strides = [1, 1]} : vector<15x32xf32> to vector<1x32xf32>
    %71 = vector.broadcast %70 : vector<1x32xf32> to vector<4x32xf32>
    %72 = arith.addf %69, %71 : vector<4x32xf32>
    %73 = vector.extract_strided_slice %34 {offsets = [4, 0], sizes = [1, 32], strides = [1, 1]} : vector<15x32xf32> to vector<1x32xf32>
    %74 = vector.extract_strided_slice %34 {offsets = [5, 0], sizes = [1, 32], strides = [1, 1]} : vector<15x32xf32> to vector<1x32xf32>
    %cst_23 = arith.constant dense<0.000000e+00> : vector<32xf32>
    %75 = vector.multi_reduction <add>, %72, %cst_23 [0] : vector<4x32xf32> to vector<32xf32>
    %76 = vector.shape_cast %75 : vector<32xf32> to vector<1x32xf32>
    %cst_24 = arith.constant 4.000000e+00 : f32
    %77 = vector.broadcast %cst_24 : f32 to vector<1x32xf32>
    %78 = arith.divf %76, %77 : vector<1x32xf32>
    %79 = vector.broadcast %78 : vector<1x32xf32> to vector<4x32xf32>
    %80 = arith.subf %72, %79 : vector<4x32xf32>
    %81 = arith.mulf %80, %80 : vector<4x32xf32>
    %cst_25 = arith.constant dense<0.000000e+00> : vector<32xf32>
    %82 = vector.multi_reduction <add>, %81, %cst_25 [0] : vector<4x32xf32> to vector<32xf32>
    %83 = vector.shape_cast %82 : vector<32xf32> to vector<1x32xf32>
    %cst_26 = arith.constant 4.000000e+00 : f32
    %84 = vector.broadcast %cst_26 : f32 to vector<1x32xf32>
    %85 = arith.divf %83, %84 : vector<1x32xf32>
    %86 = vector.broadcast %78 : vector<1x32xf32> to vector<4x32xf32>
    %87 = arith.subf %72, %86 : vector<4x32xf32>
    %cst_27 = arith.constant 9.99999974E-6 : f32
    %88 = vector.broadcast %cst_27 : f32 to vector<1x32xf32>
    %89 = arith.addf %85, %88 : vector<1x32xf32>
    %90 = math.rsqrt %89 : vector<1x32xf32>
    %91 = vector.broadcast %90 : vector<1x32xf32> to vector<4x32xf32>
    %92 = arith.mulf %87, %91 : vector<4x32xf32>
    %93 = vector.broadcast %73 : vector<1x32xf32> to vector<4x32xf32>
    %94 = arith.mulf %92, %93 : vector<4x32xf32>
    %95 = vector.broadcast %74 : vector<1x32xf32> to vector<4x32xf32>
    %96 = arith.addf %94, %95 : vector<4x32xf32>
    %cst_28 = arith.constant 0.000000e+00 : f32
    %97 = vector.broadcast %cst_28 : f32 to vector<4x32xf32>
    %98 = arith.maximumf %96, %97 : vector<4x32xf32>
    %99 = vector.extract_strided_slice %33 {offsets = [64, 0], sizes = [32, 32], strides = [1, 1]} : vector<160x32xf32> to vector<32x32xf32>
    %cst_29 = arith.constant dense<0.000000e+00> : vector<4x32xf32>
    %100 = tpu.matmul %98, %99, %cst_29 {dimension_numbers = #tpu.dot_dimension_numbers<[1], [0], [0], [1], [0, 0, 1, 1], [], []>} : vector<4x32xf32>, vector<32x32xf32>, vector<4x32xf32> -> vector<4x32xf32>
    %101 = arith.addf %98, %100 : vector<4x32xf32>
    %102 = vector.extract_strided_slice %34 {offsets = [6, 0], sizes = [1, 32], strides = [1, 1]} : vector<15x32xf32> to vector<1x32xf32>
    %103 = vector.broadcast %102 : vector<1x32xf32> to vector<4x32xf32>
    %104 = arith.addf %101, %103 : vector<4x32xf32>
    %105 = vector.extract_strided_slice %34 {offsets = [7, 0], sizes = [1, 32], strides = [1, 1]} : vector<15x32xf32> to vector<1x32xf32>
    %106 = vector.extract_strided_slice %34 {offsets = [8, 0], sizes = [1, 32], strides = [1, 1]} : vector<15x32xf32> to vector<1x32xf32>
    %cst_30 = arith.constant dense<0.000000e+00> : vector<32xf32>
    %107 = vector.multi_reduction <add>, %104, %cst_30 [0] : vector<4x32xf32> to vector<32xf32>
    %108 = vector.shape_cast %107 : vector<32xf32> to vector<1x32xf32>
    %cst_31 = arith.constant 4.000000e+00 : f32
    %109 = vector.broadcast %cst_31 : f32 to vector<1x32xf32>
    %110 = arith.divf %108, %109 : vector<1x32xf32>
    %111 = vector.broadcast %110 : vector<1x32xf32> to vector<4x32xf32>
    %112 = arith.subf %104, %111 : vector<4x32xf32>
    %113 = arith.mulf %112, %112 : vector<4x32xf32>
    %cst_32 = arith.constant dense<0.000000e+00> : vector<32xf32>
    %114 = vector.multi_reduction <add>, %113, %cst_32 [0] : vector<4x32xf32> to vector<32xf32>
    %115 = vector.shape_cast %114 : vector<32xf32> to vector<1x32xf32>
    %cst_33 = arith.constant 4.000000e+00 : f32
    %116 = vector.broadcast %cst_33 : f32 to vector<1x32xf32>
    %117 = arith.divf %115, %116 : vector<1x32xf32>
    %118 = vector.broadcast %110 : vector<1x32xf32> to vector<4x32xf32>
    %119 = arith.subf %104, %118 : vector<4x32xf32>
    %cst_34 = arith.constant 9.99999974E-6 : f32
    %120 = vector.broadcast %cst_34 : f32 to vector<1x32xf32>
    %121 = arith.addf %117, %120 : vector<1x32xf32>
    %122 = math.rsqrt %121 : vector<1x32xf32>
    %123 = vector.broadcast %122 : vector<1x32xf32> to vector<4x32xf32>
    %124 = arith.mulf %119, %123 : vector<4x32xf32>
    %125 = vector.broadcast %105 : vector<1x32xf32> to vector<4x32xf32>
    %126 = arith.mulf %124, %125 : vector<4x32xf32>
    %127 = vector.broadcast %106 : vector<1x32xf32> to vector<4x32xf32>
    %128 = arith.addf %126, %127 : vector<4x32xf32>
    %cst_35 = arith.constant 0.000000e+00 : f32
    %129 = vector.broadcast %cst_35 : f32 to vector<4x32xf32>
    %130 = arith.maximumf %128, %129 : vector<4x32xf32>
    %131 = vector.extract_strided_slice %33 {offsets = [96, 0], sizes = [32, 32], strides = [1, 1]} : vector<160x32xf32> to vector<32x32xf32>
    %cst_36 = arith.constant dense<0.000000e+00> : vector<4x32xf32>
    %132 = tpu.matmul %130, %131, %cst_36 {dimension_numbers = #tpu.dot_dimension_numbers<[1], [0], [0], [1], [0, 0, 1, 1], [], []>} : vector<4x32xf32>, vector<32x32xf32>, vector<4x32xf32> -> vector<4x32xf32>
    %133 = arith.addf %130, %132 : vector<4x32xf32>
    %134 = vector.extract_strided_slice %34 {offsets = [9, 0], sizes = [1, 32], strides = [1, 1]} : vector<15x32xf32> to vector<1x32xf32>
    %135 = vector.broadcast %134 : vector<1x32xf32> to vector<4x32xf32>
    %136 = arith.addf %133, %135 : vector<4x32xf32>
    %137 = vector.extract_strided_slice %34 {offsets = [10, 0], sizes = [1, 32], strides = [1, 1]} : vector<15x32xf32> to vector<1x32xf32>
    %138 = vector.extract_strided_slice %34 {offsets = [11, 0], sizes = [1, 32], strides = [1, 1]} : vector<15x32xf32> to vector<1x32xf32>
    %cst_37 = arith.constant dense<0.000000e+00> : vector<32xf32>
    %139 = vector.multi_reduction <add>, %136, %cst_37 [0] : vector<4x32xf32> to vector<32xf32>
    %140 = vector.shape_cast %139 : vector<32xf32> to vector<1x32xf32>
    %cst_38 = arith.constant 4.000000e+00 : f32
    %141 = vector.broadcast %cst_38 : f32 to vector<1x32xf32>
    %142 = arith.divf %140, %141 : vector<1x32xf32>
    %143 = vector.broadcast %142 : vector<1x32xf32> to vector<4x32xf32>
    %144 = arith.subf %136, %143 : vector<4x32xf32>
    %145 = arith.mulf %144, %144 : vector<4x32xf32>
    %cst_39 = arith.constant dense<0.000000e+00> : vector<32xf32>
    %146 = vector.multi_reduction <add>, %145, %cst_39 [0] : vector<4x32xf32> to vector<32xf32>
    %147 = vector.shape_cast %146 : vector<32xf32> to vector<1x32xf32>
    %cst_40 = arith.constant 4.000000e+00 : f32
    %148 = vector.broadcast %cst_40 : f32 to vector<1x32xf32>
    %149 = arith.divf %147, %148 : vector<1x32xf32>
    %150 = vector.broadcast %142 : vector<1x32xf32> to vector<4x32xf32>
    %151 = arith.subf %136, %150 : vector<4x32xf32>
    %cst_41 = arith.constant 9.99999974E-6 : f32
    %152 = vector.broadcast %cst_41 : f32 to vector<1x32xf32>
    %153 = arith.addf %149, %152 : vector<1x32xf32>
    %154 = math.rsqrt %153 : vector<1x32xf32>
    %155 = vector.broadcast %154 : vector<1x32xf32> to vector<4x32xf32>
    %156 = arith.mulf %151, %155 : vector<4x32xf32>
    %157 = vector.broadcast %137 : vector<1x32xf32> to vector<4x32xf32>
    %158 = arith.mulf %156, %157 : vector<4x32xf32>
    %159 = vector.broadcast %138 : vector<1x32xf32> to vector<4x32xf32>
    %160 = arith.addf %158, %159 : vector<4x32xf32>
    %cst_42 = arith.constant 0.000000e+00 : f32
    %161 = vector.broadcast %cst_42 : f32 to vector<4x32xf32>
    %162 = arith.maximumf %160, %161 : vector<4x32xf32>
    %163 = vector.extract_strided_slice %33 {offsets = [128, 0], sizes = [32, 32], strides = [1, 1]} : vector<160x32xf32> to vector<32x32xf32>
    %cst_43 = arith.constant dense<0.000000e+00> : vector<4x32xf32>
    %164 = tpu.matmul %162, %163, %cst_43 {dimension_numbers = #tpu.dot_dimension_numbers<[1], [0], [0], [1], [0, 0, 1, 1], [], []>} : vector<4x32xf32>, vector<32x32xf32>, vector<4x32xf32> -> vector<4x32xf32>
    %165 = arith.addf %162, %164 : vector<4x32xf32>
    %166 = vector.extract_strided_slice %34 {offsets = [12, 0], sizes = [1, 32], strides = [1, 1]} : vector<15x32xf32> to vector<1x32xf32>
    %167 = vector.broadcast %166 : vector<1x32xf32> to vector<4x32xf32>
    %168 = arith.addf %165, %167 : vector<4x32xf32>
    %169 = vector.extract_strided_slice %34 {offsets = [13, 0], sizes = [1, 32], strides = [1, 1]} : vector<15x32xf32> to vector<1x32xf32>
    %170 = vector.extract_strided_slice %34 {offsets = [14, 0], sizes = [1, 32], strides = [1, 1]} : vector<15x32xf32> to vector<1x32xf32>
    %cst_44 = arith.constant dense<0.000000e+00> : vector<32xf32>
    %171 = vector.multi_reduction <add>, %168, %cst_44 [0] : vector<4x32xf32> to vector<32xf32>
    %172 = vector.shape_cast %171 : vector<32xf32> to vector<1x32xf32>
    %cst_45 = arith.constant 4.000000e+00 : f32
    %173 = vector.broadcast %cst_45 : f32 to vector<1x32xf32>
    %174 = arith.divf %172, %173 : vector<1x32xf32>
    %175 = vector.broadcast %174 : vector<1x32xf32> to vector<4x32xf32>
    %176 = arith.subf %168, %175 : vector<4x32xf32>
    %177 = arith.mulf %176, %176 : vector<4x32xf32>
    %cst_46 = arith.constant dense<0.000000e+00> : vector<32xf32>
    %178 = vector.multi_reduction <add>, %177, %cst_46 [0] : vector<4x32xf32> to vector<32xf32>
    %179 = vector.shape_cast %178 : vector<32xf32> to vector<1x32xf32>
    %cst_47 = arith.constant 4.000000e+00 : f32
    %180 = vector.broadcast %cst_47 : f32 to vector<1x32xf32>
    %181 = arith.divf %179, %180 : vector<1x32xf32>
    %182 = vector.broadcast %174 : vector<1x32xf32> to vector<4x32xf32>
    %183 = arith.subf %168, %182 : vector<4x32xf32>
    %cst_48 = arith.constant 9.99999974E-6 : f32
    %184 = vector.broadcast %cst_48 : f32 to vector<1x32xf32>
    %185 = arith.addf %181, %184 : vector<1x32xf32>
    %186 = math.rsqrt %185 : vector<1x32xf32>
    %187 = vector.broadcast %186 : vector<1x32xf32> to vector<4x32xf32>
    %188 = arith.mulf %183, %187 : vector<4x32xf32>
    %189 = vector.broadcast %169 : vector<1x32xf32> to vector<4x32xf32>
    %190 = arith.mulf %188, %189 : vector<4x32xf32>
    %191 = vector.broadcast %170 : vector<1x32xf32> to vector<4x32xf32>
    %192 = arith.addf %190, %191 : vector<4x32xf32>
    %cst_49 = arith.constant 0.000000e+00 : f32
    %193 = vector.broadcast %cst_49 : f32 to vector<4x32xf32>
    %194 = arith.maximumf %192, %193 : vector<4x32xf32>
    %c0_50 = arith.constant 0 : index
    %c0_51 = arith.constant 0 : index
    %195 = vector.load %arg7[%c0_50, %c0_51] : memref<3x60xf32, #tpu.memory_space<vmem>>, vector<3x60xf32>
    %c0_52 = arith.constant 0 : index
    %c0_53 = arith.constant 0 : index
    %196 = vector.load %arg6[%c0_52, %c0_53] : memref<32x60xf32, #tpu.memory_space<vmem>>, vector<32x60xf32>
    %cst_54 = arith.constant dense<0.000000e+00> : vector<4x60xf32>
    %197 = tpu.matmul %194, %196, %cst_54 {dimension_numbers = #tpu.dot_dimension_numbers<[1], [0], [0], [1], [0, 0, 1, 1], [], []>} : vector<4x32xf32>, vector<32x60xf32>, vector<4x60xf32> -> vector<4x60xf32>
    %198 = vector.extract_strided_slice %195 {offsets = [0, 0], sizes = [1, 60], strides = [1, 1]} : vector<3x60xf32> to vector<1x60xf32>
    %199 = vector.broadcast %198 : vector<1x60xf32> to vector<4x60xf32>
    %200 = arith.addf %197, %199 : vector<4x60xf32>
    %201 = vector.extract_strided_slice %195 {offsets = [1, 0], sizes = [1, 60], strides = [1, 1]} : vector<3x60xf32> to vector<1x60xf32>
    %202 = vector.extract_strided_slice %195 {offsets = [2, 0], sizes = [1, 60], strides = [1, 1]} : vector<3x60xf32> to vector<1x60xf32>
    %cst_55 = arith.constant dense<0.000000e+00> : vector<60xf32>
    %203 = vector.multi_reduction <add>, %200, %cst_55 [0] : vector<4x60xf32> to vector<60xf32>
    %204 = vector.shape_cast %203 : vector<60xf32> to vector<1x60xf32>
    %cst_56 = arith.constant 4.000000e+00 : f32
    %205 = vector.broadcast %cst_56 : f32 to vector<1x60xf32>
    %206 = arith.divf %204, %205 : vector<1x60xf32>
    %207 = vector.broadcast %206 : vector<1x60xf32> to vector<4x60xf32>
    %208 = arith.subf %200, %207 : vector<4x60xf32>
    %209 = arith.mulf %208, %208 : vector<4x60xf32>
    %cst_57 = arith.constant dense<0.000000e+00> : vector<60xf32>
    %210 = vector.multi_reduction <add>, %209, %cst_57 [0] : vector<4x60xf32> to vector<60xf32>
    %211 = vector.shape_cast %210 : vector<60xf32> to vector<1x60xf32>
    %cst_58 = arith.constant 4.000000e+00 : f32
    %212 = vector.broadcast %cst_58 : f32 to vector<1x60xf32>
    %213 = arith.divf %211, %212 : vector<1x60xf32>
    %214 = vector.broadcast %206 : vector<1x60xf32> to vector<4x60xf32>
    %215 = arith.subf %200, %214 : vector<4x60xf32>
    %cst_59 = arith.constant 9.99999974E-6 : f32
    %216 = vector.broadcast %cst_59 : f32 to vector<1x60xf32>
    %217 = arith.addf %213, %216 : vector<1x60xf32>
    %218 = math.rsqrt %217 : vector<1x60xf32>
    %219 = vector.broadcast %218 : vector<1x60xf32> to vector<4x60xf32>
    %220 = arith.mulf %215, %219 : vector<4x60xf32>
    %221 = vector.broadcast %201 : vector<1x60xf32> to vector<4x60xf32>
    %222 = arith.mulf %220, %221 : vector<4x60xf32>
    %223 = vector.broadcast %202 : vector<1x60xf32> to vector<4x60xf32>
    %224 = arith.addf %222, %223 : vector<4x60xf32>
    %c0_60 = arith.constant 0 : index
    %c0_61 = arith.constant 0 : index
    %225 = vector.load %arg8[%c0_60, %c0_61] : memref<60x256xf32, #tpu.memory_space<vmem>>, vector<60x256xf32>
    %cst_62 = arith.constant dense<0.000000e+00> : vector<4x256xf32>
    %226 = tpu.matmul %224, %225, %cst_62 {dimension_numbers = #tpu.dot_dimension_numbers<[1], [0], [0], [1], [0, 0, 1, 1], [], []>} : vector<4x60xf32>, vector<60x256xf32>, vector<4x256xf32> -> vector<4x256xf32>
    %c0_63 = arith.constant 0 : index
    %c0_64 = arith.constant 0 : index
    %227 = vector.load %arg9[%c0_63, %c0_64] : memref<1x256xf32, #tpu.memory_space<vmem>>, vector<1x256xf32>
    %228 = vector.broadcast %227 : vector<1x256xf32> to vector<4x256xf32>
    %229 = arith.addf %226, %228 : vector<4x256xf32>
    %230 = vector.extract_strided_slice %229 {offsets = [0, 0], sizes = [4, 32], strides = [1, 1]} : vector<4x256xf32> to vector<4x32xf32>
    %231 = vector.extract_strided_slice %229 {offsets = [0, 32], sizes = [4, 32], strides = [1, 1]} : vector<4x256xf32> to vector<4x32xf32>
    %232 = vector.extract_strided_slice %229 {offsets = [0, 64], sizes = [4, 64], strides = [1, 1]} : vector<4x256xf32> to vector<4x64xf32>
    %233 = vector.extract_strided_slice %229 {offsets = [0, 128], sizes = [4, 128], strides = [1, 1]} : vector<4x256xf32> to vector<4x128xf32>
    %c0_65 = arith.constant 0 : index
    %c0_66 = arith.constant 0 : index
    %234 = vector.load %arg10[%c0_65, %c0_66] : memref<32x64xf32, #tpu.memory_space<vmem>>, vector<32x64xf32>
    %cst_67 = arith.constant dense<0.000000e+00> : vector<4x64xf32>
    %235 = tpu.matmul %230, %234, %cst_67 {dimension_numbers = #tpu.dot_dimension_numbers<[1], [0], [0], [1], [0, 0, 1, 1], [], []>} : vector<4x32xf32>, vector<32x64xf32>, vector<4x64xf32> -> vector<4x64xf32>
    %c0_68 = arith.constant 0 : index
    %c0_69 = arith.constant 0 : index
    %236 = vector.load %arg11[%c0_68, %c0_69] : memref<1x64xf32, #tpu.memory_space<vmem>>, vector<1x64xf32>
    %237 = vector.broadcast %236 : vector<1x64xf32> to vector<4x64xf32>
    %238 = arith.addf %235, %237 : vector<4x64xf32>
    %c0_70 = arith.constant 0 : index
    %c0_71 = arith.constant 0 : index
    %239 = vector.load %arg14[%c0_70, %c0_71] : memref<32x32xf32, #tpu.memory_space<vmem>>, vector<32x32xf32>
    %c0_72 = arith.constant 0 : index
    %c0_73 = arith.constant 0 : index
    %240 = vector.load %arg12[%c0_72, %c0_73] : memref<64x32xf32, #tpu.memory_space<vmem>>, vector<64x32xf32>
    %cst_74 = arith.constant dense<0.000000e+00> : vector<4x32xf32>
    %241 = tpu.matmul %238, %240, %cst_74 {dimension_numbers = #tpu.dot_dimension_numbers<[1], [0], [0], [1], [0, 0, 1, 1], [], []>} : vector<4x64xf32>, vector<64x32xf32>, vector<4x32xf32> -> vector<4x32xf32>
    %c0_75 = arith.constant 0 : index
    %c0_76 = arith.constant 0 : index
    %242 = vector.load %arg15[%c0_75, %c0_76] : memref<2x32xf32, #tpu.memory_space<vmem>>, vector<2x32xf32>
    %cst_77 = arith.constant dense<0.000000e+00> : vector<4x32xf32>
    %243 = tpu.matmul %241, %239, %cst_77 {dimension_numbers = #tpu.dot_dimension_numbers<[1], [0], [0], [1], [0, 0, 1, 1], [], []>} : vector<4x32xf32>, vector<32x32xf32>, vector<4x32xf32> -> vector<4x32xf32>
    %cst_78 = arith.constant dense<0.000000e+00> : vector<32xf32>
    %244 = vector.multi_reduction <add>, %243, %cst_78 [0] : vector<4x32xf32> to vector<32xf32>
    %245 = vector.shape_cast %244 : vector<32xf32> to vector<1x32xf32>
    %246 = vector.broadcast %245 : vector<1x32xf32> to vector<4x32xf32>
    %247 = arith.subf %241, %246 : vector<4x32xf32>
    %248 = arith.mulf %247, %247 : vector<4x32xf32>
    %cst_79 = arith.constant dense<0.000000e+00> : vector<4x32xf32>
    %249 = tpu.matmul %248, %239, %cst_79 {dimension_numbers = #tpu.dot_dimension_numbers<[1], [0], [0], [1], [0, 0, 1, 1], [], []>} : vector<4x32xf32>, vector<32x32xf32>, vector<4x32xf32> -> vector<4x32xf32>
    %cst_80 = arith.constant dense<0.000000e+00> : vector<32xf32>
    %250 = vector.multi_reduction <add>, %249, %cst_80 [0] : vector<4x32xf32> to vector<32xf32>
    %251 = vector.shape_cast %250 : vector<32xf32> to vector<1x32xf32>
    %cst_81 = arith.constant 9.99999974E-6 : f32
    %252 = vector.broadcast %cst_81 : f32 to vector<1x32xf32>
    %253 = arith.addf %251, %252 : vector<1x32xf32>
    %254 = math.rsqrt %253 : vector<1x32xf32>
    %255 = vector.broadcast %254 : vector<1x32xf32> to vector<4x32xf32>
    %256 = arith.mulf %247, %255 : vector<4x32xf32>
    %257 = vector.extract_strided_slice %242 {offsets = [0, 0], sizes = [1, 32], strides = [1, 1]} : vector<2x32xf32> to vector<1x32xf32>
    %258 = vector.broadcast %257 : vector<1x32xf32> to vector<4x32xf32>
    %259 = arith.mulf %256, %258 : vector<4x32xf32>
    %260 = vector.extract_strided_slice %242 {offsets = [1, 0], sizes = [1, 32], strides = [1, 1]} : vector<2x32xf32> to vector<1x32xf32>
    %261 = vector.broadcast %260 : vector<1x32xf32> to vector<4x32xf32>
    %262 = arith.addf %259, %261 : vector<4x32xf32>
    %cst_82 = arith.constant 0.000000e+00 : f32
    %263 = vector.broadcast %cst_82 : f32 to vector<4x32xf32>
    %264 = arith.maximumf %262, %263 : vector<4x32xf32>
    %c0_83 = arith.constant 0 : index
    %c0_84 = arith.constant 0 : index
    %265 = vector.load %arg13[%c0_83, %c0_84] : memref<32x32xf32, #tpu.memory_space<vmem>>, vector<32x32xf32>
    %cst_85 = arith.constant dense<0.000000e+00> : vector<4x32xf32>
    %266 = tpu.matmul %264, %265, %cst_85 {dimension_numbers = #tpu.dot_dimension_numbers<[1], [0], [0], [1], [0, 0, 1, 1], [], []>} : vector<4x32xf32>, vector<32x32xf32>, vector<4x32xf32> -> vector<4x32xf32>
    %c0_86 = arith.constant 0 : index
    %c0_87 = arith.constant 0 : index
    %267 = vector.load %arg16[%c0_86, %c0_87] : memref<2x32xf32, #tpu.memory_space<vmem>>, vector<2x32xf32>
    %cst_88 = arith.constant dense<0.000000e+00> : vector<4x32xf32>
    %268 = tpu.matmul %266, %239, %cst_88 {dimension_numbers = #tpu.dot_dimension_numbers<[1], [0], [0], [1], [0, 0, 1, 1], [], []>} : vector<4x32xf32>, vector<32x32xf32>, vector<4x32xf32> -> vector<4x32xf32>
    %cst_89 = arith.constant dense<0.000000e+00> : vector<32xf32>
    %269 = vector.multi_reduction <add>, %268, %cst_89 [0] : vector<4x32xf32> to vector<32xf32>
    %270 = vector.shape_cast %269 : vector<32xf32> to vector<1x32xf32>
    %271 = vector.broadcast %270 : vector<1x32xf32> to vector<4x32xf32>
    %272 = arith.subf %266, %271 : vector<4x32xf32>
    %273 = arith.mulf %272, %272 : vector<4x32xf32>
    %cst_90 = arith.constant dense<0.000000e+00> : vector<4x32xf32>
    %274 = tpu.matmul %273, %239, %cst_90 {dimension_numbers = #tpu.dot_dimension_numbers<[1], [0], [0], [1], [0, 0, 1, 1], [], []>} : vector<4x32xf32>, vector<32x32xf32>, vector<4x32xf32> -> vector<4x32xf32>
    %cst_91 = arith.constant dense<0.000000e+00> : vector<32xf32>
    %275 = vector.multi_reduction <add>, %274, %cst_91 [0] : vector<4x32xf32> to vector<32xf32>
    %276 = vector.shape_cast %275 : vector<32xf32> to vector<1x32xf32>
    %cst_92 = arith.constant 9.99999974E-6 : f32
    %277 = vector.broadcast %cst_92 : f32 to vector<1x32xf32>
    %278 = arith.addf %276, %277 : vector<1x32xf32>
    %279 = math.rsqrt %278 : vector<1x32xf32>
    %280 = vector.broadcast %279 : vector<1x32xf32> to vector<4x32xf32>
    %281 = arith.mulf %272, %280 : vector<4x32xf32>
    %282 = vector.extract_strided_slice %267 {offsets = [0, 0], sizes = [1, 32], strides = [1, 1]} : vector<2x32xf32> to vector<1x32xf32>
    %283 = vector.broadcast %282 : vector<1x32xf32> to vector<4x32xf32>
    %284 = arith.mulf %281, %283 : vector<4x32xf32>
    %285 = vector.extract_strided_slice %267 {offsets = [1, 0], sizes = [1, 32], strides = [1, 1]} : vector<2x32xf32> to vector<1x32xf32>
    %286 = vector.broadcast %285 : vector<1x32xf32> to vector<4x32xf32>
    %287 = arith.addf %284, %286 : vector<4x32xf32>
    %cst_93 = arith.constant 0.000000e+00 : f32
    %288 = vector.broadcast %cst_93 : f32 to vector<4x32xf32>
    %289 = arith.maximumf %287, %288 : vector<4x32xf32>
    %c0_94 = arith.constant 0 : index
    %c0_95 = arith.constant 0 : index
    %290 = vector.load %arg17[%c0_94, %c0_95] : memref<64x128xf32, #tpu.memory_space<vmem>>, vector<64x128xf32>
    %291 = vector.extract_strided_slice %290 {offsets = [0, 0], sizes = [32, 128], strides = [1, 1]} : vector<64x128xf32> to vector<32x128xf32>
    %cst_96 = arith.constant dense<0.000000e+00> : vector<4x128xf32>
    %292 = tpu.matmul %289, %291, %cst_96 {dimension_numbers = #tpu.dot_dimension_numbers<[1], [0], [0], [1], [0, 0, 1, 1], [], []>} : vector<4x32xf32>, vector<32x128xf32>, vector<4x128xf32> -> vector<4x128xf32>
    %293 = vector.extract_strided_slice %290 {offsets = [32, 0], sizes = [32, 128], strides = [1, 1]} : vector<64x128xf32> to vector<32x128xf32>
    %cst_97 = arith.constant dense<0.000000e+00> : vector<4x128xf32>
    %294 = tpu.matmul %231, %293, %cst_97 {dimension_numbers = #tpu.dot_dimension_numbers<[1], [0], [0], [1], [0, 0, 1, 1], [], []>} : vector<4x32xf32>, vector<32x128xf32>, vector<4x128xf32> -> vector<4x128xf32>
    %295 = arith.addf %292, %294 : vector<4x128xf32>
    %c0_98 = arith.constant 0 : index
    %c0_99 = arith.constant 0 : index
    %296 = vector.load %arg18[%c0_98, %c0_99] : memref<1x128xf32, #tpu.memory_space<vmem>>, vector<1x128xf32>
    %297 = vector.broadcast %296 : vector<1x128xf32> to vector<4x128xf32>
    %298 = arith.addf %295, %297 : vector<4x128xf32>
    %c0_100 = arith.constant 0 : index
    %c0_101 = arith.constant 0 : index
    %299 = vector.load %arg21[%c0_100, %c0_101] : memref<64x64xf32, #tpu.memory_space<vmem>>, vector<64x64xf32>
    %c0_102 = arith.constant 0 : index
    %c0_103 = arith.constant 0 : index
    %300 = vector.load %arg19[%c0_102, %c0_103] : memref<128x64xf32, #tpu.memory_space<vmem>>, vector<128x64xf32>
    %cst_104 = arith.constant dense<0.000000e+00> : vector<4x64xf32>
    %301 = tpu.matmul %298, %300, %cst_104 {dimension_numbers = #tpu.dot_dimension_numbers<[1], [0], [0], [1], [0, 0, 1, 1], [], []>} : vector<4x128xf32>, vector<128x64xf32>, vector<4x64xf32> -> vector<4x64xf32>
    %c0_105 = arith.constant 0 : index
    %c0_106 = arith.constant 0 : index
    %302 = vector.load %arg22[%c0_105, %c0_106] : memref<2x64xf32, #tpu.memory_space<vmem>>, vector<2x64xf32>
    %cst_107 = arith.constant dense<0.000000e+00> : vector<4x64xf32>
    %303 = tpu.matmul %301, %299, %cst_107 {dimension_numbers = #tpu.dot_dimension_numbers<[1], [0], [0], [1], [0, 0, 1, 1], [], []>} : vector<4x64xf32>, vector<64x64xf32>, vector<4x64xf32> -> vector<4x64xf32>
    %cst_108 = arith.constant dense<0.000000e+00> : vector<64xf32>
    %304 = vector.multi_reduction <add>, %303, %cst_108 [0] : vector<4x64xf32> to vector<64xf32>
    %305 = vector.shape_cast %304 : vector<64xf32> to vector<1x64xf32>
    %306 = vector.broadcast %305 : vector<1x64xf32> to vector<4x64xf32>
    %307 = arith.subf %301, %306 : vector<4x64xf32>
    %308 = arith.mulf %307, %307 : vector<4x64xf32>
    %cst_109 = arith.constant dense<0.000000e+00> : vector<4x64xf32>
    %309 = tpu.matmul %308, %299, %cst_109 {dimension_numbers = #tpu.dot_dimension_numbers<[1], [0], [0], [1], [0, 0, 1, 1], [], []>} : vector<4x64xf32>, vector<64x64xf32>, vector<4x64xf32> -> vector<4x64xf32>
    %cst_110 = arith.constant dense<0.000000e+00> : vector<64xf32>
    %310 = vector.multi_reduction <add>, %309, %cst_110 [0] : vector<4x64xf32> to vector<64xf32>
    %311 = vector.shape_cast %310 : vector<64xf32> to vector<1x64xf32>
    %cst_111 = arith.constant 9.99999974E-6 : f32
    %312 = vector.broadcast %cst_111 : f32 to vector<1x64xf32>
    %313 = arith.addf %311, %312 : vector<1x64xf32>
    %314 = math.rsqrt %313 : vector<1x64xf32>
    %315 = vector.broadcast %314 : vector<1x64xf32> to vector<4x64xf32>
    %316 = arith.mulf %307, %315 : vector<4x64xf32>
    %317 = vector.extract_strided_slice %302 {offsets = [0, 0], sizes = [1, 64], strides = [1, 1]} : vector<2x64xf32> to vector<1x64xf32>
    %318 = vector.broadcast %317 : vector<1x64xf32> to vector<4x64xf32>
    %319 = arith.mulf %316, %318 : vector<4x64xf32>
    %320 = vector.extract_strided_slice %302 {offsets = [1, 0], sizes = [1, 64], strides = [1, 1]} : vector<2x64xf32> to vector<1x64xf32>
    %321 = vector.broadcast %320 : vector<1x64xf32> to vector<4x64xf32>
    %322 = arith.addf %319, %321 : vector<4x64xf32>
    %cst_112 = arith.constant 0.000000e+00 : f32
    %323 = vector.broadcast %cst_112 : f32 to vector<4x64xf32>
    %324 = arith.maximumf %322, %323 : vector<4x64xf32>
    %c0_113 = arith.constant 0 : index
    %c0_114 = arith.constant 0 : index
    %325 = vector.load %arg20[%c0_113, %c0_114] : memref<64x64xf32, #tpu.memory_space<vmem>>, vector<64x64xf32>
    %cst_115 = arith.constant dense<0.000000e+00> : vector<4x64xf32>
    %326 = tpu.matmul %324, %325, %cst_115 {dimension_numbers = #tpu.dot_dimension_numbers<[1], [0], [0], [1], [0, 0, 1, 1], [], []>} : vector<4x64xf32>, vector<64x64xf32>, vector<4x64xf32> -> vector<4x64xf32>
    %c0_116 = arith.constant 0 : index
    %c0_117 = arith.constant 0 : index
    %327 = vector.load %arg23[%c0_116, %c0_117] : memref<2x64xf32, #tpu.memory_space<vmem>>, vector<2x64xf32>
    %cst_118 = arith.constant dense<0.000000e+00> : vector<4x64xf32>
    %328 = tpu.matmul %326, %299, %cst_118 {dimension_numbers = #tpu.dot_dimension_numbers<[1], [0], [0], [1], [0, 0, 1, 1], [], []>} : vector<4x64xf32>, vector<64x64xf32>, vector<4x64xf32> -> vector<4x64xf32>
    %cst_119 = arith.constant dense<0.000000e+00> : vector<64xf32>
    %329 = vector.multi_reduction <add>, %328, %cst_119 [0] : vector<4x64xf32> to vector<64xf32>
    %330 = vector.shape_cast %329 : vector<64xf32> to vector<1x64xf32>
    %331 = vector.broadcast %330 : vector<1x64xf32> to vector<4x64xf32>
    %332 = arith.subf %326, %331 : vector<4x64xf32>
    %333 = arith.mulf %332, %332 : vector<4x64xf32>
    %cst_120 = arith.constant dense<0.000000e+00> : vector<4x64xf32>
    %334 = tpu.matmul %333, %299, %cst_120 {dimension_numbers = #tpu.dot_dimension_numbers<[1], [0], [0], [1], [0, 0, 1, 1], [], []>} : vector<4x64xf32>, vector<64x64xf32>, vector<4x64xf32> -> vector<4x64xf32>
    %cst_121 = arith.constant dense<0.000000e+00> : vector<64xf32>
    %335 = vector.multi_reduction <add>, %334, %cst_121 [0] : vector<4x64xf32> to vector<64xf32>
    %336 = vector.shape_cast %335 : vector<64xf32> to vector<1x64xf32>
    %cst_122 = arith.constant 9.99999974E-6 : f32
    %337 = vector.broadcast %cst_122 : f32 to vector<1x64xf32>
    %338 = arith.addf %336, %337 : vector<1x64xf32>
    %339 = math.rsqrt %338 : vector<1x64xf32>
    %340 = vector.broadcast %339 : vector<1x64xf32> to vector<4x64xf32>
    %341 = arith.mulf %332, %340 : vector<4x64xf32>
    %342 = vector.extract_strided_slice %327 {offsets = [0, 0], sizes = [1, 64], strides = [1, 1]} : vector<2x64xf32> to vector<1x64xf32>
    %343 = vector.broadcast %342 : vector<1x64xf32> to vector<4x64xf32>
    %344 = arith.mulf %341, %343 : vector<4x64xf32>
    %345 = vector.extract_strided_slice %327 {offsets = [1, 0], sizes = [1, 64], strides = [1, 1]} : vector<2x64xf32> to vector<1x64xf32>
    %346 = vector.broadcast %345 : vector<1x64xf32> to vector<4x64xf32>
    %347 = arith.addf %344, %346 : vector<4x64xf32>
    %cst_123 = arith.constant 0.000000e+00 : f32
    %348 = vector.broadcast %cst_123 : f32 to vector<4x64xf32>
    %349 = arith.maximumf %347, %348 : vector<4x64xf32>
    %c0_124 = arith.constant 0 : index
    %c0_125 = arith.constant 0 : index
    %350 = vector.load %arg24[%c0_124, %c0_125] : memref<128x256xf32, #tpu.memory_space<vmem>>, vector<128x256xf32>
    %351 = vector.extract_strided_slice %350 {offsets = [0, 0], sizes = [64, 256], strides = [1, 1]} : vector<128x256xf32> to vector<64x256xf32>
    %cst_126 = arith.constant dense<0.000000e+00> : vector<4x256xf32>
    %352 = tpu.matmul %349, %351, %cst_126 {dimension_numbers = #tpu.dot_dimension_numbers<[1], [0], [0], [1], [0, 0, 1, 1], [], []>} : vector<4x64xf32>, vector<64x256xf32>, vector<4x256xf32> -> vector<4x256xf32>
    %353 = vector.extract_strided_slice %350 {offsets = [64, 0], sizes = [64, 256], strides = [1, 1]} : vector<128x256xf32> to vector<64x256xf32>
    %cst_127 = arith.constant dense<0.000000e+00> : vector<4x256xf32>
    %354 = tpu.matmul %232, %353, %cst_127 {dimension_numbers = #tpu.dot_dimension_numbers<[1], [0], [0], [1], [0, 0, 1, 1], [], []>} : vector<4x64xf32>, vector<64x256xf32>, vector<4x256xf32> -> vector<4x256xf32>
    %355 = arith.addf %352, %354 : vector<4x256xf32>
    %c0_128 = arith.constant 0 : index
    %c0_129 = arith.constant 0 : index
    %356 = vector.load %arg25[%c0_128, %c0_129] : memref<1x256xf32, #tpu.memory_space<vmem>>, vector<1x256xf32>
    %357 = vector.broadcast %356 : vector<1x256xf32> to vector<4x256xf32>
    %358 = arith.addf %355, %357 : vector<4x256xf32>
    %c0_130 = arith.constant 0 : index
    %c0_131 = arith.constant 0 : index
    %359 = vector.load %arg28[%c0_130, %c0_131] : memref<128x128xf32, #tpu.memory_space<vmem>>, vector<128x128xf32>
    %c0_132 = arith.constant 0 : index
    %c0_133 = arith.constant 0 : index
    %360 = vector.load %arg26[%c0_132, %c0_133] : memref<256x128xf32, #tpu.memory_space<vmem>>, vector<256x128xf32>
    %cst_134 = arith.constant dense<0.000000e+00> : vector<4x128xf32>
    %361 = tpu.matmul %358, %360, %cst_134 {dimension_numbers = #tpu.dot_dimension_numbers<[1], [0], [0], [1], [0, 0, 1, 1], [], []>} : vector<4x256xf32>, vector<256x128xf32>, vector<4x128xf32> -> vector<4x128xf32>
    %c0_135 = arith.constant 0 : index
    %c0_136 = arith.constant 0 : index
    %362 = vector.load %arg29[%c0_135, %c0_136] : memref<2x128xf32, #tpu.memory_space<vmem>>, vector<2x128xf32>
    %cst_137 = arith.constant dense<0.000000e+00> : vector<4x128xf32>
    %363 = tpu.matmul %361, %359, %cst_137 {dimension_numbers = #tpu.dot_dimension_numbers<[1], [0], [0], [1], [0, 0, 1, 1], [], []>} : vector<4x128xf32>, vector<128x128xf32>, vector<4x128xf32> -> vector<4x128xf32>
    %cst_138 = arith.constant dense<0.000000e+00> : vector<128xf32>
    %364 = vector.multi_reduction <add>, %363, %cst_138 [0] : vector<4x128xf32> to vector<128xf32>
    %365 = vector.shape_cast %364 : vector<128xf32> to vector<1x128xf32>
    %366 = vector.broadcast %365 : vector<1x128xf32> to vector<4x128xf32>
    %367 = arith.subf %361, %366 : vector<4x128xf32>
    %368 = arith.mulf %367, %367 : vector<4x128xf32>
    %cst_139 = arith.constant dense<0.000000e+00> : vector<4x128xf32>
    %369 = tpu.matmul %368, %359, %cst_139 {dimension_numbers = #tpu.dot_dimension_numbers<[1], [0], [0], [1], [0, 0, 1, 1], [], []>} : vector<4x128xf32>, vector<128x128xf32>, vector<4x128xf32> -> vector<4x128xf32>
    %cst_140 = arith.constant dense<0.000000e+00> : vector<128xf32>
    %370 = vector.multi_reduction <add>, %369, %cst_140 [0] : vector<4x128xf32> to vector<128xf32>
    %371 = vector.shape_cast %370 : vector<128xf32> to vector<1x128xf32>
    %cst_141 = arith.constant 9.99999974E-6 : f32
    %372 = vector.broadcast %cst_141 : f32 to vector<1x128xf32>
    %373 = arith.addf %371, %372 : vector<1x128xf32>
    %374 = math.rsqrt %373 : vector<1x128xf32>
    %375 = vector.broadcast %374 : vector<1x128xf32> to vector<4x128xf32>
    %376 = arith.mulf %367, %375 : vector<4x128xf32>
    %377 = vector.extract_strided_slice %362 {offsets = [0, 0], sizes = [1, 128], strides = [1, 1]} : vector<2x128xf32> to vector<1x128xf32>
    %378 = vector.broadcast %377 : vector<1x128xf32> to vector<4x128xf32>
    %379 = arith.mulf %376, %378 : vector<4x128xf32>
    %380 = vector.extract_strided_slice %362 {offsets = [1, 0], sizes = [1, 128], strides = [1, 1]} : vector<2x128xf32> to vector<1x128xf32>
    %381 = vector.broadcast %380 : vector<1x128xf32> to vector<4x128xf32>
    %382 = arith.addf %379, %381 : vector<4x128xf32>
    %cst_142 = arith.constant 0.000000e+00 : f32
    %383 = vector.broadcast %cst_142 : f32 to vector<4x128xf32>
    %384 = arith.maximumf %382, %383 : vector<4x128xf32>
    %c0_143 = arith.constant 0 : index
    %c0_144 = arith.constant 0 : index
    %385 = vector.load %arg27[%c0_143, %c0_144] : memref<128x128xf32, #tpu.memory_space<vmem>>, vector<128x128xf32>
    %cst_145 = arith.constant dense<0.000000e+00> : vector<4x128xf32>
    %386 = tpu.matmul %384, %385, %cst_145 {dimension_numbers = #tpu.dot_dimension_numbers<[1], [0], [0], [1], [0, 0, 1, 1], [], []>} : vector<4x128xf32>, vector<128x128xf32>, vector<4x128xf32> -> vector<4x128xf32>
    %c0_146 = arith.constant 0 : index
    %c0_147 = arith.constant 0 : index
    %387 = vector.load %arg30[%c0_146, %c0_147] : memref<2x128xf32, #tpu.memory_space<vmem>>, vector<2x128xf32>
    %cst_148 = arith.constant dense<0.000000e+00> : vector<4x128xf32>
    %388 = tpu.matmul %386, %359, %cst_148 {dimension_numbers = #tpu.dot_dimension_numbers<[1], [0], [0], [1], [0, 0, 1, 1], [], []>} : vector<4x128xf32>, vector<128x128xf32>, vector<4x128xf32> -> vector<4x128xf32>
    %cst_149 = arith.constant dense<0.000000e+00> : vector<128xf32>
    %389 = vector.multi_reduction <add>, %388, %cst_149 [0] : vector<4x128xf32> to vector<128xf32>
    %390 = vector.shape_cast %389 : vector<128xf32> to vector<1x128xf32>
    %391 = vector.broadcast %390 : vector<1x128xf32> to vector<4x128xf32>
    %392 = arith.subf %386, %391 : vector<4x128xf32>
    %393 = arith.mulf %392, %392 : vector<4x128xf32>
    %cst_150 = arith.constant dense<0.000000e+00> : vector<4x128xf32>
    %394 = tpu.matmul %393, %359, %cst_150 {dimension_numbers = #tpu.dot_dimension_numbers<[1], [0], [0], [1], [0, 0, 1, 1], [], []>} : vector<4x128xf32>, vector<128x128xf32>, vector<4x128xf32> -> vector<4x128xf32>
    %cst_151 = arith.constant dense<0.000000e+00> : vector<128xf32>
    %395 = vector.multi_reduction <add>, %394, %cst_151 [0] : vector<4x128xf32> to vector<128xf32>
    %396 = vector.shape_cast %395 : vector<128xf32> to vector<1x128xf32>
    %cst_152 = arith.constant 9.99999974E-6 : f32
    %397 = vector.broadcast %cst_152 : f32 to vector<1x128xf32>
    %398 = arith.addf %396, %397 : vector<1x128xf32>
    %399 = math.rsqrt %398 : vector<1x128xf32>
    %400 = vector.broadcast %399 : vector<1x128xf32> to vector<4x128xf32>
    %401 = arith.mulf %392, %400 : vector<4x128xf32>
    %402 = vector.extract_strided_slice %387 {offsets = [0, 0], sizes = [1, 128], strides = [1, 1]} : vector<2x128xf32> to vector<1x128xf32>
    %403 = vector.broadcast %402 : vector<1x128xf32> to vector<4x128xf32>
    %404 = arith.mulf %401, %403 : vector<4x128xf32>
    %405 = vector.extract_strided_slice %387 {offsets = [1, 0], sizes = [1, 128], strides = [1, 1]} : vector<2x128xf32> to vector<1x128xf32>
    %406 = vector.broadcast %405 : vector<1x128xf32> to vector<4x128xf32>
    %407 = arith.addf %404, %406 : vector<4x128xf32>
    %cst_153 = arith.constant 0.000000e+00 : f32
    %408 = vector.broadcast %cst_153 : f32 to vector<4x128xf32>
    %409 = arith.maximumf %407, %408 : vector<4x128xf32>
    %c0_154 = arith.constant 0 : index
    %c0_155 = arith.constant 0 : index
    %410 = vector.load %arg31[%c0_154, %c0_155] : memref<256x128xf32, #tpu.memory_space<vmem>>, vector<256x128xf32>
    %411 = vector.extract_strided_slice %410 {offsets = [0, 0], sizes = [128, 128], strides = [1, 1]} : vector<256x128xf32> to vector<128x128xf32>
    %cst_156 = arith.constant dense<0.000000e+00> : vector<4x128xf32>
    %412 = tpu.matmul %409, %411, %cst_156 {dimension_numbers = #tpu.dot_dimension_numbers<[1], [0], [0], [1], [0, 0, 1, 1], [], []>} : vector<4x128xf32>, vector<128x128xf32>, vector<4x128xf32> -> vector<4x128xf32>
    %413 = vector.extract_strided_slice %410 {offsets = [128, 0], sizes = [128, 128], strides = [1, 1]} : vector<256x128xf32> to vector<128x128xf32>
    %cst_157 = arith.constant dense<0.000000e+00> : vector<4x128xf32>
    %414 = tpu.matmul %233, %413, %cst_157 {dimension_numbers = #tpu.dot_dimension_numbers<[1], [0], [0], [1], [0, 0, 1, 1], [], []>} : vector<4x128xf32>, vector<128x128xf32>, vector<4x128xf32> -> vector<4x128xf32>
    %415 = arith.addf %412, %414 : vector<4x128xf32>
    %c0_158 = arith.constant 0 : index
    %c0_159 = arith.constant 0 : index
    %416 = vector.load %arg32[%c0_158, %c0_159] : memref<1x128xf32, #tpu.memory_space<vmem>>, vector<1x128xf32>
    %417 = vector.broadcast %416 : vector<1x128xf32> to vector<4x128xf32>
    %418 = arith.addf %415, %417 : vector<4x128xf32>
    %c0_160 = arith.constant 0 : index
    %c0_161 = arith.constant 0 : index
    %419 = vector.load %arg33[%c0_160, %c0_161] : memref<4x128xf32, #tpu.memory_space<vmem>>, vector<4x128xf32>
    tpu.vector_store %arg33[%c0_160, %c0_161], %418 {strides = array<i32>} : memref<4x128xf32, #tpu.memory_space<vmem>>, vector<4x128xf32>,
    return
  }
  func.func @transform_0(%arg0: i32) -> (i32, i32) {
    %c0_i32 = arith.constant 0 : i32
    %c0_i32_0 = arith.constant 0 : i32
    %c0_i32_1 = arith.constant 0 : i32
    return %c0_i32, %c0_i32_0 : i32, i32
  }
  func.func @transform_1(%arg0: i32) -> (i32, i32) {
    %c0_i32 = arith.constant 0 : i32
    %c0_i32_0 = arith.constant 0 : i32
    %c0_i32_1 = arith.constant 0 : i32
    return %c0_i32, %c0_i32_0 : i32, i32
  }
  func.func @transform_2(%arg0: i32) -> (i32, i32) {
    %c0_i32 = arith.constant 0 : i32
    %c0_i32_0 = arith.constant 0 : i32
    %c0_i32_1 = arith.constant 0 : i32
    return %c0_i32, %c0_i32_0 : i32, i32
  }
  func.func @transform_3(%arg0: i32) -> (i32, i32) {
    %c0_i32 = arith.constant 0 : i32
    %c0_i32_0 = arith.constant 0 : i32
    %c0_i32_1 = arith.constant 0 : i32
    return %c0_i32, %c0_i32_0 : i32, i32
  }
  func.func @transform_4(%arg0: i32) -> (i32, i32) {
    %c0_i32 = arith.constant 0 : i32
    %c0_i32_0 = arith.constant 0 : i32
    %c0_i32_1 = arith.constant 0 : i32
    return %c0_i32, %c0_i32_0 : i32, i32
  }
  func.func @transform_5(%arg0: i32) -> (i32, i32) {
    %c0_i32 = arith.constant 0 : i32
    %c0_i32_0 = arith.constant 0 : i32
    %c0_i32_1 = arith.constant 0 : i32
    return %c0_i32, %c0_i32_0 : i32, i32
  }
  func.func @transform_6(%arg0: i32) -> (i32, i32) {
    %c0_i32 = arith.constant 0 : i32
    %c0_i32_0 = arith.constant 0 : i32
    %c0_i32_1 = arith.constant 0 : i32
    return %c0_i32, %c0_i32_0 : i32, i32
  }
  func.func @transform_7(%arg0: i32) -> (i32, i32) {
    %c0_i32 = arith.constant 0 : i32
    %c0_i32_0 = arith.constant 0 : i32
    %c0_i32_1 = arith.constant 0 : i32
    return %c0_i32, %c0_i32_0 : i32, i32
  }
  func.func @transform_8(%arg0: i32) -> (i32, i32) {
    %c0_i32 = arith.constant 0 : i32
    %c0_i32_0 = arith.constant 0 : i32
    %c0_i32_1 = arith.constant 0 : i32
    return %c0_i32, %c0_i32_0 : i32, i32
  }
  func.func @transform_9(%arg0: i32) -> (i32, i32) {
    %c0_i32 = arith.constant 0 : i32
    %c0_i32_0 = arith.constant 0 : i32
    %c0_i32_1 = arith.constant 0 : i32
    return %c0_i32, %c0_i32_0 : i32, i32
  }
  func.func @transform_10(%arg0: i32) -> (i32, i32) {
    %c0_i32 = arith.constant 0 : i32
    %c0_i32_0 = arith.constant 0 : i32
    %c0_i32_1 = arith.constant 0 : i32
    return %c0_i32, %c0_i32_0 : i32, i32
  }
  func.func @transform_11(%arg0: i32) -> (i32, i32) {
    %c0_i32 = arith.constant 0 : i32
    %c0_i32_0 = arith.constant 0 : i32
    %c0_i32_1 = arith.constant 0 : i32
    return %c0_i32, %c0_i32_0 : i32, i32
  }
  func.func @transform_12(%arg0: i32) -> (i32, i32) {
    %c0_i32 = arith.constant 0 : i32
    %c0_i32_0 = arith.constant 0 : i32
    %c0_i32_1 = arith.constant 0 : i32
    return %c0_i32, %c0_i32_0 : i32, i32
  }
  func.func @transform_13(%arg0: i32) -> (i32, i32) {
    %c0_i32 = arith.constant 0 : i32
    %c0_i32_0 = arith.constant 0 : i32
    %c0_i32_1 = arith.constant 0 : i32
    return %c0_i32, %c0_i32_0 : i32, i32
  }
  func.func @transform_14(%arg0: i32) -> (i32, i32) {
    %c0_i32 = arith.constant 0 : i32
    %c0_i32_0 = arith.constant 0 : i32
    %c0_i32_1 = arith.constant 0 : i32
    return %c0_i32, %c0_i32_0 : i32, i32
  }
  func.func @transform_15(%arg0: i32) -> (i32, i32) {
    %c0_i32 = arith.constant 0 : i32
    %c0_i32_0 = arith.constant 0 : i32
    %c0_i32_1 = arith.constant 0 : i32
    return %c0_i32, %c0_i32_0 : i32, i32
  }
  func.func @transform_16(%arg0: i32) -> (i32, i32) {
    %c0_i32 = arith.constant 0 : i32
    %c0_i32_0 = arith.constant 0 : i32
    %c0_i32_1 = arith.constant 0 : i32
    return %c0_i32, %c0_i32_0 : i32, i32
  }
  func.func @transform_17(%arg0: i32) -> (i32, i32) {
    %c0_i32 = arith.constant 0 : i32
    %c0_i32_0 = arith.constant 0 : i32
    %c0_i32_1 = arith.constant 0 : i32
    return %c0_i32, %c0_i32_0 : i32, i32
  }
  func.func @transform_18(%arg0: i32) -> (i32, i32) {
    %c0_i32 = arith.constant 0 : i32
    %c0_i32_0 = arith.constant 0 : i32
    %c0_i32_1 = arith.constant 0 : i32
    return %c0_i32, %c0_i32_0 : i32, i32
  }
  func.func @transform_19(%arg0: i32) -> (i32, i32) {
    %c0_i32 = arith.constant 0 : i32
    %c0_i32_0 = arith.constant 0 : i32
    %c0_i32_1 = arith.constant 0 : i32
    return %c0_i32, %c0_i32_0 : i32, i32
  }
  func.func @transform_20(%arg0: i32) -> (i32, i32) {
    %c0_i32 = arith.constant 0 : i32
    %c0_i32_0 = arith.constant 0 : i32
    %c0_i32_1 = arith.constant 0 : i32
    return %c0_i32, %c0_i32_0 : i32, i32
  }
  func.func @transform_21(%arg0: i32) -> (i32, i32) {
    %c0_i32 = arith.constant 0 : i32
    %c0_i32_0 = arith.constant 0 : i32
    %c0_i32_1 = arith.constant 0 : i32
    return %c0_i32, %c0_i32_0 : i32, i32
  }
  func.func @transform_22(%arg0: i32) -> (i32, i32) {
    %c0_i32 = arith.constant 0 : i32
    %c0_i32_0 = arith.constant 0 : i32
    %c0_i32_1 = arith.constant 0 : i32
    return %c0_i32, %c0_i32_0 : i32, i32
  }
  func.func @transform_23(%arg0: i32) -> (i32, i32) {
    %c0_i32 = arith.constant 0 : i32
    %c0_i32_0 = arith.constant 0 : i32
    %c0_i32_1 = arith.constant 0 : i32
    return %c0_i32, %c0_i32_0 : i32, i32
  }
  func.func @transform_24(%arg0: i32) -> (i32, i32) {
    %c0_i32 = arith.constant 0 : i32
    %c0_i32_0 = arith.constant 0 : i32
    %c0_i32_1 = arith.constant 0 : i32
    return %c0_i32, %c0_i32_0 : i32, i32
  }
  func.func @transform_25(%arg0: i32) -> (i32, i32) {
    %c0_i32 = arith.constant 0 : i32
    %c0_i32_0 = arith.constant 0 : i32
    %c0_i32_1 = arith.constant 0 : i32
    return %c0_i32, %c0_i32_0 : i32, i32
  }
  func.func @transform_26(%arg0: i32) -> (i32, i32) {
    %c0_i32 = arith.constant 0 : i32
    %c0_i32_0 = arith.constant 0 : i32
    %c0_i32_1 = arith.constant 0 : i32
    return %c0_i32, %c0_i32_0 : i32, i32
  }
  func.func @transform_27(%arg0: i32) -> (i32, i32) {
    %c0_i32 = arith.constant 0 : i32
    %c0_i32_0 = arith.constant 0 : i32
    %c0_i32_1 = arith.constant 0 : i32
    return %c0_i32, %c0_i32_0 : i32, i32
  }
  func.func @transform_28(%arg0: i32) -> (i32, i32) {
    %c0_i32 = arith.constant 0 : i32
    %c0_i32_0 = arith.constant 0 : i32
    %c0_i32_1 = arith.constant 0 : i32
    return %c0_i32, %c0_i32_0 : i32, i32
  }
  func.func @transform_29(%arg0: i32) -> (i32, i32) {
    %c0_i32 = arith.constant 0 : i32
    %c0_i32_0 = arith.constant 0 : i32
    %c0_i32_1 = arith.constant 0 : i32
    return %c0_i32, %c0_i32_0 : i32, i32
  }
  func.func @transform_30(%arg0: i32) -> (i32, i32) {
    %c0_i32 = arith.constant 0 : i32
    %c0_i32_0 = arith.constant 0 : i32
    %c0_i32_1 = arith.constant 0 : i32
    return %c0_i32, %c0_i32_0 : i32, i32
  }
  func.func @transform_31(%arg0: i32) -> (i32, i32) {
    %c0_i32 = arith.constant 0 : i32
    %c0_i32_0 = arith.constant 0 : i32
    %c0_i32_1 = arith.constant 0 : i32
    return %c0_i32, %c0_i32_0 : i32, i32
  }
  func.func @transform_32(%arg0: i32) -> (i32, i32) {
    %c0_i32 = arith.constant 0 : i32
    %c0_i32_0 = arith.constant 0 : i32
    %c0_i32_1 = arith.constant 0 : i32
    return %c0_i32, %c0_i32_0 : i32, i32
  }
}

</mosaic_0001>

<bundles_post_ra>
// kernel: forward.1
= control target key start
LH: loop header
LB: loop body
LE: loop exit
PB: predicated region body
PF: predicated region fallthrough
CT: control target
= control target key end

     0   :  { %s2695_s6 = smov 1   ;;  %s2696_s10 = smov 2   ;;  %s3303_s0 = inlined_call_operand.smem [shape: u32[33], index: -1, kind: input, shape index: {}] }
   0x1   :  { %s2761_s5 = sld [smem:[%s3303_s0]]   ;;  %s2697_s14 = smov 3  }
   0x2   :  { %s2766_s9 = sld [smem:[%s3303_s0 + %s2695_s6]]   ;;  %s2698_s18 = smov 4  }
   0x3   :  { %s2771_s13 = sld [smem:[%s3303_s0 + %s2696_s10]]   ;;  %s2699_s22 = smov 5  }
   0x4   :  { %s2776_s17 = sld [smem:[%s3303_s0 + %s2697_s14]]   ;;  %s2700_s26 = smov 6  }
   0x5   :  { %s2781_s21 = sld [smem:[%s3303_s0 + %s2698_s18]]   ;;  %s2701_s30 = smov 7  }
   0x6   :  { %s2786_s25 = sld [smem:[%s3303_s0 + %s2699_s22]]   ;;  %s2702_s4 = smov 8  }
   0x7   :  { %s2791_s29 = sld [smem:[%s3303_s0 + %s2700_s26]]   ;;  %s2703_s10 = smov 9  }
   0x8   :  { %s2796_s3 = sld [smem:[%s3303_s0 + %s2701_s30]]   ;;  %s2704_s15 = smov 10  }
   0x9   :  { %s2801_s8 = sld [smem:[%s3303_s0 + %s2702_s4]]   ;;  %s2705_s20 = smov 11  }
   0xa   :  { %3316 = sst [smem:[#allocation45_spill]] %s2776_s17  ;;  %s2706_s26 = smov 12  }
   0xb   :  { %3317 = sst [smem:[#allocation46_spill]] %s2781_s21  ;;  %s2707_s1 = smov 13  }
   0xc   :  { %s2806_s14 = sld [smem:[%s3303_s0 + %s2703_s10]]   ;;  %s2708_s7 = smov 14  }
   0xd   :  { %s2811_s19 = sld [smem:[%s3303_s0 + %s2704_s15]]   ;;  %s2709_s15 = smov 15  }
   0xe   :  { %3318 = sst [smem:[#allocation47_spill]] %s2796_s3  ;;  %s2710_s22 = smov 16  }
   0xf   :  { %s2816_s24 = sld [smem:[%s3303_s0 + %s2705_s20]]   ;;  %s2711_s28 = smov 17  }
  0x10   :  { %s2821_s30 = sld [smem:[%s3303_s0 + %s2706_s26]]  }
  0x11   :  { %s2826_s6 = sld [smem:[%s3303_s0 + %s2707_s1]]  }
  0x12   :  { %s2831_s12 = sld [smem:[%s3303_s0 + %s2708_s7]]   ;;  %s2712_s7 = smov 18  }
  0x13   :  { %3319 = sst [smem:[#allocation48_spill]] %s2811_s19 }
  0x14   :  { %s2836_s20 = sld [smem:[%s3303_s0 + %s2709_s15]]   ;;  %s2713_s15 = smov 19  }
  0x15   :  { %3320 = sst [smem:[#allocation49_spill]] %s2816_s24 }
  0x16   :  { %s2841_s27 = sld [smem:[%s3303_s0 + %s2710_s22]]   ;;  %s2714_s22 = smov 20  }
  0x17   :  { %3321 = sst [smem:[#allocation50_spill]] %s2826_s6 }
  0x18   :  { %s2846_s4 = sld [smem:[%s3303_s0 + %s2711_s28]]   ;;  %s2715_s28 = smov 21  }
  0x19   :  { %s2851_s19 = sld [smem:[%s3303_s0 + %s2712_s7]]   ;;  %s2716_s7 = smov 22  }
  0x1a   :  { %3322 = sst [smem:[#allocation51_spill]] %s2836_s20 }
  0x1b   :  { %s2856_s24 = sld [smem:[%s3303_s0 + %s2713_s15]]   ;;  %s2717_s15 = smov 23  }
  0x1c   :  { %s2861_s3 = sld [smem:[%s3303_s0 + %s2714_s22]]   ;;  %s2718_s22 = smov 24  }
  0x1d   :  { %s2866_s21 = sld [smem:[%s3303_s0 + %s2715_s28]]   ;;  %s2719_s28 = smov 25  }
  0x1e   :  { %3323 = sst [smem:[#allocation52_spill]] %s2846_s4 }
  0x1f   :  { %3324 = sst [smem:[#allocation53_spill]] %s2851_s19 }
  0x20   :  { %s2871_s19 = sld [smem:[%s3303_s0 + %s2716_s7]]   ;;  %s2720_s7 = smov 26  }
  0x21   :  { %s2876_s17 = sld [smem:[%s3303_s0 + %s2717_s15]]   ;;  %s2721_s15 = smov 27  }
  0x22   :  { %3325 = sst [smem:[#allocation54_spill]] %s2861_s3 }
  0x23   :  { %s2881_s3 = sld [smem:[%s3303_s0 + %s2718_s22]]   ;;  %s2722_s22 = smov 28  }
  0x24   :  { %s2886_s4 = sld [smem:[%s3303_s0 + %s2719_s28]]   ;;  %s2723_s28 = smov 29  }
  0x25   :  { %s2906_s20 = sld [smem:[%s3303_s0 + %s2723_s28]]  }
  0x26   :  { %3326 = sst [smem:[#allocation55_spill]] %s2871_s19 }
  0x27   :  { %3327 = sst [smem:[#allocation56_spill]] %s2876_s17 }
  0x28   :  { %s2891_s19 = sld [smem:[%s3303_s0 + %s2720_s7]]   ;;  %s2724_s7 = smov 30  }
  0x29   :  { %3328 = sst [smem:[#allocation57_spill]] %s2881_s3 }
  0x2a   :  { %s2896_s17 = sld [smem:[%s3303_s0 + %s2721_s15]]   ;;  %s2725_s15 = smov 31  }
  0x2b   :  { %s2901_s3 = sld [smem:[%s3303_s0 + %s2722_s22]]   ;;  %s2726_s22 = smov 32  }
  0x2c   :  { %s2916_s6 = sld [smem:[%s3303_s0 + %s2725_s15]]  }
  0x2e   :  { %3329 = sst [smem:[#allocation58_spill]] %s2891_s19 }
  0x2f   :  { %s2911_s19 = sld [smem:[%s3303_s0 + %s2724_s7]]  }
  0x31   :  { %3330 = sst [smem:[#allocation59_spill]] %s2901_s3 }
  0x32   :  { %s2921_s3 = sld [smem:[%s3303_s0 + %s2726_s22]]  }
  0x33   :  { %70 = vsyncpa [#allocation3], 0 }
  0x34   :  { %71 = vsyncpa [#allocation5], 0 }
  0x35   :  { %72 = vsyncpa [#allocation8], 0 }
  0x36   :  { %73 = vsyncpa [#allocation11], 0 }
  0x37   :  { %74 = vsyncpa [#allocation14], 0 }
  0x38   :  { %75 = vsyncpa [#allocation17], 0 }
  0x39   :  { %76 = vsyncpa [#allocation20], 0 }
  0x3a   :  { %77 = vsyncpa [#allocation23], 0 }
  0x3b   :  { %78 = vsyncpa [#allocation26], 0 }
  0x3c   :  { %79 = vsyncpa [#allocation29], 0  ;;  %s97_s28 = sshll.u32 %s2766_s9, 4  ;;  %s98_s28 = int_to_ptr.hbm [resolvable:$true] %s97_s28 }
  0x3d   :  { %80 = vsyncpa [#allocation32], 0  ;;  %s2727_s1 = smov [#allocation4]   ;;  %s122_s2 = sshll.u32 %s2786_s25, 4  ;;  %s123_s2 = int_to_ptr.hbm [resolvable:$true] %s122_s2 }
  0x3e   :  { %s99_s0 = sshll.u32 %s2727_s1, 4  ;;  %s2169_s7 = sshra.s32 %s98_s28, 4  ;;  %s100_s0 = int_to_ptr.vmem [resolvable:$true] %s99_s0  ;;  %s2170_s7 = int_to_ptr.hbm [resolvable:$true] %s2169_s7 }
  0x3f   :  { %s2171_s10 = scalar_lea.hbm %s2170_s7, 8  ;;  %s2173_s11 = scalar_lea.hbm %s2766_s9, 8 }
  0x40   :  { %p2172_p0 = scmp.ne.s32.totalorder %s2170_s7, %s2171_s10  ;;  %p2174_p1 = scmp.lt.s32.totalorder %s2170_s7, %s2766_s9 }
  0x41   :  { %p2175_p2 = scmp.lt.s32.totalorder %s2173_s11, %s2171_s10 }
  0x43   :  { %p2176_p3 = por %p2175_p2, %p2174_p1 }
  0x45   :  { %p2177_p4 = pnand %p2176_p3, %p2172_p0 }
  0x47   :  { %2180 = shalt.err (!%p2177_p4)
}
  0x48   :  { %102 = dma.hbm_to_vmem [thread:$0]  %s98_s28, 128, %s100_s0, [#allocation5]  }
  0x49   :  { %s2728_s15 = smov [#allocation7]   ;;  %s2193_s18 = sshra.s32 %s123_s2, 4  ;;  %s2194_s18 = int_to_ptr.hbm [resolvable:$true] %s2193_s18 }
  0x4a   :  { %s124_s16 = sshll.u32 %s2728_s15, 4  ;;  %s2195_s22 = scalar_lea.hbm %s2194_s18, 32  ;;  %s125_s16 = int_to_ptr.vmem [resolvable:$true] %s124_s16 }
  0x4b   :  { %p2196_p5 = scmp.ne.s32.totalorder %s2194_s18, %s2195_s22  ;;  %s2197_s23 = scalar_lea.hbm %s2786_s25, 32 }
  0x4c   :  { %p2198_p6 = scmp.lt.s32.totalorder %s2194_s18, %s2786_s25  ;;  %p2199_p7 = scmp.lt.s32.totalorder %s2197_s23, %s2195_s22 }
  0x4e   :  { %p2200_p8 = por %p2199_p7, %p2198_p6 }
  0x50   :  { %p2201_p9 = pnand %p2200_p8, %p2196_p5 }
  0x52   :  { %2204 = shalt.err (!%p2201_p9)
}
  0x53   :  { %s2729_s9 = smov 128   ;;  %s2730_s26 = smov 8  }
  0x54   :  { %130 = dma.hbm_to_vmem [thread:$0]  %s123_s2, 512, %s125_s16, [#allocation8], %s2729_s9, %s2729_s9, %s2730_s26  }
  0x55   :  { %s149_s28 = sshll.u32 %s2801_s8, 4  ;;  %s2731_s1 = smov [#allocation10]   ;;  %s150_s28 = int_to_ptr.hbm [resolvable:$true] %s149_s28 }
  0x56   :  { %s151_s0 = sshll.u32 %s2731_s1, 4  ;;  %s176_s25 = sshll.u32 %s2821_s30, 4  ;;  %s152_s0 = int_to_ptr.vmem [resolvable:$true] %s151_s0  ;;  %s177_s25 = int_to_ptr.hbm [resolvable:$true] %s176_s25 }
  0x57   :  { %s2217_s7 = sshra.s32 %s150_s28, 4  ;;  %s2221_s11 = scalar_lea.hbm %s2801_s8, 2  ;;  %s2218_s7 = int_to_ptr.hbm [resolvable:$true] %s2217_s7 }
  0x58   :  { %s2219_s10 = scalar_lea.hbm %s2218_s7, 2  ;;  %p2222_p11 = scmp.lt.s32.totalorder %s2218_s7, %s2801_s8 }
  0x59   :  { %p2220_p10 = scmp.ne.s32.totalorder %s2218_s7, %s2219_s10  ;;  %p2223_p12 = scmp.lt.s32.totalorder %s2221_s11, %s2219_s10 }
  0x5b   :  { %p2224_p13 = por %p2223_p12, %p2222_p11 }
  0x5d   :  { %p2225_p0 = pnand %p2224_p13, %p2220_p10 }
  0x5f   :  { %2228 = shalt.err (!%p2225_p0)
}
  0x60   :  { %154 = dma.hbm_to_vmem [thread:$0]  %s150_s28, 32, %s152_s0, [#allocation11]  }
  0x61   :  { %s2732_s2 = smov [#allocation13]   ;;  %s203_s16 = sshll.u32 %s2831_s12, 4  ;;  %s204_s16 = int_to_ptr.hbm [resolvable:$true] %s203_s16 }
  0x62   :  { %s178_s15 = sshll.u32 %s2732_s2, 4  ;;  %s2241_s18 = sshra.s32 %s177_s25, 4  ;;  %s179_s15 = int_to_ptr.vmem [resolvable:$true] %s178_s15  ;;  %s2242_s18 = int_to_ptr.hbm [resolvable:$true] %s2241_s18 }
  0x63   :  { %s2243_s22 = scalar_lea.hbm %s2242_s18, 32  ;;  %s2245_s23 = scalar_lea.hbm %s2821_s30, 32 }
  0x64   :  { %p2244_p1 = scmp.ne.s32.totalorder %s2242_s18, %s2243_s22  ;;  %p2246_p2 = scmp.lt.s32.totalorder %s2242_s18, %s2821_s30 }
  0x65   :  { %p2247_p3 = scmp.lt.s32.totalorder %s2245_s23, %s2243_s22 }
  0x67   :  { %p2248_p4 = por %p2247_p3, %p2246_p2 }
  0x69   :  { %p2249_p5 = pnand %p2248_p4, %p2244_p1 }
  0x6b   :  { %2252 = shalt.err (!%p2249_p5)
}
  0x6c   :  { %184 = dma.hbm_to_vmem [thread:$0]  %s177_s25, 512, %s179_s15, [#allocation14], %s2729_s9, %s2729_s9, %s2730_s26  }
  0x6d   :  { %s224_s8 = sshll.u32 %s2841_s27, 4  ;;  %s2733_s28 = smov [#allocation16]   ;;  %s2943_s8 = int_to_ptr.hbm [resolvable:$true] %s224_s8 }
  0x6e   :  { %s205_s1 = sshll.u32 %s2733_s28, 4  ;;  %s2265_s0 = sshra.s32 %s204_s16, 4  ;;  %s206_s1 = int_to_ptr.vmem [resolvable:$true] %s205_s1  ;;  %s2266_s0 = int_to_ptr.hbm [resolvable:$true] %s2265_s0 }
  0x6f   :  { %s2267_s30 = scalar_lea.hbm %s2266_s0, 2  ;;  %s2269_s7 = scalar_lea.hbm %s2831_s12, 2 }
  0x70   :  { %p2268_p6 = scmp.ne.s32.totalorder %s2266_s0, %s2267_s30  ;;  %p2270_p7 = scmp.lt.s32.totalorder %s2266_s0, %s2831_s12 }
  0x71   :  { %p2271_p8 = scmp.lt.s32.totalorder %s2269_s7, %s2267_s30 }
  0x73   :  { %p2272_p9 = por %p2271_p8, %p2270_p7 }
  0x75   :  { %p2273_p10 = pnand %p2272_p9, %p2268_p6 }
  0x77   :  { %2276 = shalt.err (!%p2273_p10)
}
  0x78   :  { %208 = dma.hbm_to_vmem [thread:$0]  %s204_s16, 32, %s206_s1, [#allocation17]  }
  0x79   :  { %s2734_s25 = smov [#allocation19]   ;;  %s250_s11 = sshll.u32 %s2856_s24, 4  ;;  %s2948_s11 = int_to_ptr.hbm [resolvable:$true] %s250_s11 }
  0x7a   :  { %s226_s10 = sshll.u32 %s2734_s25, 4  ;;  %s2289_s2 = sshra.s32 %s2943_s8, 4  ;;  %s227_s10 = int_to_ptr.vmem [resolvable:$true] %s226_s10  ;;  %s2290_s2 = int_to_ptr.hbm [resolvable:$true] %s2289_s2 }
  0x7b   :  { %s2291_s15 = scalar_lea.hbm %s2290_s2, 64  ;;  %s2293_s12 = scalar_lea.hbm %s2841_s27, 64 }
  0x7c   :  { %p2292_p11 = scmp.ne.s32.totalorder %s2290_s2, %s2291_s15  ;;  %p2294_p12 = scmp.lt.s32.totalorder %s2290_s2, %s2841_s27 }
  0x7d   :  { %p2295_p13 = scmp.lt.s32.totalorder %s2293_s12, %s2291_s15 }
  0x7f   :  { %p2296_p0 = por %p2295_p13, %p2294_p12 }
  0x81   :  { %p2297_p1 = pnand %p2296_p0, %p2292_p11 }
  0x83   :  { %2300 = shalt.err (!%p2297_p1)
}
  0x84   :  { %232 = dma.hbm_to_vmem [thread:$0]  %s2943_s8, 1024, %s227_s10, [#allocation20], %s2729_s9, %s2729_s9, %s2730_s26  }
  0x85   :  { %s277_s16 = sshll.u32 %s2866_s21, 4  ;;  %s2735_s18 = smov [#allocation22]   ;;  %s278_s16 = int_to_ptr.hbm [resolvable:$true] %s277_s16 }
  0x86   :  { %s252_s22 = sshll.u32 %s2735_s18, 4  ;;  %s2313_s23 = sshra.s32 %s2948_s11, 4  ;;  %s253_s22 = int_to_ptr.vmem [resolvable:$true] %s252_s22  ;;  %s2314_s23 = int_to_ptr.hbm [resolvable:$true] %s2313_s23 }
  0x87   :  { %s2315_s27 = scalar_lea.hbm %s2314_s23, 64  ;;  %s2317_s28 = scalar_lea.hbm %s2856_s24, 64 }
  0x88   :  { %p2316_p2 = scmp.ne.s32.totalorder %s2314_s23, %s2315_s27  ;;  %p2318_p3 = scmp.lt.s32.totalorder %s2314_s23, %s2856_s24 }
  0x89   :  { %p2319_p4 = scmp.lt.s32.totalorder %s2317_s28, %s2315_s27 }
  0x8b   :  { %p2320_p5 = por %p2319_p4, %p2318_p3 }
  0x8d   :  { %p2321_p6 = pnand %p2320_p5, %p2316_p2 }
  0x8f   :  { %2324 = shalt.err (!%p2321_p6)
}
  0x90   :  { %258 = dma.hbm_to_vmem [thread:$0]  %s2948_s11, 1024, %s253_s22, [#allocation23], %s2729_s9, %s2729_s9, %s2730_s26  }
  0x91   :  { %s2736_s8 = smov [#allocation25]   ;;  %s302_s0 = sshll.u32 %s2886_s4, 4  ;;  %s2966_s0 = int_to_ptr.hbm [resolvable:$true] %s302_s0 }
  0x92   :  { %s279_s1 = sshll.u32 %s2736_s8, 4  ;;  %s2337_s30 = sshra.s32 %s278_s16, 4  ;;  %s280_s1 = int_to_ptr.vmem [resolvable:$true] %s279_s1  ;;  %s2338_s30 = int_to_ptr.hbm [resolvable:$true] %s2337_s30 }
  0x93   :  { %s2339_s24 = scalar_lea.hbm %s2338_s30, 2  ;;  %s2341_s7 = scalar_lea.hbm %s2866_s21, 2 }
  0x94   :  { %p2340_p7 = scmp.ne.s32.totalorder %s2338_s30, %s2339_s24  ;;  %p2342_p8 = scmp.lt.s32.totalorder %s2338_s30, %s2866_s21 }
  0x95   :  { %p2343_p9 = scmp.lt.s32.totalorder %s2341_s7, %s2339_s24 }
  0x97   :  { %p2344_p10 = por %p2343_p9, %p2342_p8 }
  0x99   :  { %p2345_p11 = pnand %p2344_p10, %p2340_p7 }
  0x9b   :  { %2348 = shalt.err (!%p2345_p11)
}
  0x9c   :  { %282 = dma.hbm_to_vmem [thread:$0]  %s278_s16, 32, %s280_s1, [#allocation26]  }
  0x9d   :  { %s328_s25 = sshll.u32 %s2896_s17, 4  ;;  %s2737_s10 = smov [#allocation28]   ;;  %s2971_s25 = int_to_ptr.hbm [resolvable:$true] %s328_s25 }
  0x9e   :  { %s304_s11 = sshll.u32 %s2737_s10, 4  ;;  %s2361_s2 = sshra.s32 %s2966_s0, 4  ;;  %s305_s11 = int_to_ptr.vmem [resolvable:$true] %s304_s11  ;;  %s2362_s2 = int_to_ptr.hbm [resolvable:$true] %s2361_s2 }
  0x9f   :  { %s2363_s15 = scalar_lea.hbm %s2362_s2, 256  ;;  %s2365_s21 = scalar_lea.hbm %s2886_s4, 256 }
  0xa0   :  { %p2364_p12 = scmp.ne.s32.totalorder %s2362_s2, %s2363_s15  ;;  %p2366_p13 = scmp.lt.s32.totalorder %s2362_s2, %s2886_s4 }
  0xa1   :  { %p2367_p0 = scmp.lt.s32.totalorder %s2365_s21, %s2363_s15 }
  0xa3   :  { %p2368_p1 = por %p2367_p0, %p2366_p13 }
  0xa5   :  { %p2369_p2 = pnand %p2368_p1, %p2364_p12 }
  0xa7   :  { %2372 = shalt.err (!%p2369_p2)
}
  0xa8   :  { %310 = dma.hbm_to_vmem [thread:$0]  %s2966_s0, 4096, %s305_s11, [#allocation29], %s2729_s9, %s2729_s9, %s2730_s26  }
  0xa9   :  { %s2738_s12 = smov [#allocation31]   ;;  %s86_s18 = sshll.u32 %s2761_s5, 4  ;;  %s87_s18 = int_to_ptr.hbm [resolvable:$true] %s86_s18 }
  0xaa   :  { %s330_s16 = sshll.u32 %s2738_s12, 4  ;;  %s2385_s22 = sshra.s32 %s2971_s25, 4  ;;  %s331_s16 = int_to_ptr.vmem [resolvable:$true] %s330_s16  ;;  %s2386_s22 = int_to_ptr.hbm [resolvable:$true] %s2385_s22 }
  0xab   :  { %s2387_s4 = scalar_lea.hbm %s2386_s22, 128  ;;  %s2389_s23 = scalar_lea.hbm %s2896_s17, 128 }
  0xac   :  { %p2388_p3 = scmp.ne.s32.totalorder %s2386_s22, %s2387_s4  ;;  %p2390_p4 = scmp.lt.s32.totalorder %s2386_s22, %s2896_s17 }
  0xad   :  { %p2391_p5 = scmp.lt.s32.totalorder %s2389_s23, %s2387_s4 }
  0xaf   :  { %p2392_p6 = por %p2391_p5, %p2390_p4 }
  0xb1   :  { %p2393_p7 = pnand %p2392_p6, %p2388_p3 }
  0xb3   :  { %2396 = shalt.err (!%p2393_p7)
}
  0xb4   :  { %336 = dma.hbm_to_vmem [thread:$0]  %s2971_s25, 2048, %s331_s16, [#allocation32], %s2729_s9, %s2729_s9, %s2730_s26  }
  0xb5   :  { %s108_s27 = sshll.u32 %s2771_s13, 4  ;;  %s2739_s28 = smov [#allocation2]   ;;  %s109_s27 = int_to_ptr.hbm [resolvable:$true] %s108_s27 }
  0xb6   :  { %s88_s8 = sshll.u32 %s2739_s28, 4  ;;  %s2409_s1 = sshra.s32 %s87_s18, 4  ;;  %s89_s8 = int_to_ptr.vmem [resolvable:$true] %s88_s8  ;;  %s2410_s1 = int_to_ptr.hbm [resolvable:$true] %s2409_s1 }
  0xb7   :  { %s2411_s17 = scalar_lea.hbm %s2410_s1, 4  ;;  %s2413_s0 = scalar_lea.hbm %s2761_s5, 4 }
  0xb8   :  { %p2412_p8 = scmp.ne.s32.totalorder %s2410_s1, %s2411_s17  ;;  %p2414_p9 = scmp.lt.s32.totalorder %s2410_s1, %s2761_s5 }
  0xb9   :  { %p2415_p10 = scmp.lt.s32.totalorder %s2413_s0, %s2411_s17 }
  0xbb   :  { %p2416_p11 = por %p2415_p10, %p2414_p9 }
  0xbd   :  { %p2417_p12 = pnand %p2416_p11, %p2412_p8 }
  0xbf   :  { %2420 = shalt.err (!%p2417_p12)
}
  0xc0   :  { %91 = dma.hbm_to_vmem [thread:$0]  %s87_s18, 64, %s89_s8, [#allocation3]  }
  0xc1   :  { %s2740_s30 = smov [#allocation6]   ;;  %s136_s7 = sshll.u32 %s2791_s29, 4  ;;  %s137_s7 = int_to_ptr.hbm [resolvable:$true] %s136_s7 }
  0xc2   :  { %s110_s24 = sshll.u32 %s2740_s30, 4  ;;  %s2433_s25 = sshra.s32 %s109_s27, 4  ;;  %s111_s24 = int_to_ptr.vmem [resolvable:$true] %s110_s24  ;;  %s2434_s25 = int_to_ptr.hbm [resolvable:$true] %s2433_s25 }
  0xc3   :  { %s2435_s10 = scalar_lea.hbm %s2434_s25, 4  ;;  %s2437_s11 = scalar_lea.hbm %s2771_s13, 4 }
  0xc4   :  { %p2436_p13 = scmp.ne.s32.totalorder %s2434_s25, %s2435_s10  ;;  %p2438_p0 = scmp.lt.s32.totalorder %s2434_s25, %s2771_s13 }
  0xc5   :  { %p2439_p1 = scmp.lt.s32.totalorder %s2437_s11, %s2435_s10 }
  0xc7   :  { %p2440_p2 = por %p2439_p1, %p2438_p0 }
  0xc9   :  { %p2441_p3 = pnand %p2440_p2, %p2436_p13 }
  0xcb   :  { %2444 = shalt.err (!%p2441_p3)
}
  0xcc   :  { %113 = dma.hbm_to_vmem [thread:$0]  %s109_s27, 64, %s111_s24, [#allocation5]  }
  0xcd   :  { %s159_s5 = sshll.u32 %s2806_s14, 4  ;;  %s2741_s2 = smov [#allocation9]   ;;  %s2995_s5 = int_to_ptr.hbm [resolvable:$true] %s159_s5 }
  0xce   :  { %s138_s15 = sshll.u32 %s2741_s2, 4  ;;  %s2457_s21 = sshra.s32 %s137_s7, 4  ;;  %s139_s15 = int_to_ptr.vmem [resolvable:$true] %s138_s15  ;;  %s2458_s21 = int_to_ptr.hbm [resolvable:$true] %s2457_s21 }
  0xcf   :  { %s2459_s12 = scalar_lea.hbm %s2458_s21, 4  ;;  %s2461_s16 = scalar_lea.hbm %s2791_s29, 4 }
  0xd0   :  { %p2460_p4 = scmp.ne.s32.totalorder %s2458_s21, %s2459_s12  ;;  %p2462_p5 = scmp.lt.s32.totalorder %s2458_s21, %s2791_s29 }
  0xd1   :  { %p2463_p6 = scmp.lt.s32.totalorder %s2461_s16, %s2459_s12 }
  0xd3   :  { %p2464_p7 = por %p2463_p6, %p2462_p5 }
  0xd5   :  { %p2465_p8 = pnand %p2464_p7, %p2460_p4 }
  0xd7   :  { %2468 = shalt.err (!%p2465_p8)
}
  0xd8   :  { %141 = dma.hbm_to_vmem [thread:$0]  %s137_s7, 64, %s139_s15, [#allocation8]  }
  0xd9   :  { %s3331_s13 = sld [smem:[#allocation50_spill]]  ;;  %s2742_s18 = smov [#allocation12]  }
  0xda   :  { %s161_s22 = sshll.u32 %s2742_s18, 4  ;;  %s2481_s23 = sshra.s32 %s2995_s5, 4  ;;  %s162_s22 = int_to_ptr.vmem [resolvable:$true] %s161_s22  ;;  %s2482_s23 = int_to_ptr.hbm [resolvable:$true] %s2481_s23 }
  0xdb   :  { %s2483_s27 = scalar_lea.hbm %s2482_s23, 32  ;;  %s2485_s29 = scalar_lea.hbm %s2806_s14, 32 }
  0xdc   :  { %p2484_p9 = scmp.ne.s32.totalorder %s2482_s23, %s2483_s27  ;;  %p2486_p10 = scmp.lt.s32.totalorder %s2482_s23, %s2806_s14 }
  0xdd   :  { %p2487_p11 = scmp.lt.s32.totalorder %s2485_s29, %s2483_s27 }
  0xdf   :  { %s189_s4 = sshll.u32 %s3331_s13, 4  ;;  %p2488_p12 = por %p2487_p11, %p2486_p10  ;;  %s3000_s4 = int_to_ptr.hbm [resolvable:$true] %s189_s4 }
  0xe1   :  { %p2489_p13 = pnand %p2488_p12, %p2484_p9 }
  0xe3   :  { %2492 = shalt.err (!%p2489_p13)
}
  0xe4   :  { %s3332_s28 = sld [smem:[#allocation51_spill]]  ;;  %s2743_s1 = smov [#allocation15]  }
  0xe5   :  { %167 = dma.hbm_to_vmem [thread:$0]  %s2995_s5, 512, %s162_s22, [#allocation11], %s2729_s9, %s2729_s9, %s2730_s26  }
  0xe6   :  { %s191_s17 = sshll.u32 %s2743_s1, 4  ;;  %s2505_s0 = sshra.s32 %s3000_s4, 4  ;;  %s192_s17 = int_to_ptr.vmem [resolvable:$true] %s191_s17  ;;  %s2506_s0 = int_to_ptr.hbm [resolvable:$true] %s2505_s0 }
  0xe7   :  { %s2507_s14 = scalar_lea.hbm %s2506_s0, 32  ;;  %s2509_s30 = scalar_lea.hbm %s3331_s13, 32 }
  0xe8   :  { %p2508_p0 = scmp.ne.s32.totalorder %s2506_s0, %s2507_s14  ;;  %p2510_p1 = scmp.lt.s32.totalorder %s2506_s0, %s3331_s13 }
  0xe9   :  { %p2511_p2 = scmp.lt.s32.totalorder %s2509_s30, %s2507_s14 }
  0xea   :  { %s214_s8 = sshll.u32 %s3332_s28, 4  ;;  %s215_s8 = int_to_ptr.hbm [resolvable:$true] %s214_s8 }
  0xeb   :  { %p2512_p3 = por %p2511_p2, %p2510_p1 }
  0xed   :  { %p2513_p4 = pnand %p2512_p3, %p2508_p0 }
  0xef   :  { %2516 = shalt.err (!%p2513_p4)
}
  0xf0   :  { %s3333_s24 = sld [smem:[#allocation52_spill]]  ;;  %s2744_s7 = smov [#allocation18]  }
  0xf1   :  { %197 = dma.hbm_to_vmem [thread:$0]  %s3000_s4, 512, %s192_s17, [#allocation14], %s2729_s9, %s2729_s9, %s2730_s26  }
  0xf2   :  { %s216_s25 = sshll.u32 %s2744_s7, 4  ;;  %s2529_s11 = sshra.s32 %s215_s8, 4  ;;  %s217_s25 = int_to_ptr.vmem [resolvable:$true] %s216_s25  ;;  %s2530_s11 = int_to_ptr.hbm [resolvable:$true] %s2529_s11 }
  0xf3   :  { %s2531_s5 = scalar_lea.hbm %s2530_s11, 2  ;;  %s2533_s2 = scalar_lea.hbm %s3332_s28, 2 }
  0xf4   :  { %p2532_p5 = scmp.ne.s32.totalorder %s2530_s11, %s2531_s5  ;;  %p2534_p6 = scmp.lt.s32.totalorder %s2530_s11, %s3332_s28 }
  0xf5   :  { %p2535_p7 = scmp.lt.s32.totalorder %s2533_s2, %s2531_s5 }
  0xf6   :  { %s238_s10 = sshll.u32 %s3333_s24, 4  ;;  %s239_s10 = int_to_ptr.hbm [resolvable:$true] %s238_s10 }
  0xf7   :  { %p2536_p8 = por %p2535_p7, %p2534_p6 }
  0xf9   :  { %p2537_p9 = pnand %p2536_p8, %p2532_p5 }
  0xfb   :  { %2540 = shalt.err (!%p2537_p9)
}
  0xfc   :  { %219 = dma.hbm_to_vmem [thread:$0]  %s215_s8, 32, %s217_s25, [#allocation17]  }
  0xfd   :  { %s3334_s15 = sld [smem:[#allocation54_spill]]  ;;  %s2745_s12 = smov [#allocation21]  }
  0xfe   :  { %s240_s16 = sshll.u32 %s2745_s12, 4  ;;  %s2553_s13 = sshra.s32 %s239_s10, 4  ;;  %s241_s16 = int_to_ptr.vmem [resolvable:$true] %s240_s16  ;;  %s2554_s13 = int_to_ptr.hbm [resolvable:$true] %s2553_s13 }
  0xff   :  { %s2555_s18 = scalar_lea.hbm %s2554_s13, 1  ;;  %s2557_s22 = scalar_lea.hbm %s3333_s24, 1 }
 0x100   :  { %p2556_p10 = scmp.ne.s32.totalorder %s2554_s13, %s2555_s18  ;;  %p2558_p11 = scmp.lt.s32.totalorder %s2554_s13, %s3333_s24 }
 0x101   :  { %p2559_p12 = scmp.lt.s32.totalorder %s2557_s22, %s2555_s18 }
 0x103   :  { %s263_s21 = sshll.u32 %s3334_s15, 4  ;;  %p2560_p13 = por %p2559_p12, %p2558_p11  ;;  %s3021_s21 = int_to_ptr.hbm [resolvable:$true] %s263_s21 }
 0x105   :  { %p2561_p0 = pnand %p2560_p13, %p2556_p10 }
 0x107   :  { %2564 = shalt.err (!%p2561_p0)
}
 0x108   :  { %243 = dma.hbm_to_vmem [thread:$0]  %s239_s10, 16, %s241_s16, [#allocation20]  }
 0x109   :  { %s3335_s4 = sld [smem:[#allocation55_spill]]  ;;  %s2746_s23 = smov [#allocation24]  }
 0x10a   :  { %s265_s27 = sshll.u32 %s2746_s23, 4  ;;  %s2577_s28 = sshra.s32 %s3021_s21, 4  ;;  %s266_s27 = int_to_ptr.vmem [resolvable:$true] %s265_s27  ;;  %s2578_s28 = int_to_ptr.hbm [resolvable:$true] %s2577_s28 }
 0x10b   :  { %s2579_s8 = scalar_lea.hbm %s2578_s28, 64  ;;  %s2581_s1 = scalar_lea.hbm %s3334_s15, 64 }
 0x10c   :  { %p2580_p1 = scmp.ne.s32.totalorder %s2578_s28, %s2579_s8  ;;  %p2582_p2 = scmp.lt.s32.totalorder %s2578_s28, %s3334_s15 }
 0x10d   :  { %p2583_p3 = scmp.lt.s32.totalorder %s2581_s1, %s2579_s8 }
 0x10f   :  { %s288_s29 = sshll.u32 %s3335_s4, 4  ;;  %p2584_p4 = por %p2583_p3, %p2582_p2  ;;  %s289_s29 = int_to_ptr.hbm [resolvable:$true] %s288_s29 }
 0x111   :  { %p2585_p5 = pnand %p2584_p4, %p2580_p1 }
 0x113   :  { %2588 = shalt.err (!%p2585_p5)
}
 0x114   :  { %s3336_s17 = sld [smem:[#allocation58_spill]]  ;;  %s2747_s14 = smov [#allocation27]  }
 0x115   :  { %271 = dma.hbm_to_vmem [thread:$0]  %s3021_s21, 1024, %s266_s27, [#allocation23], %s2729_s9, %s2729_s9, %s2730_s26  }
 0x116   :  { %s290_s30 = sshll.u32 %s2747_s14, 4  ;;  %s2601_s24 = sshra.s32 %s289_s29, 4  ;;  %s291_s30 = int_to_ptr.vmem [resolvable:$true] %s290_s30  ;;  %s2602_s24 = int_to_ptr.hbm [resolvable:$true] %s2601_s24 }
 0x117   :  { %s2603_s7 = scalar_lea.hbm %s2602_s24, 2  ;;  %s2605_s25 = scalar_lea.hbm %s3335_s4, 2 }
 0x118   :  { %p2604_p6 = scmp.ne.s32.totalorder %s2602_s24, %s2603_s7  ;;  %p2606_p7 = scmp.lt.s32.totalorder %s2602_s24, %s3335_s4 }
 0x119   :  { %p2607_p8 = scmp.lt.s32.totalorder %s2605_s25, %s2603_s7 }
 0x11a   :  { %s315_s0 = sshll.u32 %s3336_s17, 4  ;;  %s3034_s0 = int_to_ptr.hbm [resolvable:$true] %s315_s0 }
 0x11b   :  { %p2608_p9 = por %p2607_p8, %p2606_p7 }
 0x11d   :  { %p2609_p10 = pnand %p2608_p9, %p2604_p6 }
 0x11f   :  { %2612 = shalt.err (!%p2609_p10)
}
 0x120   :  { %293 = dma.hbm_to_vmem [thread:$0]  %s289_s29, 32, %s291_s30, [#allocation26]  }
 0x121   :  { %s2748_s10 = smov [#allocation30]   ;;  %s345_s5 = sshll.u32 %s2911_s19, 4  ;;  %s346_s5 = int_to_ptr.hbm [resolvable:$true] %s345_s5 }
 0x122   :  { %s317_s11 = sshll.u32 %s2748_s10, 4  ;;  %s2625_s2 = sshra.s32 %s3034_s0, 4  ;;  %s318_s11 = int_to_ptr.vmem [resolvable:$true] %s317_s11  ;;  %s2626_s2 = int_to_ptr.hbm [resolvable:$true] %s2625_s2 }
 0x123   :  { %s2627_s15 = scalar_lea.hbm %s2626_s2, 128  ;;  %s2629_s21 = scalar_lea.hbm %s3336_s17, 128 }
 0x124   :  { %p2628_p11 = scmp.ne.s32.totalorder %s2626_s2, %s2627_s15  ;;  %p2630_p12 = scmp.lt.s32.totalorder %s2626_s2, %s3336_s17 }
 0x125   :  { %p2631_p13 = scmp.lt.s32.totalorder %s2629_s21, %s2627_s15 }
 0x127   :  { %p2632_p0 = por %p2631_p13, %p2630_p12 }
 0x129   :  { %p2633_p1 = pnand %p2632_p0, %p2628_p11 }
 0x12b   :  { %2636 = shalt.err (!%p2633_p1)
}
 0x12c   :  { %323 = dma.hbm_to_vmem [thread:$0]  %s3034_s0, 2048, %s318_s11, [#allocation29], %s2729_s9, %s2729_s9, %s2730_s26  }
 0x12d   :  { %s2749_s12 = smov [#allocation33]   ;;  %s2649_s13 = sshra.s32 %s346_s5, 4  ;;  %s2650_s13 = int_to_ptr.hbm [resolvable:$true] %s2649_s13 }
 0x12e   :  { %s347_s16 = sshll.u32 %s2749_s12, 4  ;;  %s2651_s18 = scalar_lea.hbm %s2650_s13, 256  ;;  %s348_s16 = int_to_ptr.vmem [resolvable:$true] %s347_s16 }
 0x12f   :  { %p2652_p2 = scmp.ne.s32.totalorder %s2650_s13, %s2651_s18  ;;  %s2653_s22 = scalar_lea.hbm %s2911_s19, 256 }
 0x130   :  { %p2654_p3 = scmp.lt.s32.totalorder %s2650_s13, %s2911_s19  ;;  %p2655_p4 = scmp.lt.s32.totalorder %s2653_s22, %s2651_s18 }
 0x132   :  { %p2656_p5 = por %p2655_p4, %p2654_p3 }
 0x134   :  { %p2657_p6 = pnand %p2656_p5, %p2652_p2 }
 0x136   :  { %2660 = shalt.err (!%p2657_p6)
}
 0x137   :  { %353 = dma.hbm_to_vmem [thread:$0]  %s346_s5, 4096, %s348_s16, [#allocation32], %s2729_s9, %s2729_s9, %s2730_s26  }
 0x138   :  { %2673 = dma.done.wait [#allocation3], 64  }
 0x139   :  { %2674 = vsyncadd [#allocation3], 4294967232 }
 0x13a   :  { %2675 = dma.done.wait [#allocation5], 192  }
 0x13b   :  { %2676 = vsyncadd [#allocation5], 4294967104 }
 0x13c   :  { %2677 = dma.done.wait [#allocation8], 576  }
 0x13d   :  { %2678 = vsyncadd [#allocation8], 4294966720 }
 0x13e   :  { %2679 = dma.done.wait [#allocation11], 544  }
 0x13f   :  { %2680 = vsyncadd [#allocation11], 4294966752 }
 0x140   :  { %2681 = dma.done.wait [#allocation14], 1024  }
 0x141   :  { %2682 = vsyncadd [#allocation14], 4294966272 }
 0x142   :  { %2683 = dma.done.wait [#allocation17], 64  }
 0x143   :  { %2684 = vsyncadd [#allocation17], 4294967232 }
 0x144   :  { %2685 = dma.done.wait [#allocation20], 1040  }
 0x145   :  { %2686 = vsyncadd [#allocation20], 4294966256 }
 0x146   :  { %2687 = dma.done.wait [#allocation23], 2048  }
 0x147   :  { %2688 = vsyncadd [#allocation23], 4294965248 }
 0x148   :  { %2689 = dma.done.wait [#allocation26], 64  }
 0x149   :  { %2690 = vsyncadd [#allocation26], 4294967232 }
 0x14a   :  { %2691 = dma.done.wait [#allocation29], 6144  }
 0x14b   :  { %2692 = vsyncadd [#allocation29], 4294961152 }
 0x14c   :  { %2693 = dma.done.wait [#allocation32], 6144  }
 0x14d   :  { %2694 = vsyncadd [#allocation32], 4294961152  ;;  %vm444_vm0 = vcmask 64512   ;;  %v442_v0 = vld [vmem:[#allocation4] sm:$0xff]  ;;  %v441_v1 = vld [vmem:[#allocation2] sm:$0xf] }
 0x14e   :  { %463 = vmatpush.msra.mxu2 %v442_v0  ;;  %v2750_v2 = vmov 4.0   ;;  %v440_v4 = vld [vmem:[#allocation6] sm:$0x7]  ;;  %vm468_vm1 = vcmask 257024   ;;  %s3337_s19 = sld [smem:[#allocation45_spill]]  ;;  %vm533_vm6 = vcmask 261120  }
 0x14f   :  { %2050 = vmatmul.msk.f32.vlgmr.msra.gmra.mxu2 %vm444_vm0, %v441_v1  ;;  %2140 = vrcp.f32 %v2750_v2  ;;  %v443_v5 = vperm.slane %v440_v4, 0  ;;  %s3338_s9 = sld [smem:[#allocation46_spill]]  ;;  %v506_v42 = vperm.slane %v440_v4, 1  ;;  %v508_v45 = vperm.slane %v440_v4, 2  ;;  %s2751_s23 = smov 96  }
 0x150   :  { %s3339_s26 = sld [smem:[#allocation47_spill]]  ;;  %s2752_s27 = smov 64  }
 0x151   :  { %s3340_s4 = sld [smem:[#allocation49_spill]] }
 0x152   :  { %s3341_s29 = sld [smem:[#allocation48_spill]] }
 0x153   :  { %s3342_s28 = sld [smem:[#allocation53_spill]] }
 0x154   :  { %v514_v26 = vld [vmem:[%s3337_s19 + $0x18] sm:$0xff]  ;;  %v513_v27 = vld [vmem:[%s3337_s19 + $0x10] sm:$0xff]  ;;  %v512_v29 = vld [vmem:[%s3337_s19 + $0x8] sm:$0xff]  ;;  %s3343_s8 = sld [smem:[#allocation56_spill]] }
 0x155   :  { %v2141_v3 = vpop.eup %2140  ;;  %549 = vmatpush.msra.mxu1 %v514_v26  ;;  %v511_v31 = vld [vmem:[%s3337_s19] sm:$0xff]  ;;  %s3344_s1 = sld [smem:[#allocation57_spill]] }
 0x156   :  { %v477_v6 = vmul.f32 4.0, %v2141_v3  ;;  %vm481_vm2 = vweird.f32 %v2141_v3  ;;  %v3063_v49 = vld [vmem:[%s3338_s9] sm:$0xff]  ;;  %s3345_s17 = sld [smem:[#allocation59_spill]] }
 0x157   :  { %550 = vmatpush.msra.mxu1 %v513_v27  ;;  %v558_v50 = vperm.slane %v3063_v49, 0  ;;  %v619_v27 = vperm.slane %v3063_v49, 3 }
 0x158   :  { %v478_v9 = vsub.f32 1.0, %v477_v6  ;;  %v516_v6 = vld [vmem:[%s3337_s19 + $0x28] sm:$0xff] }
 0x159   :  { %551 = vmatpush.msra.mxu1 %v512_v29 }
 0x15a   :  { %v479_v12 = vmul.f32 %v2141_v3, %v478_v9 }
 0x15b   :  { %552 = vmatpush.msra.mxu1 %v511_v31 }
 0x15c   :  { %v480_v15 = vadd.f32 %v2141_v3, %v479_v12 }
 0x15e   :  { %v3052_v18 = vsel %vm481_vm2, %v2141_v3, %v480_v15  ;;  %v518_v3 = vld [vmem:[%s3337_s19 + $0x38] sm:$0xff] }
 0x15f   :  { %610 = vmatpush.msrb.mxu2 %v518_v3 }
 0x1d2   :  { %v465_v7 = vpop.f32.mrf.mxu2 }
 0x1d3   :  { %v466_v8 = vadd.f32 %v465_v7, %v443_v5  ;;  %v517_v5 = vld [vmem:[%s3337_s19 + $0x30] sm:$0xff] }
 0x1d4   :  { %611 = vmatpush.msrb.mxu2 %v517_v5 }
 0x1d5   :  { %v469_v10 = vsel %vm468_vm1, %v466_v8, 0.0 }
 0x1d6   :  { %v470_v11 = vrot.slane %v469_v10, 4  ;;  %612 = vmatpush.msrb.mxu2 %v516_v6 }
 0x1d8   :  { %v471_v13 = vadd.f32 %v470_v11, %v469_v10 }
 0x1da   :  { %v472_v14 = vrot.slane %v471_v13, 2 }
 0x1dc   :  { %v473_v16 = vadd.f32 %v472_v14, %v471_v13 }
 0x1de   :  { %v474_v17 = vrot.slane %v473_v16, 1 }
 0x1e0   :  { %v475_v19 = vadd.f32 %v474_v17, %v473_v16 }
 0x1e2   :  { %v483_v20 = vmul.f32 %v3052_v18, %v475_v19 }
 0x1e4   :  { %v484_v21 = vsub.f32 %v466_v8, %v483_v20  ;;  %v515_v8 = vld [vmem:[%s3337_s19 + $0x20] sm:$0xff]  ;;  %v590_v20 = vperm.slane %v3063_v49, 1 }
 0x1e5   :  { %613 = vmatpush.msrb.mxu2 %v515_v8 }
 0x1e6   :  { %v485_v22 = vmul.f32 %v484_v21, %v484_v21 }
 0x1e8   :  { %v486_v23 = vsel %vm468_vm1, %v485_v22, 0.0 }
 0x1e9   :  { %v487_v24 = vrot.slane %v486_v23, 4 }
 0x1eb   :  { %v488_v25 = vadd.f32 %v487_v24, %v486_v23  ;;  %v592_v23 = vperm.slane %v3063_v49, 2 }
 0x1ed   :  { %v489_v28 = vrot.slane %v488_v25, 2 }
 0x1ef   :  { %v490_v30 = vadd.f32 %v489_v28, %v488_v25 }
 0x1f1   :  { %v491_v32 = vrot.slane %v490_v30, 1 }
 0x1f3   :  { %v492_v33 = vadd.f32 %v491_v32, %v490_v30 }
 0x1f5   :  { %v493_v34 = vmul.f32 %v492_v33, %v3052_v18 }
 0x1f7   :  { %v494_v35 = vadd.f32 1e-05, %v493_v34 }
 0x1f9   :  { %2142 = vrsqrt.f32 %v494_v35  ;;  %vm501_vm4 = vweird.f32 %v494_v35 }
 0x1ff   :  { %v2143_v36 = vpop.eup %2142 }
 0x200   :  { %v496_v37 = vmul.f32 %v2143_v36, %v494_v35  ;;  %vm502_vm3 = vweird.f32 %v2143_v36 }
 0x201   :  { %vm503_vm5 = vmor %vm501_vm4, %vm502_vm3 }
 0x202   :  { %v497_v38 = vmul.f32 %v2143_v36, %v496_v37 }
 0x204   :  { %v498_v39 = vmul.f32 0.5, %v497_v38 }
 0x206   :  { %v499_v40 = vsub.f32 1.5, %v498_v39 }
 0x208   :  { %v500_v41 = vmul.f32 %v2143_v36, %v499_v40 }
 0x20a   :  { %v504_v43 = vsel %vm503_vm5, %v2143_v36, %v500_v41 }
 0x20b   :  { %v505_v44 = vmul.f32 %v504_v43, %v484_v21 }
 0x20d   :  { %v507_v46 = vmul.f32 %v506_v42, %v505_v44  ;;  %v522_v44 = vld [vmem:[%s3337_s19 + $0x58] sm:$0xff] }
 0x20e   :  { %671 = vmatpush.msra.mxu3 %v522_v44 }
 0x20f   :  { %v509_v47 = vadd.f32 %v508_v45, %v507_v46  ;;  %v521_v45 = vld [vmem:[%s3337_s19 + $0x50] sm:$0xff] }
 0x210   :  { %672 = vmatpush.msra.mxu3 %v521_v45 }
 0x211   :  { %v510_v48 = vmax.f32 %v509_v47, 0.0  ;;  %v520_v47 = vld [vmem:[%s3337_s19 + $0x48] sm:$0xff] }
 0x212   :  { %673 = vmatpush.msra.mxu3 %v520_v47 }
 0x213   :  { %2051 = vmatmul.msk.f32.vlgmr.msra.gmra.mxu1 %vm533_vm6, %v510_v48 }
 0x290   :  { %v554_v51 = vpop.f32.mrf.mxu1 }
 0x291   :  { %v557_v52 = vadd.f32 %v554_v51, %v510_v48 }
 0x293   :  { %v559_v53 = vadd.f32 %v558_v50, %v557_v52  ;;  %v519_v50 = vld [vmem:[%s3337_s19 + $0x40] sm:$0xff] }
 0x294   :  { %674 = vmatpush.msra.mxu3 %v519_v50 }
 0x295   :  { %v560_v54 = vsel %vm468_vm1, %v559_v53, 0.0 }
 0x296   :  { %v561_v55 = vrot.slane %v560_v54, 4 }
 0x298   :  { %v562_v56 = vadd.f32 %v561_v55, %v560_v54 }
 0x29a   :  { %v563_v57 = vrot.slane %v562_v56, 2 }
 0x29c   :  { %v564_v58 = vadd.f32 %v563_v57, %v562_v56 }
 0x29e   :  { %v565_v59 = vrot.slane %v564_v58, 1 }
 0x2a0   :  { %v566_v60 = vadd.f32 %v565_v59, %v564_v58 }
 0x2a2   :  { %v567_v61 = vmul.f32 %v566_v60, %v3052_v18 }
 0x2a4   :  { %v568_v62 = vsub.f32 %v559_v53, %v567_v61  ;;  %v651_v61 = vperm.slane %v3063_v49, 4 }
 0x2a6   :  { %v569_v63 = vmul.f32 %v568_v62, %v568_v62 }
 0x2a8   :  { %v570_v0 = vsel %vm468_vm1, %v569_v63, 0.0 }
 0x2a9   :  { %v571_v1 = vrot.slane %v570_v0, 4 }
 0x2ab   :  { %v572_v2 = vadd.f32 %v571_v1, %v570_v0  ;;  %v653_v0 = vperm.slane %v3063_v49, 5 }
 0x2ad   :  { %v573_v4 = vrot.slane %v572_v2, 2 }
 0x2af   :  { %v574_v7 = vadd.f32 %v573_v4, %v572_v2  ;;  %v680_v4 = vperm.slane %v3063_v49, 6 }
 0x2b1   :  { %v575_v9 = vrot.slane %v574_v7, 1 }
 0x2b3   :  { %v576_v10 = vadd.f32 %v575_v9, %v574_v7 }
 0x2b5   :  { %v577_v11 = vmul.f32 %v576_v10, %v3052_v18 }
 0x2b7   :  { %v578_v12 = vadd.f32 1e-05, %v577_v11 }
 0x2b9   :  { %2144 = vrsqrt.f32 %v578_v12  ;;  %vm585_vm8 = vweird.f32 %v578_v12 }
 0x2bf   :  { %v2145_v13 = vpop.eup %2144 }
 0x2c0   :  { %v580_v14 = vmul.f32 %v2145_v13, %v578_v12  ;;  %vm586_vm7 = vweird.f32 %v2145_v13 }
 0x2c1   :  { %vm587_vm9 = vmor %vm585_vm8, %vm586_vm7  ;;  %vm868_vm8 = vcmask 486400  }
 0x2c2   :  { %v581_v15 = vmul.f32 %v2145_v13, %v580_v14 }
 0x2c4   :  { %v582_v16 = vmul.f32 0.5, %v581_v15 }
 0x2c6   :  { %v583_v17 = vsub.f32 1.5, %v582_v16 }
 0x2c8   :  { %v584_v19 = vmul.f32 %v2145_v13, %v583_v17 }
 0x2ca   :  { %v588_v21 = vsel %vm587_vm9, %v2145_v13, %v584_v19  ;;  %vm929_vm9 = vcmask 1043456  }
 0x2cb   :  { %v589_v22 = vmul.f32 %v588_v21, %v568_v62 }
 0x2cd   :  { %v591_v24 = vmul.f32 %v590_v20, %v589_v22  ;;  %v526_v22 = vld [vmem:[%s3337_s19 + $0x78] sm:$0xff] }
 0x2ce   :  { %732 = vmatpush.msrb.mxu1 %v526_v22 }
 0x2cf   :  { %v593_v25 = vadd.f32 %v592_v23, %v591_v24  ;;  %v525_v24 = vld [vmem:[%s3337_s19 + $0x70] sm:$0xff] }
 0x2d0   :  { %733 = vmatpush.msrb.mxu1 %v525_v24 }
 0x2d1   :  { %v594_v26 = vmax.f32 %v593_v25, 0.0  ;;  %v524_v25 = vld [vmem:[%s3337_s19 + $0x68] sm:$0xff] }
 0x2d2   :  { %734 = vmatpush.msrb.mxu1 %v524_v25 }
 0x2d3   :  { %2052 = vmatmul.msk.f32.vlgmr.msrb.gmra.mxu2 %vm533_vm6, %v594_v26 }
 0x356   :  { %v615_v28 = vpop.f32.mrf.mxu2 }
 0x357   :  { %v618_v29 = vadd.f32 %v615_v28, %v594_v26 }
 0x359   :  { %v620_v30 = vadd.f32 %v619_v27, %v618_v29  ;;  %v523_v27 = vld [vmem:[%s3337_s19 + $0x60] sm:$0xff] }
 0x35a   :  { %735 = vmatpush.msrb.mxu1 %v523_v27 }
 0x35b   :  { %v621_v31 = vsel %vm468_vm1, %v620_v30, 0.0 }
 0x35c   :  { %v622_v32 = vrot.slane %v621_v31, 4 }
 0x35e   :  { %v623_v33 = vadd.f32 %v622_v32, %v621_v31 }
 0x360   :  { %v624_v34 = vrot.slane %v623_v33, 2 }
 0x362   :  { %v625_v35 = vadd.f32 %v624_v34, %v623_v33 }
 0x364   :  { %v626_v36 = vrot.slane %v625_v35, 1 }
 0x366   :  { %v627_v37 = vadd.f32 %v626_v36, %v625_v35 }
 0x368   :  { %v628_v38 = vmul.f32 %v627_v37, %v3052_v18 }
 0x36a   :  { %v629_v39 = vsub.f32 %v620_v30, %v628_v38  ;;  %v3099_v38 = vld [vmem:[%s3338_s9 + $0x8] sm:$0x7f] }
 0x36c   :  { %v630_v40 = vmul.f32 %v629_v39, %v629_v39 }
 0x36e   :  { %v631_v41 = vsel %vm468_vm1, %v630_v40, 0.0 }
 0x36f   :  { %v632_v42 = vrot.slane %v631_v41, 4 }
 0x371   :  { %v633_v43 = vadd.f32 %v632_v42, %v631_v41  ;;  %v714_v42 = vperm.slane %v3099_v38, 0 }
 0x373   :  { %v634_v46 = vrot.slane %v633_v43, 2 }
 0x375   :  { %v635_v48 = vadd.f32 %v634_v46, %v633_v43  ;;  %v741_v46 = vperm.slane %v3099_v38, 1 }
 0x377   :  { %v636_v51 = vrot.slane %v635_v48, 1 }
 0x379   :  { %v637_v52 = vadd.f32 %v636_v51, %v635_v48 }
 0x37b   :  { %v638_v53 = vmul.f32 %v637_v52, %v3052_v18 }
 0x37d   :  { %v639_v54 = vadd.f32 1e-05, %v638_v53 }
 0x37f   :  { %2146 = vrsqrt.f32 %v639_v54  ;;  %vm646_vm11 = vweird.f32 %v639_v54 }
 0x385   :  { %v2147_v55 = vpop.eup %2146 }
 0x386   :  { %v641_v56 = vmul.f32 %v2147_v55, %v639_v54  ;;  %vm647_vm10 = vweird.f32 %v2147_v55 }
 0x387   :  { %vm648_vm12 = vmor %vm646_vm11, %vm647_vm10 }
 0x388   :  { %v642_v57 = vmul.f32 %v2147_v55, %v641_v56 }
 0x38a   :  { %v643_v58 = vmul.f32 0.5, %v642_v57 }
 0x38c   :  { %v644_v59 = vsub.f32 1.5, %v643_v58 }
 0x38e   :  { %v645_v60 = vmul.f32 %v2147_v55, %v644_v59 }
 0x390   :  { %v649_v62 = vsel %vm648_vm12, %v2147_v55, %v645_v60 }
 0x391   :  { %v650_v63 = vmul.f32 %v649_v62, %v629_v39  ;;  %v712_v39 = vperm.slane %v3063_v49, 7 }
 0x393   :  { %v652_v1 = vmul.f32 %v651_v61, %v650_v63  ;;  %v530_v63 = vld [vmem:[%s3337_s19 + $0x98] sm:$0xff] }
 0x394   :  { %793 = vmatpush.msra.mxu1 %v530_v63 }
 0x395   :  { %v654_v2 = vadd.f32 %v653_v0, %v652_v1  ;;  %v529_v1 = vld [vmem:[%s3337_s19 + $0x90] sm:$0xff] }
 0x396   :  { %794 = vmatpush.msra.mxu1 %v529_v1 }
 0x397   :  { %v655_v3 = vmax.f32 %v654_v2, 0.0 }
 0x399   :  { %2053 = vmatmul.msk.f32.vlgmr.msra.gmra.mxu3 %vm533_vm6, %v655_v3 }
 0x41c   :  { %v676_v5 = vpop.f32.mrf.mxu3 }
 0x41d   :  { %v679_v6 = vadd.f32 %v676_v5, %v655_v3  ;;  %v528_v3 = vld [vmem:[%s3337_s19 + $0x88] sm:$0xff]  ;;  %v527_v5 = vld [vmem:[%s3337_s19 + $0x80] sm:$0xff] }
 0x41e   :  { %795 = vmatpush.msra.mxu1 %v528_v3 }
 0x41f   :  { %v681_v7 = vadd.f32 %v680_v4, %v679_v6 }
 0x420   :  { %796 = vmatpush.msra.mxu1 %v527_v5 }
 0x421   :  { %v682_v8 = vsel %vm468_vm1, %v681_v7, 0.0 }
 0x422   :  { %v683_v9 = vrot.slane %v682_v8, 4 }
 0x424   :  { %v684_v10 = vadd.f32 %v683_v9, %v682_v8 }
 0x426   :  { %v685_v11 = vrot.slane %v684_v10, 2 }
 0x428   :  { %v686_v12 = vadd.f32 %v685_v11, %v684_v10 }
 0x42a   :  { %v687_v13 = vrot.slane %v686_v12, 1 }
 0x42c   :  { %v688_v14 = vadd.f32 %v687_v13, %v686_v12 }
 0x42e   :  { %v689_v15 = vmul.f32 %v688_v14, %v3052_v18 }
 0x430   :  { %v690_v16 = vsub.f32 %v681_v7, %v689_v15  ;;  %v773_v15 = vperm.slane %v3099_v38, 2 }
 0x432   :  { %v691_v17 = vmul.f32 %v690_v16, %v690_v16 }
 0x434   :  { %v692_v19 = vsel %vm468_vm1, %v691_v17, 0.0 }
 0x435   :  { %v693_v20 = vrot.slane %v692_v19, 4 }
 0x437   :  { %v694_v21 = vadd.f32 %v693_v20, %v692_v19  ;;  %v775_v19 = vperm.slane %v3099_v38, 3 }
 0x439   :  { %v695_v23 = vrot.slane %v694_v21, 2 }
 0x43b   :  { %v696_v26 = vadd.f32 %v695_v23, %v694_v21  ;;  %v802_v23 = vperm.slane %v3099_v38, 4 }
 0x43d   :  { %v697_v28 = vrot.slane %v696_v26, 1 }
 0x43f   :  { %v698_v29 = vadd.f32 %v697_v28, %v696_v26 }
 0x441   :  { %v699_v30 = vmul.f32 %v698_v29, %v3052_v18 }
 0x443   :  { %v700_v31 = vadd.f32 1e-05, %v699_v30 }
 0x445   :  { %2148 = vrsqrt.f32 %v700_v31  ;;  %vm707_vm14 = vweird.f32 %v700_v31 }
 0x44b   :  { %v2149_v32 = vpop.eup %2148 }
 0x44c   :  { %v702_v33 = vmul.f32 %v2149_v32, %v700_v31  ;;  %vm708_vm13 = vweird.f32 %v2149_v32 }
 0x44d   :  { %vm709_vm15 = vmor %vm707_vm14, %vm708_vm13  ;;  %vm925_vm13 = vcmask 490496   ;;  %vm1019_vm14 = vcmask 523264  }
 0x44e   :  { %v703_v34 = vmul.f32 %v2149_v32, %v702_v33 }
 0x450   :  { %v704_v35 = vmul.f32 0.5, %v703_v34 }
 0x452   :  { %v705_v36 = vsub.f32 1.5, %v704_v35 }
 0x454   :  { %v706_v37 = vmul.f32 %v2149_v32, %v705_v36 }
 0x456   :  { %v710_v40 = vsel %vm709_vm15, %v2149_v32, %v706_v37 }
 0x457   :  { %v711_v41 = vmul.f32 %v710_v40, %v690_v16 }
 0x459   :  { %v713_v43 = vmul.f32 %v712_v39, %v711_v41  ;;  %v843_v41 = vld [vmem:[#allocation7 + $0x18] sm:$0xff] }
 0x45a   :  { %860 = vmatpush.msra.mxu2 %v843_v41 }
 0x45b   :  { %v715_v44 = vadd.f32 %v714_v42, %v713_v43  ;;  %v842_v43 = vld [vmem:[#allocation7 + $0x10] sm:$0xff] }
 0x45c   :  { %861 = vmatpush.msra.mxu2 %v842_v43 }
 0x45d   :  { %v716_v45 = vmax.f32 %v715_v44, 0.0 }
 0x45f   :  { %2054 = vmatmul.msk.f32.vlgmr.msrb.gmra.mxu1 %vm533_vm6, %v716_v45 }
 0x4dc   :  { %v737_v47 = vpop.f32.mrf.mxu1 }
 0x4dd   :  { %v740_v48 = vadd.f32 %v737_v47, %v716_v45  ;;  %v841_v45 = vld [vmem:[#allocation7 + $0x8] sm:$0xff]  ;;  %v840_v47 = vld [vmem:[#allocation7] sm:$0xff] }
 0x4de   :  { %862 = vmatpush.msra.mxu2 %v841_v45 }
 0x4df   :  { %v742_v50 = vadd.f32 %v741_v46, %v740_v48 }
 0x4e0   :  { %863 = vmatpush.msra.mxu2 %v840_v47 }
 0x4e1   :  { %v743_v51 = vsel %vm468_vm1, %v742_v50, 0.0 }
 0x4e2   :  { %v744_v52 = vrot.slane %v743_v51, 4 }
 0x4e4   :  { %v745_v49 = vadd.f32 %v744_v52, %v743_v51 }
 0x4e6   :  { %v746_v53 = vrot.slane %v745_v49, 2 }
 0x4e8   :  { %v747_v54 = vadd.f32 %v746_v53, %v745_v49 }
 0x4ea   :  { %v748_v55 = vrot.slane %v747_v54, 1 }
 0x4ec   :  { %v749_v56 = vadd.f32 %v748_v55, %v747_v54 }
 0x4ee   :  { %v750_v57 = vmul.f32 %v749_v56, %v3052_v18 }
 0x4f0   :  { %v751_v58 = vsub.f32 %v742_v50, %v750_v57  ;;  %v834_v57 = vperm.slane %v3099_v38, 5 }
 0x4f2   :  { %v752_v59 = vmul.f32 %v751_v58, %v751_v58 }
 0x4f4   :  { %v753_v60 = vsel %vm468_vm1, %v752_v59, 0.0 }
 0x4f5   :  { %v754_v61 = vrot.slane %v753_v60, 4 }
 0x4f7   :  { %v755_v62 = vadd.f32 %v754_v61, %v753_v60  ;;  %v836_v60 = vperm.slane %v3099_v38, 6 }
 0x4f9   :  { %v756_v0 = vrot.slane %v755_v62, 2 }
 0x4fb   :  { %v757_v2 = vadd.f32 %v756_v0, %v755_v62  ;;  %v3124_v0 = vld [vmem:[#allocation9] sm:$0x7] }
 0x4fc   :  { %v844_v1 = vperm.slane %v3124_v0, 0 }
 0x4fd   :  { %v758_v4 = vrot.slane %v757_v2, 1 }
 0x4ff   :  { %v759_v6 = vadd.f32 %v758_v4, %v757_v2 }
 0x501   :  { %v760_v7 = vmul.f32 %v759_v6, %v3052_v18 }
 0x503   :  { %v761_v8 = vadd.f32 1e-05, %v760_v7 }
 0x505   :  { %2150 = vrsqrt.f32 %v761_v8  ;;  %vm768_vm2 = vweird.f32 %v761_v8 }
 0x50b   :  { %v2151_v9 = vpop.eup %2150 }
 0x50c   :  { %v763_v10 = vmul.f32 %v2151_v9, %v761_v8  ;;  %vm769_vm0 = vweird.f32 %v2151_v9 }
 0x50d   :  { %vm770_vm3 = vmor %vm768_vm2, %vm769_vm0 }
 0x50e   :  { %v764_v11 = vmul.f32 %v2151_v9, %v763_v10  ;;  %v917_v10 = vld [vmem:[%s3339_s26 + $0x70] sm:$0xf] }
 0x50f   :  { %2057 = vmatpush.msk.msrb.mxu3 %vm929_vm9, %v917_v10  ;;  %v1237_v10 = vld [vmem:[#allocation19 + $0x38] sm:$0xff] }
 0x510   :  { %v765_v12 = vmul.f32 0.5, %v764_v11  ;;  %v918_v11 = vld [vmem:[%s3339_s26 + $0x78] sm:$0xf] }
 0x511   :  { %2059 = vmatpush.msk.msra.mxu0 %vm929_vm9, %v918_v11  ;;  %v1236_v11 = vld [vmem:[#allocation19 + $0x30] sm:$0xff] }
 0x512   :  { %v766_v13 = vsub.f32 1.5, %v765_v12 }
 0x514   :  { %v767_v14 = vmul.f32 %v2151_v9, %v766_v13  ;;  %v915_v13 = vld [vmem:[%s3339_s26 + $0x60] sm:$0xff] }
 0x515   :  { %945 = vmatpush.msrb.mxu3 %v915_v13  ;;  %v1234_v13 = vld [vmem:[#allocation19 + $0x20] sm:$0xff] }
 0x516   :  { %v771_v16 = vsel %vm770_vm3, %v2151_v9, %v767_v14  ;;  %v916_v14 = vld [vmem:[%s3339_s26 + $0x68] sm:$0xff] }
 0x517   :  { %v772_v17 = vmul.f32 %v771_v16, %v751_v58  ;;  %965 = vmatpush.msra.mxu0 %v916_v14  ;;  %v913_v16 = vld [vmem:[%s3339_s26 + $0x50] sm:$0xff] }
 0x518   :  { %946 = vmatpush.msrb.mxu3 %v913_v16 }
 0x519   :  { %v774_v20 = vmul.f32 %v773_v15, %v772_v17  ;;  %v914_v17 = vld [vmem:[%s3339_s26 + $0x58] sm:$0xff] }
 0x51a   :  { %966 = vmatpush.msra.mxu0 %v914_v17 }
 0x51b   :  { %v776_v21 = vadd.f32 %v775_v19, %v774_v20  ;;  %v911_v20 = vld [vmem:[%s3339_s26 + $0x40] sm:$0xff] }
 0x51c   :  { %947 = vmatpush.msrb.mxu3 %v911_v20 }
 0x51d   :  { %v777_v22 = vmax.f32 %v776_v21, 0.0  ;;  %v912_v21 = vld [vmem:[%s3339_s26 + $0x48] sm:$0xff] }
 0x51e   :  { %967 = vmatpush.msra.mxu0 %v912_v21 }
 0x51f   :  { %2055 = vmatmul.msk.f32.vlgmr.msra.gmra.mxu1 %vm533_vm6, %v777_v22 }
 0x59c   :  { %v798_v24 = vpop.f32.mrf.mxu1 }
 0x59d   :  { %v801_v25 = vadd.f32 %v798_v24, %v777_v22  ;;  %v909_v24 = vld [vmem:[%s3339_s26 + $0x30] sm:$0xff] }
 0x59e   :  { %948 = vmatpush.msrb.mxu3 %v909_v24 }
 0x59f   :  { %v803_v26 = vadd.f32 %v802_v23, %v801_v25  ;;  %v910_v25 = vld [vmem:[%s3339_s26 + $0x38] sm:$0xff] }
 0x5a0   :  { %968 = vmatpush.msra.mxu0 %v910_v25 }
 0x5a1   :  { %v804_v27 = vsel %vm468_vm1, %v803_v26, 0.0 }
 0x5a2   :  { %v805_v28 = vrot.slane %v804_v27, 4 }
 0x5a4   :  { %v806_v29 = vadd.f32 %v805_v28, %v804_v27  ;;  %v907_v27 = vld [vmem:[%s3339_s26 + $0x20] sm:$0xff]  ;;  %v908_v28 = vld [vmem:[%s3339_s26 + $0x28] sm:$0xff] }
 0x5a5   :  { %949 = vmatpush.msrb.mxu3 %v907_v27  ;;  %969 = vmatpush.msra.mxu0 %v908_v28  ;;  %v1125_v27 = vld [vmem:[#allocation13 + $0x10] sm:$0xff] }
 0x5a6   :  { %v807_v30 = vrot.slane %v806_v29, 2 }
 0x5a8   :  { %v808_v31 = vadd.f32 %v807_v30, %v806_v29  ;;  %v905_v30 = vld [vmem:[%s3339_s26 + $0x10] sm:$0xff] }
 0x5a9   :  { %950 = vmatpush.msrb.mxu3 %v905_v30  ;;  %v1124_v30 = vld [vmem:[#allocation13 + $0x8] sm:$0xff] }
 0x5aa   :  { %v809_v32 = vrot.slane %v808_v31, 1 }
 0x5ac   :  { %v810_v33 = vadd.f32 %v809_v32, %v808_v31  ;;  %v906_v31 = vld [vmem:[%s3339_s26 + $0x18] sm:$0xff]  ;;  %v903_v32 = vld [vmem:[%s3339_s26] sm:$0xff] }
 0x5ad   :  { %970 = vmatpush.msra.mxu0 %v906_v31  ;;  %951 = vmatpush.msrb.mxu3 %v903_v32  ;;  %v1123_v32 = vld [vmem:[#allocation13] sm:$0xff] }
 0x5ae   :  { %v811_v34 = vmul.f32 %v810_v33, %v3052_v18  ;;  %v904_v33 = vld [vmem:[%s3339_s26 + $0x8] sm:$0xff] }
 0x5af   :  { %971 = vmatpush.msra.mxu0 %v904_v33 }
 0x5b0   :  { %v812_v35 = vsub.f32 %v803_v26, %v811_v34 }
 0x5b2   :  { %v813_v36 = vmul.f32 %v812_v35, %v812_v35 }
 0x5b4   :  { %v814_v37 = vsel %vm468_vm1, %v813_v36, 0.0 }
 0x5b5   :  { %v815_v39 = vrot.slane %v814_v37, 4 }
 0x5b7   :  { %v816_v40 = vadd.f32 %v815_v39, %v814_v37 }
 0x5b9   :  { %v817_v42 = vrot.slane %v816_v40, 2 }
 0x5bb   :  { %v818_v44 = vadd.f32 %v817_v42, %v816_v40 }
 0x5bd   :  { %v819_v46 = vrot.slane %v818_v44, 1 }
 0x5bf   :  { %v820_v48 = vadd.f32 %v819_v46, %v818_v44  ;;  %v899_v46 = vperm.slane %v3124_v0, 1 }
 0x5c1   :  { %v821_v50 = vmul.f32 %v820_v48, %v3052_v18 }
 0x5c3   :  { %v822_v51 = vadd.f32 1e-05, %v821_v50  ;;  %v901_v50 = vperm.slane %v3124_v0, 2  ;;  %v1013_v0 = vld [vmem:[%s3340_s4 + $0x10] sm:$0xff] }
 0x5c5   :  { %2152 = vrsqrt.f32 %v822_v51  ;;  %vm829_vm5 = vweird.f32 %v822_v51 }
 0x5cb   :  { %v2153_v52 = vpop.eup %2152 }
 0x5cc   :  { %v824_v49 = vmul.f32 %v2153_v52, %v822_v51  ;;  %vm830_vm4 = vweird.f32 %v2153_v52 }
 0x5cd   :  { %vm831_vm7 = vmor %vm829_vm5, %vm830_vm4 }
 0x5ce   :  { %v825_v53 = vmul.f32 %v2153_v52, %v824_v49  ;;  %v978_v49 = vld [vmem:[#allocation12 + $0x10] sm:$0xff] }
 0x5d0   :  { %v826_v54 = vmul.f32 0.5, %v825_v53  ;;  %v977_v53 = vld [vmem:[#allocation12 + $0x8] sm:$0xff] }
 0x5d2   :  { %v827_v55 = vsub.f32 1.5, %v826_v54  ;;  %v976_v54 = vld [vmem:[#allocation12] sm:$0xff] }
 0x5d4   :  { %v828_v56 = vmul.f32 %v2153_v52, %v827_v55  ;;  %v1018_v55 = vld [vmem:[%s3340_s4 + $0x38] sm:$0xff] }
 0x5d5   :  { %1031 = vmatpush.msrb.mxu2 %v1018_v55 }
 0x5d6   :  { %v832_v58 = vsel %vm831_vm7, %v2153_v52, %v828_v56  ;;  %v979_v52 = vld [vmem:[#allocation12 + $0x18] sm:$0xff] }
 0x5d7   :  { %v833_v59 = vmul.f32 %v832_v58, %v812_v35  ;;  %999 = vmatpush.msrb.mxu1 %v979_v52  ;;  %v919_v56 = vld [vmem:[#allocation10] sm:$0x3] }
 0x5d9   :  { %v835_v61 = vmul.f32 %v834_v57, %v833_v59  ;;  %1000 = vmatpush.msrb.mxu1 %v978_v49  ;;  %v921_v57 = vperm.slane %v919_v56, 0 }
 0x5db   :  { %v837_v62 = vadd.f32 %v836_v60, %v835_v61  ;;  %1001 = vmatpush.msrb.mxu1 %v977_v53  ;;  %v1017_v60 = vld [vmem:[%s3340_s4 + $0x30] sm:$0xff]  ;;  %v1016_v61 = vld [vmem:[%s3340_s4 + $0x28] sm:$0xff] }
 0x5dc   :  { %1032 = vmatpush.msrb.mxu2 %v1017_v60 }
 0x5dd   :  { %v838_v63 = vmax.f32 %v837_v62, 0.0  ;;  %1002 = vmatpush.msrb.mxu1 %v976_v54  ;;  %v1015_v62 = vld [vmem:[%s3340_s4 + $0x20] sm:$0xff] }
 0x5de   :  { %1033 = vmatpush.msrb.mxu2 %v1016_v61 }
 0x5df   :  { %2056 = vmatmul.msk.f32.vlgmr.msra.gmra.mxu2 %vm533_vm6, %v838_v63  ;;  %v1014_v63 = vld [vmem:[%s3340_s4 + $0x18] sm:$0xff] }
 0x5e0   :  { %1034 = vmatpush.msrb.mxu2 %v1015_v62 }
 0x5e2   :  { %1035 = vmatpush.msrb.mxu2 %v1014_v63 }
 0x5e4   :  { %1036 = vmatpush.msrb.mxu2 %v1013_v0 }
 0x662   :  { %v865_v2 = vpop.f32.mrf.mxu2 }
 0x663   :  { %v866_v3 = vadd.f32 %v865_v2, %v844_v1  ;;  %v1012_v1 = vld [vmem:[%s3340_s4 + $0x8] sm:$0xff]  ;;  %v1011_v2 = vld [vmem:[%s3340_s4] sm:$0xff] }
 0x664   :  { %1037 = vmatpush.msrb.mxu2 %v1012_v1 }
 0x665   :  { %v869_v4 = vsel %vm868_vm8, %v866_v3, 0.0 }
 0x666   :  { %v870_v5 = vrot.slane %v869_v4, 4  ;;  %1038 = vmatpush.msrb.mxu2 %v1011_v2 }
 0x668   :  { %v871_v38 = vadd.f32 %v870_v5, %v869_v4  ;;  %v1009_v4 = vld [vmem:[#allocation15 + $0x10] sm:$0xff]  ;;  %v1008_v5 = vld [vmem:[#allocation15 + $0x8] sm:$0xff] }
 0x66a   :  { %v872_v6 = vrot.slane %v871_v38, 2 }
 0x66c   :  { %v873_v7 = vadd.f32 %v872_v6, %v871_v38  ;;  %v1007_v38 = vld [vmem:[#allocation15] sm:$0xff]  ;;  %v2137_v6 = vld [vmem:[%s3341_s29] ss:$0 sm:$0xff] }
 0x66e   :  { %v874_v8 = vrot.slane %v873_v7, 1 }
 0x670   :  { %v875_v9 = vadd.f32 %v874_v8, %v873_v7 }
 0x672   :  { %v876_v12 = vmul.f32 %v875_v9, %v3052_v18 }
 0x674   :  { %v877_v15 = vsub.f32 %v866_v3, %v876_v12  ;;  %v1010_v3 = vld [vmem:[#allocation15 + $0x18] sm:$0xff]  ;;  %v1235_v12 = vld [vmem:[#allocation19 + $0x28] sm:$0xff] }
 0x675   :  { %1059 = vmatpush.msra.mxu1 %v1010_v3  ;;  %1091 = vmatpush.msra.mxu3 %v1010_v3 }
 0x676   :  { %v878_v19 = vmul.f32 %v877_v15, %v877_v15  ;;  %1198 = vmatpush.msra.mxu2 %v1010_v3 }
 0x677   :  { %1060 = vmatpush.msra.mxu1 %v1009_v4  ;;  %1092 = vmatpush.msra.mxu3 %v1009_v4 }
 0x678   :  { %v879_v22 = vsel %vm868_vm8, %v878_v19, 0.0  ;;  %1199 = vmatpush.msra.mxu2 %v1009_v4 }
 0x679   :  { %v880_v23 = vrot.slane %v879_v22, 4  ;;  %1061 = vmatpush.msra.mxu1 %v1008_v5  ;;  %1093 = vmatpush.msra.mxu3 %v1008_v5 }
 0x67a   :  { %1200 = vmatpush.msra.mxu2 %v1008_v5 }
 0x67b   :  { %v881_v26 = vadd.f32 %v880_v23, %v879_v22  ;;  %1062 = vmatpush.msra.mxu1 %v1007_v38  ;;  %1094 = vmatpush.msra.mxu3 %v1007_v38 }
 0x67c   :  { %1201 = vmatpush.msra.mxu2 %v1007_v38 }
 0x67d   :  { %v882_v29 = vrot.slane %v881_v26, 2 }
 0x67f   :  { %v883_v34 = vadd.f32 %v882_v29, %v881_v26  ;;  %v1126_v26 = vld [vmem:[#allocation13 + $0x18] sm:$0xff] }
 0x680   :  { %1142 = vmatpush.msrb.mxu0 %v1126_v26  ;;  %v1304_v26 = vld [vmem:[%s3342_s28 + $0x30] sm:$0xff] }
 0x681   :  { %v884_v35 = vrot.slane %v883_v34, 1 }
 0x682   :  { %1143 = vmatpush.msrb.mxu0 %v1125_v27 }
 0x683   :  { %v885_v36 = vadd.f32 %v884_v35, %v883_v34 }
 0x684   :  { %1144 = vmatpush.msrb.mxu0 %v1124_v30  ;;  %v1150_v30 = vld [vmem:[#allocation18] sm:$0x3] }
 0x685   :  { %v886_v37 = vmul.f32 %v885_v36, %v3052_v18 }
 0x686   :  { %1145 = vmatpush.msrb.mxu0 %v1123_v32 }
 0x687   :  { %v887_v39 = vadd.f32 1e-05, %v886_v37 }
 0x689   :  { %2154 = vrsqrt.f32 %v887_v39  ;;  %vm894_vm11 = vweird.f32 %v887_v39 }
 0x68f   :  { %v2155_v40 = vpop.eup %2154 }
 0x690   :  { %v889_v41 = vmul.f32 %v2155_v40, %v887_v39  ;;  %vm895_vm10 = vweird.f32 %v2155_v40 }
 0x691   :  { %vm896_vm12 = vmor %vm894_vm11, %vm895_vm10 }
 0x692   :  { %v890_v42 = vmul.f32 %v2155_v40, %v889_v41 }
 0x694   :  { %v891_v43 = vmul.f32 0.5, %v890_v42 }
 0x696   :  { %v892_v44 = vsub.f32 1.5, %v891_v43 }
 0x698   :  { %v893_v45 = vmul.f32 %v2155_v40, %v892_v44 }
 0x69a   :  { %v897_v47 = vsel %vm896_vm12, %v2155_v40, %v893_v45  ;;  %v1043_v45 = vld [vmem:[#allocation16] sm:$0x3] }
 0x69b   :  { %v898_v48 = vmul.f32 %v897_v47, %v877_v15  ;;  %v1118_v47 = vperm.slane %v1043_v45, 0 }
 0x69d   :  { %v900_v51 = vmul.f32 %v899_v46, %v898_v48 }
 0x69f   :  { %v902_v18 = vadd.f32 %v901_v50, %v900_v51  ;;  %v1120_v51 = vperm.slane %v1043_v45, 1 }
 0x6a1   :  { %2058 = vmatmul.msk.f32.vlgmr.msrb.gmra.mxu3 %vm925_vm13, %v902_v18  ;;  %2060 = vmatmul.msk.f32.vlgmr.msra.gmra.mxu0 %vm925_vm13, %v902_v18 }
 0x6a2   :  { %1254 = vmatpush.msrb.mxu3 %v1237_v10 }
 0x6a4   :  { %1255 = vmatpush.msrb.mxu3 %v1236_v11  ;;  %v1313_v11 = vld [vmem:[%s3342_s28 + $0x78] sm:$0xff] }
 0x6a6   :  { %1256 = vmatpush.msrb.mxu3 %v1235_v12  ;;  %v1312_v12 = vld [vmem:[%s3342_s28 + $0x70] sm:$0xff] }
 0x6a8   :  { %1257 = vmatpush.msrb.mxu3 %v1234_v13 }
 0x71e   :  { %v3168_v53 = vpop.f32.mrf.mxu0 }
 0x724   :  { %v953_v58 = vpop.f32.mrf.mxu3 }
 0x725   :  { %v954_v59 = vadd.f32 %v953_v58, %v921_v57 }
 0x727   :  { %1238 = vrot.lane.b32.xlu0 %v954_v59, %s2751_s23  ;;  %2061 = vmatmul.msk.f32.vlgmr.msrb.gmra.mxu1 %vm533_vm6, %v954_v59 }
 0x728   :  { %1166 = vmatpush.msrb.mxu1 %v1010_v3 }
 0x72a   :  { %1167 = vmatpush.msrb.mxu1 %v1009_v4  ;;  %v1233_v4 = vld [vmem:[#allocation19 + $0x18] sm:$0xff] }
 0x72b   :  { %1277 = vmatpush.msra.mxu0 %v1233_v4 }
 0x72c   :  { %1168 = vmatpush.msrb.mxu1 %v1008_v5  ;;  %v1232_v5 = vld [vmem:[#allocation19 + $0x10] sm:$0xff] }
 0x72d   :  { %1278 = vmatpush.msra.mxu0 %v1232_v5 }
 0x72e   :  { %1169 = vmatpush.msrb.mxu1 %v1007_v38 }
 0x72f   :  { %1558 = vrot.lane.b32.xlu0 %v954_v59, %s2752_s27 }
 0x799   :  { %v1239_v25 = vpop.permute.xlu0 %1238 }
 0x7a4   :  { %v1004_v7 = vpop.f32.mrf.mxu1 }
 0x7a5   :  { %v1005_v8 = vadd.f32 %v2137_v6, %v1004_v7  ;;  %v1231_v6 = vld [vmem:[#allocation19 + $0x8] sm:$0xff] }
 0x7a6   :  { %1279 = vmatpush.msra.mxu0 %v1231_v6 }
 0x7a7   :  { %2062 = vmatmul.msk.f32.vlgmr.msrb.gmra.mxu2 %vm1019_vm14, %v1005_v8  ;;  %v1230_v8 = vld [vmem:[#allocation19] sm:$0xff] }
 0x7a8   :  { %1280 = vmatpush.msra.mxu0 %v1230_v8 }
 0x82a   :  { %v1040_v9 = vpop.f32.mrf.mxu2 }
 0x82b   :  { %2063 = vmatmul.msk.f32.vlgmr.msra.gmra.mxu1 %vm533_vm6, %v1040_v9 }
 0x82c   :  { %1314 = vmatpush.msra.mxu1 %v1313_v11 }
 0x82e   :  { %1315 = vmatpush.msra.mxu1 %v1312_v12 }
 0x8a8   :  { %v1064_v14 = vpop.f32.mrf.mxu1 }
 0x8a9   :  { %v1067_v15 = vsel %vm468_vm1, %v1064_v14, 0.0  ;;  %v1311_v14 = vld [vmem:[%s3342_s28 + $0x68] sm:$0xff] }
 0x8aa   :  { %v1068_v16 = vrot.slane %v1067_v15, 4  ;;  %1316 = vmatpush.msra.mxu1 %v1311_v14  ;;  %v1421_v14 = vld [vmem:[#allocation22 + $0x30] sm:$0xff] }
 0x8ac   :  { %v1069_v17 = vadd.f32 %v1068_v16, %v1067_v15  ;;  %v1310_v16 = vld [vmem:[%s3342_s28 + $0x60] sm:$0xff] }
 0x8ad   :  { %1317 = vmatpush.msra.mxu1 %v1310_v16  ;;  %v1419_v16 = vld [vmem:[#allocation22 + $0x20] sm:$0xff] }
 0x8ae   :  { %v1070_v19 = vrot.slane %v1069_v17, 2 }
 0x8b0   :  { %v1071_v20 = vadd.f32 %v1070_v19, %v1069_v17  ;;  %v1309_v17 = vld [vmem:[%s3342_s28 + $0x58] sm:$0xff]  ;;  %v1308_v19 = vld [vmem:[%s3342_s28 + $0x50] sm:$0xff] }
 0x8b1   :  { %1318 = vmatpush.msra.mxu1 %v1309_v17  ;;  %v1418_v17 = vld [vmem:[#allocation22 + $0x18] sm:$0xff] }
 0x8b2   :  { %v1072_v21 = vrot.slane %v1071_v20, 1 }
 0x8b3   :  { %1319 = vmatpush.msra.mxu1 %v1308_v19  ;;  %v1417_v19 = vld [vmem:[#allocation22 + $0x10] sm:$0xff] }
 0x8b4   :  { %v1073_v22 = vadd.f32 %v1072_v21, %v1071_v20  ;;  %v1307_v20 = vld [vmem:[%s3342_s28 + $0x48] sm:$0xff] }
 0x8b5   :  { %1320 = vmatpush.msra.mxu1 %v1307_v20  ;;  %v1416_v20 = vld [vmem:[#allocation22 + $0x8] sm:$0xff] }
 0x8b6   :  { %v1074_v23 = vsub.f32 %v1040_v9, %v1073_v22  ;;  %v1306_v22 = vld [vmem:[%s3342_s28 + $0x40] sm:$0xff] }
 0x8b7   :  { %1321 = vmatpush.msra.mxu1 %v1306_v22 }
 0x8b8   :  { %v1075_v24 = vmul.f32 %v1074_v23, %v1074_v23 }
 0x8ba   :  { %2064 = vmatmul.msk.f32.vlgmr.msra.gmra.mxu3 %vm533_vm6, %v1075_v24  ;;  %v1305_v24 = vld [vmem:[%s3342_s28 + $0x38] sm:$0xff] }
 0x8bb   :  { %1322 = vmatpush.msra.mxu1 %v1305_v24 }
 0x8bd   :  { %1323 = vmatpush.msra.mxu1 %v1304_v26  ;;  %v1554_v26 = vld [vmem:[%s3343_s8 + $0xe0] sm:$0xff] }
 0x8c2   :  { %2068 = vmatmul.msk.f32.vlgmr.msrb.gmra.mxu3 %vm533_vm6, %v1239_v25 }
 0x93d   :  { %v1096_v28 = vpop.f32.mrf.mxu3 }
 0x93e   :  { %v1099_v29 = vsel %vm468_vm1, %v1096_v28, 0.0  ;;  %v1303_v28 = vld [vmem:[%s3342_s28 + $0x28] sm:$0xff] }
 0x93f   :  { %v1100_v31 = vrot.slane %v1099_v29, 4  ;;  %1324 = vmatpush.msra.mxu1 %v1303_v28  ;;  %v1552_v28 = vld [vmem:[%s3343_s8 + $0xd0] sm:$0xff] }
 0x941   :  { %v1101_v33 = vadd.f32 %v1100_v31, %v1099_v29  ;;  %v1302_v31 = vld [vmem:[%s3342_s28 + $0x20] sm:$0xff] }
 0x942   :  { %1325 = vmatpush.msra.mxu1 %v1302_v31 }
 0x943   :  { %v1102_v34 = vrot.slane %v1101_v33, 2 }
 0x945   :  { %v1103_v35 = vadd.f32 %v1102_v34, %v1101_v33  ;;  %v1225_v33 = vperm.slane %v1150_v30, 0  ;;  %v1301_v34 = vld [vmem:[%s3342_s28 + $0x18] sm:$0xff] }
 0x946   :  { %1326 = vmatpush.msra.mxu1 %v1301_v34  ;;  %v1546_v34 = vld [vmem:[%s3343_s8 + $0xa0] sm:$0xff] }
 0x947   :  { %v1104_v36 = vrot.slane %v1103_v35, 1 }
 0x949   :  { %v1105_v37 = vadd.f32 %v1104_v36, %v1103_v35 }
 0x94b   :  { %v1106_v39 = vadd.f32 1e-05, %v1105_v37  ;;  %v1227_v37 = vperm.slane %v1150_v30, 1  ;;  %v1550_v30 = vld [vmem:[%s3343_s8 + $0xc0] sm:$0xff] }
 0x94d   :  { %2156 = vrsqrt.f32 %v1106_v39  ;;  %vm1113_vm0 = vweird.f32 %v1106_v39 }
 0x953   :  { %v2157_v40 = vpop.eup %2156 }
 0x954   :  { %v1108_v41 = vmul.f32 %v2157_v40, %v1106_v39  ;;  %vm1114_vm15 = vweird.f32 %v2157_v40  ;;  %v1300_v39 = vld [vmem:[%s3342_s28 + $0x10] sm:$0xff] }
 0x955   :  { %vm1115_vm2 = vmor %vm1113_vm0, %vm1114_vm15  ;;  %1327 = vmatpush.msra.mxu1 %v1300_v39  ;;  %v1542_v39 = vld [vmem:[%s3343_s8 + $0x80] sm:$0xff] }
 0x956   :  { %v1109_v42 = vmul.f32 %v2157_v40, %v1108_v41  ;;  %v1299_v41 = vld [vmem:[%s3342_s28 + $0x8] sm:$0xff] }
 0x957   :  { %1328 = vmatpush.msra.mxu1 %v1299_v41 }
 0x958   :  { %v1110_v43 = vmul.f32 0.5, %v1109_v42 }
 0x95a   :  { %v1111_v44 = vsub.f32 1.5, %v1110_v43  ;;  %v1298_v43 = vld [vmem:[%s3342_s28] sm:$0xff] }
 0x95b   :  { %1329 = vmatpush.msra.mxu1 %v1298_v43 }
 0x95c   :  { %v1112_v46 = vmul.f32 %v2157_v40, %v1111_v44  ;;  %v1557_v44 = vld [vmem:[%s3343_s8 + $0xf8] sm:$0xff] }
 0x95e   :  { %v1116_v48 = vsel %vm1115_vm2, %v2157_v40, %v1112_v46  ;;  %v1555_v46 = vld [vmem:[%s3343_s8 + $0xe8] sm:$0xff] }
 0x95f   :  { %v1117_v50 = vmul.f32 %v1116_v48, %v1074_v23  ;;  %v1551_v48 = vld [vmem:[%s3343_s8 + $0xc8] sm:$0xff] }
 0x961   :  { %v1119_v18 = vmul.f32 %v1118_v47, %v1117_v50  ;;  %v1553_v47 = vld [vmem:[%s3343_s8 + $0xd8] sm:$0xff] }
 0x962   :  { %v1549_v50 = vld [vmem:[%s3343_s8 + $0xb8] sm:$0xff] }
 0x963   :  { %v1121_v52 = vadd.f32 %v1120_v51, %v1119_v18  ;;  %v1547_v51 = vld [vmem:[%s3343_s8 + $0xa8] sm:$0xff]  ;;  %v1545_v18 = vld [vmem:[%s3343_s8 + $0x98] sm:$0xff] }
 0x965   :  { %v1122_v49 = vmax.f32 %v1121_v52, 0.0  ;;  %v1543_v52 = vld [vmem:[%s3343_s8 + $0x88] sm:$0xff] }
 0x967   :  { %2065 = vmatmul.msk.f32.vlgmr.msrb.gmra.mxu0 %vm533_vm6, %v1122_v49  ;;  %v1297_v49 = vld [vmem:[#allocation24 + $0x38] sm:$0xff] }
 0x968   :  { %1346 = vmatpush.msrb.mxu2 %v1297_v49  ;;  %1379 = vmatpush.msra.mxu3 %v1297_v49 }
 0x9e4   :  { %v1147_v54 = vpop.f32.mrf.mxu0 }
 0x9e5   :  { %2066 = vmatmul.msk.f32.vlgmr.msrb.gmra.mxu1 %vm533_vm6, %v1147_v54 }
 0x9e6   :  { %1590 = vmatpush.msrb.mxu1 %v1557_v44 }
 0x9e8   :  { %1591 = vmatpush.msrb.mxu1 %v1555_v46 }
 0x9ea   :  { %1592 = vmatpush.msrb.mxu1 %v1553_v47 }
 0x9ec   :  { %1593 = vmatpush.msrb.mxu1 %v1551_v48 }
 0x9ee   :  { %1594 = vmatpush.msrb.mxu1 %v1549_v50 }
 0x9f0   :  { %1595 = vmatpush.msrb.mxu1 %v1547_v51 }
 0x9f2   :  { %1596 = vmatpush.msrb.mxu1 %v1545_v18 }
 0x9f4   :  { %1597 = vmatpush.msrb.mxu1 %v1543_v52 }
 0xa62   :  { %v1171_v55 = vpop.f32.mrf.mxu1 }
 0xa63   :  { %v1174_v56 = vsel %vm468_vm1, %v1171_v55, 0.0  ;;  %v1295_v55 = vld [vmem:[#allocation24 + $0x28] sm:$0xff] }
 0xa64   :  { %v1175_v57 = vrot.slane %v1174_v56, 4 }
 0xa66   :  { %v1176_v58 = vadd.f32 %v1175_v57, %v1174_v56  ;;  %v1294_v56 = vld [vmem:[#allocation24 + $0x20] sm:$0xff]  ;;  %v1293_v57 = vld [vmem:[#allocation24 + $0x18] sm:$0xff] }
 0xa68   :  { %v1177_v59 = vrot.slane %v1176_v58, 2 }
 0xa6a   :  { %v1178_v60 = vadd.f32 %v1177_v59, %v1176_v58  ;;  %v1292_v58 = vld [vmem:[#allocation24 + $0x10] sm:$0xff]  ;;  %v1291_v59 = vld [vmem:[#allocation24 + $0x8] sm:$0xff] }
 0xa6c   :  { %v1179_v61 = vrot.slane %v1178_v60, 1 }
 0xa6e   :  { %v1180_v62 = vadd.f32 %v1179_v61, %v1178_v60  ;;  %v2138_v60 = vld [vmem:[#allocation21] ss:$0 sm:$0xff]  ;;  %v1259_v61 = vpop.f32.mrf.mxu3 }
 0xa70   :  { %v1181_v63 = vsub.f32 %v1147_v54, %v1180_v62  ;;  %v1296_v54 = vld [vmem:[#allocation24 + $0x30] sm:$0xff] }
 0xa71   :  { %1347 = vmatpush.msrb.mxu2 %v1296_v54  ;;  %1380 = vmatpush.msra.mxu3 %v1296_v54 }
 0xa72   :  { %v1182_v0 = vmul.f32 %v1181_v63, %v1181_v63 }
 0xa73   :  { %1348 = vmatpush.msrb.mxu2 %v1295_v55  ;;  %1381 = vmatpush.msra.mxu3 %v1295_v55 }
 0xa74   :  { %2067 = vmatmul.msk.f32.vlgmr.msra.gmra.mxu2 %vm533_vm6, %v1182_v0 }
 0xa75   :  { %1349 = vmatpush.msrb.mxu2 %v1294_v56  ;;  %1382 = vmatpush.msra.mxu3 %v1294_v56 }
 0xa77   :  { %1350 = vmatpush.msrb.mxu2 %v1293_v57  ;;  %1383 = vmatpush.msra.mxu3 %v1293_v57 }
 0xa79   :  { %1351 = vmatpush.msrb.mxu2 %v1292_v58  ;;  %1384 = vmatpush.msra.mxu3 %v1292_v58 }
 0xa7b   :  { %1352 = vmatpush.msrb.mxu2 %v1291_v59  ;;  %1385 = vmatpush.msra.mxu3 %v1291_v59 }
 0xaf7   :  { %v1203_v1 = vpop.f32.mrf.mxu2 }
 0xaf8   :  { %v1206_v2 = vsel %vm468_vm1, %v1203_v1, 0.0  ;;  %v3199_v1 = vpop.permute.xlu0 %1558 }
 0xaf9   :  { %v1207_v3 = vrot.slane %v1206_v2, 4 }
 0xafb   :  { %v1208_v38 = vadd.f32 %v1207_v3, %v1206_v2  ;;  %v1290_v2 = vld [vmem:[#allocation24] sm:$0xff] }
 0xafc   :  { %1353 = vmatpush.msrb.mxu2 %v1290_v2  ;;  %1386 = vmatpush.msra.mxu3 %v1290_v2 }
 0xafd   :  { %v1209_v7 = vrot.slane %v1208_v38, 2 }
 0xafe   :  { %1458 = vmatpush.msra.mxu2 %v1297_v49  ;;  %1490 = vmatpush.msrb.mxu3 %v1297_v49 }
 0xaff   :  { %v1210_v9 = vadd.f32 %v1209_v7, %v1208_v38 }
 0xb00   :  { %1459 = vmatpush.msra.mxu2 %v1296_v54  ;;  %1491 = vmatpush.msrb.mxu3 %v1296_v54 }
 0xb01   :  { %v1211_v10 = vrot.slane %v1210_v9, 1 }
 0xb02   :  { %1460 = vmatpush.msra.mxu2 %v1295_v55  ;;  %1492 = vmatpush.msrb.mxu3 %v1295_v55 }
 0xb03   :  { %v1212_v13 = vadd.f32 %v1211_v10, %v1210_v9 }
 0xb04   :  { %1461 = vmatpush.msra.mxu2 %v1294_v56  ;;  %1493 = vmatpush.msrb.mxu3 %v1294_v56 }
 0xb05   :  { %v1213_v15 = vadd.f32 1e-05, %v1212_v13  ;;  %v1422_v13 = vld [vmem:[#allocation22 + $0x38] sm:$0xff] }
 0xb06   :  { %1462 = vmatpush.msra.mxu2 %v1293_v57  ;;  %1494 = vmatpush.msrb.mxu3 %v1293_v57 }
 0xb07   :  { %2158 = vrsqrt.f32 %v1213_v15  ;;  %vm1220_vm3 = vweird.f32 %v1213_v15  ;;  %1434 = vmatpush.msrb.mxu0 %v1422_v13  ;;  %v1530_v13 = vld [vmem:[%s3343_s8 + $0x20] sm:$0xff] }
 0xb08   :  { %1463 = vmatpush.msra.mxu2 %v1292_v58  ;;  %1495 = vmatpush.msrb.mxu3 %v1292_v58 }
 0xb09   :  { %1435 = vmatpush.msrb.mxu0 %v1421_v14  ;;  %v1531_v14 = vld [vmem:[%s3343_s8 + $0x28] sm:$0xff] }
 0xb0a   :  { %1464 = vmatpush.msra.mxu2 %v1291_v59  ;;  %1496 = vmatpush.msrb.mxu3 %v1291_v59 }
 0xb0c   :  { %1465 = vmatpush.msra.mxu2 %v1290_v2  ;;  %1497 = vmatpush.msrb.mxu3 %v1290_v2  ;;  %v1541_v2 = vld [vmem:[%s3343_s8 + $0x78] sm:$0xff] }
 0xb0d   :  { %v2159_v21 = vpop.eup %2158 }
 0xb0e   :  { %v1215_v23 = vmul.f32 %v2159_v21, %v1213_v15  ;;  %vm1221_vm1 = vweird.f32 %v2159_v21  ;;  %v1420_v15 = vld [vmem:[#allocation22 + $0x28] sm:$0xff] }
 0xb0f   :  { %vm1222_vm4 = vmor %vm1220_vm3, %vm1221_vm1  ;;  %1436 = vmatpush.msrb.mxu0 %v1420_v15 }
 0xb10   :  { %v1216_v25 = vmul.f32 %v2159_v21, %v1215_v23  ;;  %v1415_v23 = vld [vmem:[#allocation22] sm:$0xff] }
 0xb11   :  { %1437 = vmatpush.msrb.mxu0 %v1419_v16  ;;  %v1528_v16 = vld [vmem:[%s3343_s8 + $0x10] sm:$0xff] }
 0xb12   :  { %v1217_v27 = vmul.f32 0.5, %v1216_v25  ;;  %v1556_v25 = vld [vmem:[%s3343_s8 + $0xf0] sm:$0xff] }
 0xb13   :  { %1438 = vmatpush.msrb.mxu0 %v1418_v17  ;;  %v1529_v17 = vld [vmem:[%s3343_s8 + $0x18] sm:$0xff] }
 0xb14   :  { %v1218_v29 = vsub.f32 1.5, %v1217_v27 }
 0xb15   :  { %1439 = vmatpush.msrb.mxu0 %v1417_v19 }
 0xb16   :  { %v1219_v32 = vmul.f32 %v2159_v21, %v1218_v29 }
 0xb17   :  { %1440 = vmatpush.msrb.mxu0 %v1416_v20  ;;  %v1526_v20 = vld [vmem:[%s3343_s8] sm:$0xff] }
 0xb18   :  { %v1223_v35 = vsel %vm1222_vm4, %v2159_v21, %v1219_v32 }
 0xb19   :  { %v1224_v36 = vmul.f32 %v1223_v35, %v1181_v63  ;;  %1441 = vmatpush.msrb.mxu0 %v1415_v23 }
 0xb1b   :  { %v1226_v40 = vmul.f32 %v1225_v33, %v1224_v36  ;;  %v1548_v33 = vld [vmem:[%s3343_s8 + $0xb0] sm:$0xff] }
 0xb1c   :  { %v1544_v36 = vld [vmem:[%s3343_s8 + $0x90] sm:$0xff] }
 0xb1d   :  { %v1228_v42 = vadd.f32 %v1227_v37, %v1226_v40 }
 0xb1f   :  { %v1229_v45 = vmax.f32 %v1228_v42, 0.0 }
 0xb21   :  { %2069 = vmatmul.msk.f32.vlgmr.msra.gmra.mxu0 %vm533_vm6, %v1229_v45  ;;  %vm1358_vm6 = vcmask 519168   ;;  %v1334_v45 = vld [vmem:[#allocation25] sm:$0x3] }
 0xb22   :  { %1570 = vmatpush.msra.mxu0 %v1556_v25  ;;  %v1410_v47 = vperm.slane %v1334_v45, 0  ;;  %v1412_v51 = vperm.slane %v1334_v45, 1  ;;  %v1700_v25 = vld [vmem:[#allocation28 + $0xf8] sm:$0xff] }
 0xb23   :  { %v1676_v45 = vld [vmem:[#allocation28 + $0x38] sm:$0xff] }
 0xb24   :  { %1571 = vmatpush.msra.mxu0 %v1554_v26  ;;  %v1683_v26 = vld [vmem:[#allocation28 + $0x70] sm:$0xff] }
 0xb26   :  { %1572 = vmatpush.msra.mxu0 %v1552_v28 }
 0xb28   :  { %1573 = vmatpush.msra.mxu0 %v1550_v30  ;;  %v1698_v30 = vld [vmem:[#allocation28 + $0xe8] sm:$0xff] }
 0xb2a   :  { %1574 = vmatpush.msra.mxu0 %v1548_v33  ;;  %v1697_v33 = vld [vmem:[#allocation28 + $0xe0] sm:$0xff] }
 0xb2c   :  { %1575 = vmatpush.msra.mxu0 %v1546_v34  ;;  %v1680_v34 = vld [vmem:[#allocation28 + $0x58] sm:$0xff] }
 0xb2e   :  { %1576 = vmatpush.msra.mxu0 %v1544_v36  ;;  %v1679_v36 = vld [vmem:[#allocation28 + $0x50] sm:$0xff] }
 0xb30   :  { %1577 = vmatpush.msra.mxu0 %v1542_v39  ;;  %v1678_v39 = vld [vmem:[#allocation28 + $0x48] sm:$0xff] }
 0xb9e   :  { %v1282_v62 = vpop.f32.mrf.mxu0 }
 0xb9f   :  { %v1283_v63 = vadd.f32 %v1282_v62, %v1259_v61 }
 0xba1   :  { %v1289_v0 = vadd.f32 %v2138_v60, %v1283_v63 }
 0xba3   :  { %1330 = vmatmul.f32.vlgmr.msra.gmra.mxu1 %v1289_v0 }
 0xba4   :  { %1721 = vmatpush.msra.mxu1 %v1700_v25 }
 0xbab   :  { %2076 = vmatmul.msk.f32.vlgmr.msrb.gmra.mxu1 %vm1019_vm14, %v3199_v1 }
 0xc20   :  { %v1331_v3 = vpop.f32.mrf.mxu1 }
 0xc21   :  { %2070 = vmatmul.msk.f32.vlgmr.msrb.gmra.mxu2 %vm1019_vm14, %v1331_v3 }
 0xca4   :  { %v1355_v4 = vpop.f32.mrf.mxu2 }
 0xca5   :  { %v1359_v5 = vsel %vm1358_vm6, %v1355_v4, 0.0  ;;  %v1539_v4 = vld [vmem:[%s3343_s8 + $0x68] sm:$0xff] }
 0xca6   :  { %v1360_v38 = vrot.slane %v1359_v5, 4 }
 0xca8   :  { %v1361_v6 = vadd.f32 %v1360_v38, %v1359_v5  ;;  %v1536_v5 = vld [vmem:[%s3343_s8 + $0x50] sm:$0xff]  ;;  %v1537_v38 = vld [vmem:[%s3343_s8 + $0x58] sm:$0xff] }
 0xcaa   :  { %v1362_v7 = vrot.slane %v1361_v6, 2 }
 0xcac   :  { %v1363_v8 = vadd.f32 %v1362_v7, %v1361_v6  ;;  %v1534_v7 = vld [vmem:[%s3343_s8 + $0x40] sm:$0xff] }
 0xcae   :  { %v1364_v9 = vrot.slane %v1363_v8, 1 }
 0xcb0   :  { %v1365_v10 = vadd.f32 %v1364_v9, %v1363_v8  ;;  %v1535_v8 = vld [vmem:[%s3343_s8 + $0x48] sm:$0xff] }
 0xcb2   :  { %v1366_v11 = vsub.f32 %v1331_v3, %v1365_v10  ;;  %v1538_v3 = vld [vmem:[%s3343_s8 + $0x60] sm:$0xff] }
 0xcb4   :  { %v1367_v12 = vmul.f32 %v1366_v11, %v1366_v11 }
 0xcb6   :  { %2071 = vmatmul.msk.f32.vlgmr.msra.gmra.mxu3 %vm1019_vm14, %v1367_v12  ;;  %v1533_v12 = vld [vmem:[%s3343_s8 + $0x38] sm:$0xff] }
 0xcb7   :  { %1633 = vmatpush.msra.mxu3 %v1541_v2 }
 0xcb9   :  { %1634 = vmatpush.msra.mxu3 %v1539_v4  ;;  %v1671_v4 = vld [vmem:[#allocation28 + $0x10] sm:$0xff] }
 0xcbb   :  { %1635 = vmatpush.msra.mxu3 %v1537_v38  ;;  %v1670_v38 = vld [vmem:[#allocation28 + $0x8] sm:$0xff] }
 0xcbd   :  { %1636 = vmatpush.msra.mxu3 %v1535_v8  ;;  %v3245_v8 = vld [vmem:[#allocation31 + $0x78] sm:$0xff] }
 0xcbf   :  { %1637 = vmatpush.msra.mxu3 %v1533_v12  ;;  %v3261_v12 = vld [vmem:[#allocation31 + $0x58] sm:$0xff] }
 0xcc1   :  { %1638 = vmatpush.msra.mxu3 %v1531_v14  ;;  %v3271_v14 = vld [vmem:[#allocation31 + $0x48] sm:$0xff] }
 0xcc3   :  { %1639 = vmatpush.msra.mxu3 %v1529_v17  ;;  %v1659_v17 = vld [vmem:[#allocation31 + $0x30] sm:$0xff] }
 0xd39   :  { %v1388_v21 = vpop.f32.mrf.mxu3 }
 0xd3a   :  { %v1391_v22 = vsel %vm1358_vm6, %v1388_v21, 0.0  ;;  %v1527_v21 = vld [vmem:[%s3343_s8 + $0x8] sm:$0xff] }
 0xd3b   :  { %v1392_v24 = vrot.slane %v1391_v22, 4  ;;  %1640 = vmatpush.msra.mxu3 %v1527_v21  ;;  %v1656_v21 = vld [vmem:[#allocation31 + $0x18] sm:$0xff] }
 0xd3d   :  { %v1393_v27 = vadd.f32 %v1392_v24, %v1391_v22  ;;  %v1684_v24 = vld [vmem:[#allocation28 + $0x78] sm:$0xff] }
 0xd3f   :  { %v1394_v29 = vrot.slane %v1393_v27, 2 }
 0xd41   :  { %v1395_v31 = vadd.f32 %v1394_v29, %v1393_v27  ;;  %v1699_v27 = vld [vmem:[#allocation28 + $0xf0] sm:$0xff]  ;;  %v1682_v29 = vld [vmem:[#allocation28 + $0x68] sm:$0xff] }
 0xd42   :  { %1722 = vmatpush.msra.mxu1 %v1699_v27 }
 0xd43   :  { %v1396_v32 = vrot.slane %v1395_v31, 1 }
 0xd44   :  { %1723 = vmatpush.msra.mxu1 %v1698_v30 }
 0xd45   :  { %v1397_v35 = vadd.f32 %v1396_v32, %v1395_v31  ;;  %v1681_v32 = vld [vmem:[#allocation28 + $0x60] sm:$0xff] }
 0xd46   :  { %1724 = vmatpush.msra.mxu1 %v1697_v33 }
 0xd47   :  { %v1398_v37 = vadd.f32 1e-05, %v1397_v35  ;;  %v1696_v35 = vld [vmem:[#allocation28 + $0xd8] sm:$0xff] }
 0xd48   :  { %1725 = vmatpush.msra.mxu1 %v1696_v35  ;;  %v1653_v35 = vld [vmem:[#allocation31] sm:$0xff] }
 0xd49   :  { %2160 = vrsqrt.f32 %v1398_v37  ;;  %vm1405_vm7 = vweird.f32 %v1398_v37 }
 0xd4f   :  { %v2161_v40 = vpop.eup %2160 }
 0xd50   :  { %v1400_v41 = vmul.f32 %v2161_v40, %v1398_v37  ;;  %vm1406_vm5 = vweird.f32 %v2161_v40  ;;  %v1695_v37 = vld [vmem:[#allocation28 + $0xd0] sm:$0xff] }
 0xd51   :  { %vm1407_vm8 = vmor %vm1405_vm7, %vm1406_vm5  ;;  %1726 = vmatpush.msra.mxu1 %v1695_v37  ;;  %v1955_v37 = vld [vmem:[#allocation33 + $0xf0] sm:$0xff] }
 0xd52   :  { %v1401_v42 = vmul.f32 %v2161_v40, %v1400_v41 }
 0xd54   :  { %v1402_v43 = vmul.f32 0.5, %v1401_v42  ;;  %v1677_v42 = vld [vmem:[#allocation28 + $0x40] sm:$0xff] }
 0xd56   :  { %v1403_v44 = vsub.f32 1.5, %v1402_v43  ;;  %v1693_v43 = vld [vmem:[#allocation28 + $0xc0] sm:$0xff] }
 0xd58   :  { %v1404_v46 = vmul.f32 %v2161_v40, %v1403_v44 }
 0xd5a   :  { %v1408_v48 = vsel %vm1407_vm8, %v2161_v40, %v1404_v46  ;;  %v1694_v40 = vld [vmem:[#allocation28 + $0xc8] sm:$0xff]  ;;  %v1692_v46 = vld [vmem:[#allocation28 + $0xb8] sm:$0xff] }
 0xd5b   :  { %v1409_v50 = vmul.f32 %v1408_v48, %v1366_v11  ;;  %v1532_v11 = vld [vmem:[%s3343_s8 + $0x30] sm:$0xff]  ;;  %1727 = vmatpush.msra.mxu1 %v1694_v40 }
 0xd5c   :  { %v1675_v48 = vld [vmem:[#allocation28 + $0x30] sm:$0xff] }
 0xd5d   :  { %v1411_v18 = vmul.f32 %v1410_v47, %v1409_v50  ;;  %1728 = vmatpush.msra.mxu1 %v1693_v43  ;;  %v1691_v50 = vld [vmem:[#allocation28 + $0xb0] sm:$0xff]  ;;  %v1953_v43 = vld [vmem:[#allocation33 + $0xe0] sm:$0xff] }
 0xd5f   :  { %v1413_v52 = vadd.f32 %v1412_v51, %v1411_v18  ;;  %1729 = vmatpush.msra.mxu1 %v1692_v46  ;;  %v1674_v18 = vld [vmem:[#allocation28 + $0x28] sm:$0xff] }
 0xd60   :  { %v1950_v46 = vld [vmem:[#allocation33 + $0xc8] sm:$0xff] }
 0xd61   :  { %v1414_v49 = vmax.f32 %v1413_v52, 0.0  ;;  %v1690_v52 = vld [vmem:[#allocation28 + $0xa8] sm:$0xff]  ;;  %1730 = vmatpush.msra.mxu1 %v1691_v50  ;;  %v1947_v50 = vld [vmem:[#allocation33 + $0xb0] sm:$0xff] }
 0xd63   :  { %2072 = vmatmul.msk.f32.vlgmr.msrb.gmra.mxu0 %vm1019_vm14, %v1414_v49  ;;  %1731 = vmatpush.msra.mxu1 %v1690_v52  ;;  %v1944_v52 = vld [vmem:[#allocation33 + $0x98] sm:$0xff] }
 0xd64   :  { %1701 = vmatpush.msrb.mxu0 %v1684_v24  ;;  %v1599_v24 = vpop.f32.mrf.mxu1 }
 0xd66   :  { %1702 = vmatpush.msrb.mxu0 %v1683_v26 }
 0xd68   :  { %1703 = vmatpush.msrb.mxu0 %v1682_v29 }
 0xd6a   :  { %1704 = vmatpush.msrb.mxu0 %v1681_v32 }
 0xd6b   :  { %2075 = vmatmul.msk.f32.vlgmr.msra.gmra.mxu0 %vm1019_vm14, %v3199_v1  ;;  %v1540_v1 = vld [vmem:[%s3343_s8 + $0x70] sm:$0xff] }
 0xd6c   :  { %1613 = vmatpush.msrb.mxu2 %v1540_v1  ;;  %1705 = vmatpush.msrb.mxu0 %v1680_v34  ;;  %v1654_v34 = vld [vmem:[#allocation31 + $0x8] sm:$0xff] }
 0xd6e   :  { %1614 = vmatpush.msrb.mxu2 %v1538_v3  ;;  %1706 = vmatpush.msrb.mxu0 %v1679_v36  ;;  %v1956_v36 = vld [vmem:[#allocation33 + $0xf8] sm:$0xff] }
 0xd70   :  { %1615 = vmatpush.msrb.mxu2 %v1536_v5  ;;  %1707 = vmatpush.msrb.mxu0 %v1678_v39  ;;  %v1687_v5 = vld [vmem:[#allocation28 + $0x90] sm:$0xff]  ;;  %v1954_v39 = vld [vmem:[#allocation33 + $0xe8] sm:$0xff] }
 0xd72   :  { %1616 = vmatpush.msrb.mxu2 %v1534_v7  ;;  %1708 = vmatpush.msrb.mxu0 %v1677_v42  ;;  %v1669_v7 = vld [vmem:[#allocation28] sm:$0xff] }
 0xd74   :  { %1617 = vmatpush.msrb.mxu2 %v1532_v11  ;;  %1709 = vmatpush.msrb.mxu0 %v1676_v45  ;;  %v3256_v11 = vld [vmem:[#allocation31 + $0x60] sm:$0xff]  ;;  %v1951_v45 = vld [vmem:[#allocation33 + $0xd0] sm:$0xff] }
 0xd76   :  { %1618 = vmatpush.msrb.mxu2 %v1530_v13  ;;  %1710 = vmatpush.msrb.mxu0 %v1675_v48  ;;  %v3266_v13 = vld [vmem:[#allocation31 + $0x50] sm:$0xff]  ;;  %v1948_v48 = vld [vmem:[#allocation33 + $0xb8] sm:$0xff] }
 0xd78   :  { %1619 = vmatpush.msrb.mxu2 %v1528_v16  ;;  %1711 = vmatpush.msrb.mxu0 %v1674_v18  ;;  %v1660_v16 = vld [vmem:[#allocation31 + $0x38] sm:$0xff]  ;;  %v1945_v18 = vld [vmem:[#allocation33 + $0xa0] sm:$0xff] }
 0xd7a   :  { %1620 = vmatpush.msrb.mxu2 %v1526_v20  ;;  %v1657_v20 = vld [vmem:[#allocation31 + $0x20] sm:$0xff] }
 0xde0   :  { %v1443_v54 = vpop.f32.mrf.mxu0 }
 0xde1   :  { %2073 = vmatmul.msk.f32.vlgmr.msra.gmra.mxu2 %vm1019_vm14, %v1443_v54 }
 0xde2   :  { %1742 = vmatpush.msra.mxu2 %v3245_v8 }
 0xde8   :  { %v1579_v25 = vpop.f32.mrf.mxu0 }
 0xe64   :  { %v1467_v55 = vpop.f32.mrf.mxu2 }
 0xe65   :  { %v1470_v56 = vsel %vm1358_vm6, %v1467_v55, 0.0  ;;  %v1673_v55 = vld [vmem:[#allocation28 + $0x20] sm:$0xff] }
 0xe66   :  { %v1471_v57 = vrot.slane %v1470_v56, 4  ;;  %1712 = vmatpush.msrb.mxu0 %v1673_v55  ;;  %v1941_v55 = vld [vmem:[#allocation33 + $0x80] sm:$0xff] }
 0xe68   :  { %v1472_v58 = vadd.f32 %v1471_v57, %v1470_v56  ;;  %v1689_v56 = vld [vmem:[#allocation28 + $0xa0] sm:$0xff] }
 0xe69   :  { %1732 = vmatpush.msra.mxu1 %v1689_v56 }
 0xe6a   :  { %v1473_v59 = vrot.slane %v1472_v58, 2 }
 0xe6c   :  { %v1474_v60 = vadd.f32 %v1473_v59, %v1472_v58  ;;  %v1672_v59 = vld [vmem:[#allocation28 + $0x18] sm:$0xff] }
 0xe6d   :  { %1713 = vmatpush.msrb.mxu0 %v1672_v59 }
 0xe6e   :  { %v1475_v61 = vrot.slane %v1474_v60, 1 }
 0xe6f   :  { %1714 = vmatpush.msrb.mxu0 %v1671_v4 }
 0xe70   :  { %v1476_v62 = vadd.f32 %v1475_v61, %v1474_v60  ;;  %v1688_v60 = vld [vmem:[#allocation28 + $0x98] sm:$0xff] }
 0xe71   :  { %1733 = vmatpush.msra.mxu1 %v1688_v60  ;;  %1715 = vmatpush.msrb.mxu0 %v1670_v38  ;;  %v1830_v38 = vld [vmem:[#allocation30 + $0x78] sm:$0xff] }
 0xe72   :  { %v3220_v63 = vsub.f32 %v1443_v54, %v1476_v62  ;;  %v1446_v54 = vld [vmem:[#allocation27] sm:$0x3] }
 0xe73   :  { %v1521_v58 = vperm.slane %v1446_v54, 0  ;;  %1734 = vmatpush.msra.mxu1 %v1687_v5  ;;  %1716 = vmatpush.msrb.mxu0 %v1669_v7  ;;  %v1828_v7 = vld [vmem:[#allocation30 + $0x68] sm:$0xff] }
 0xe74   :  { %v1478_v0 = vmul.f32 %v3220_v63, %v3220_v63 }
 0xe75   :  { %1831 = vmatpush.msra.mxu0 %v1830_v38 }
 0xe76   :  { %2074 = vmatmul.msk.f32.vlgmr.msrb.gmra.mxu3 %vm1019_vm14, %v1478_v0  ;;  %v1523_v0 = vperm.slane %v1446_v54, 1  ;;  %v1942_v54 = vld [vmem:[#allocation33 + $0x88] sm:$0xff] }
 0xe77   :  { %1771 = vmatpush.msrb.mxu3 %v3245_v8 }
 0xef9   :  { %v1499_v6 = vpop.f32.mrf.mxu3 }
 0xefa   :  { %v1502_v9 = vsel %vm1358_vm6, %v1499_v6, 0.0  ;;  %v1686_v6 = vld [vmem:[#allocation28 + $0x88] sm:$0xff] }
 0xefb   :  { %v1503_v10 = vrot.slane %v1502_v9, 4  ;;  %1735 = vmatpush.msra.mxu1 %v1686_v6  ;;  %v1829_v6 = vld [vmem:[#allocation30 + $0x70] sm:$0xff] }
 0xefc   :  { %1832 = vmatpush.msra.mxu0 %v1829_v6 }
 0xefd   :  { %v1504_v15 = vadd.f32 %v1503_v10, %v1502_v9  ;;  %v3247_v9 = vld [vmem:[#allocation31 + $0x70] sm:$0xff]  ;;  %v3251_v10 = vld [vmem:[#allocation31 + $0x68] sm:$0xff] }
 0xefe   :  { %1743 = vmatpush.msra.mxu2 %v3247_v9  ;;  %1772 = vmatpush.msrb.mxu3 %v3247_v9 }
 0xeff   :  { %v1505_v19 = vrot.slane %v1504_v15, 2  ;;  %1833 = vmatpush.msra.mxu0 %v1828_v7  ;;  %v1927_v7 = vld [vmem:[#allocation33 + $0x10] sm:$0xff] }
 0xf00   :  { %1744 = vmatpush.msra.mxu2 %v3251_v10  ;;  %1773 = vmatpush.msrb.mxu3 %v3251_v10 }
 0xf01   :  { %v1506_v22 = vadd.f32 %v1505_v19, %v1504_v15  ;;  %v3276_v15 = vld [vmem:[#allocation31 + $0x40] sm:$0xff]  ;;  %v1658_v19 = vld [vmem:[#allocation31 + $0x28] sm:$0xff] }
 0xf02   :  { %1745 = vmatpush.msra.mxu2 %v3256_v11  ;;  %1774 = vmatpush.msrb.mxu3 %v3256_v11 }
 0xf03   :  { %v1507_v23 = vrot.slane %v1506_v22, 1 }
 0xf04   :  { %1746 = vmatpush.msra.mxu2 %v3261_v12  ;;  %1775 = vmatpush.msrb.mxu3 %v3261_v12 }
 0xf05   :  { %v1508_v28 = vadd.f32 %v1507_v23, %v1506_v22  ;;  %v1645_v22 = vld [vmem:[%s3344_s1] sm:$0x3]  ;;  %v1655_v23 = vld [vmem:[#allocation31 + $0x10] sm:$0xff] }
 0xf06   :  { %1747 = vmatpush.msra.mxu2 %v3266_v13  ;;  %1776 = vmatpush.msrb.mxu3 %v3266_v13  ;;  %v1647_v26 = vperm.slane %v1645_v22, 0  ;;  %v1648_v27 = vperm.slane %v1645_v22, 1  ;;  %v1816_v22 = vld [vmem:[#allocation30 + $0x8] sm:$0xff] }
 0xf07   :  { %v1509_v31 = vadd.f32 1e-05, %v1508_v28 }
 0xf08   :  { %1748 = vmatpush.msra.mxu2 %v3271_v14  ;;  %1777 = vmatpush.msrb.mxu3 %v3271_v14 }
 0xf09   :  { %2162 = vrsqrt.f32 %v1509_v31  ;;  %vm1516_vm11 = vweird.f32 %v1509_v31 }
 0xf0a   :  { %1749 = vmatpush.msra.mxu2 %v3276_v15  ;;  %1778 = vmatpush.msrb.mxu3 %v3276_v15 }
 0xf0c   :  { %1750 = vmatpush.msra.mxu2 %v1660_v16  ;;  %1779 = vmatpush.msrb.mxu3 %v1660_v16 }
 0xf0e   :  { %1751 = vmatpush.msra.mxu2 %v1659_v17  ;;  %1780 = vmatpush.msrb.mxu3 %v1659_v17 }
 0xf0f   :  { %v2163_v41 = vpop.eup %2162 }
 0xf10   :  { %v1511_v44 = vmul.f32 %v2163_v41, %v1509_v31  ;;  %vm1517_vm10 = vweird.f32 %v2163_v41  ;;  %1752 = vmatpush.msra.mxu2 %v1658_v19  ;;  %1781 = vmatpush.msrb.mxu3 %v1658_v19 }
 0xf11   :  { %vm1518_vm12 = vmor %vm1516_vm11, %vm1517_vm10 }
 0xf12   :  { %v1512_v47 = vmul.f32 %v2163_v41, %v1511_v44  ;;  %1753 = vmatpush.msra.mxu2 %v1657_v20  ;;  %1782 = vmatpush.msrb.mxu3 %v1657_v20  ;;  %v1952_v44 = vld [vmem:[#allocation33 + $0xd8] sm:$0xff] }
 0xf14   :  { %v1513_v51 = vmul.f32 0.5, %v1512_v47  ;;  %1754 = vmatpush.msra.mxu2 %v1656_v21  ;;  %1783 = vmatpush.msrb.mxu3 %v1656_v21  ;;  %v1949_v47 = vld [vmem:[#allocation33 + $0xc0] sm:$0xff] }
 0xf16   :  { %v1514_v49 = vsub.f32 1.5, %v1513_v51  ;;  %1755 = vmatpush.msra.mxu2 %v1655_v23  ;;  %1784 = vmatpush.msrb.mxu3 %v1655_v23  ;;  %v1946_v51 = vld [vmem:[#allocation33 + $0xa8] sm:$0xff] }
 0xf18   :  { %v1515_v57 = vmul.f32 %v2163_v41, %v1514_v49  ;;  %1756 = vmatpush.msra.mxu2 %v1654_v34  ;;  %1785 = vmatpush.msrb.mxu3 %v1654_v34  ;;  %v1943_v49 = vld [vmem:[#allocation33 + $0x90] sm:$0xff] }
 0xf1a   :  { %v1519_v61 = vsel %vm1518_vm12, %v2163_v41, %v1515_v57  ;;  %1757 = vmatpush.msra.mxu2 %v1653_v35  ;;  %1786 = vmatpush.msrb.mxu3 %v1653_v35 }
 0xf1b   :  { %v1520_v62 = vmul.f32 %v1519_v61, %v3220_v63  ;;  %v1685_v63 = vld [vmem:[#allocation28 + $0x80] sm:$0xff] }
 0xf1c   :  { %1736 = vmatpush.msra.mxu1 %v1685_v63  ;;  %v1827_v63 = vld [vmem:[#allocation30 + $0x60] sm:$0xff] }
 0xf1d   :  { %v1522_v1 = vmul.f32 %v1521_v58, %v1520_v62  ;;  %1834 = vmatpush.msra.mxu0 %v1827_v63 }
 0xf1e   :  { %1852 = vmatpush.msrb.mxu1 %v3245_v8 }
 0xf1f   :  { %v1524_v2 = vadd.f32 %v1523_v0, %v1522_v1 }
 0xf20   :  { %1853 = vmatpush.msrb.mxu1 %v3247_v9 }
 0xf21   :  { %v1525_v3 = vmax.f32 %v1524_v2, 0.0 }
 0xf22   :  { %1854 = vmatpush.msrb.mxu1 %v3251_v10 }
 0xf23   :  { %2077 = vmatmul.msk.f32.vlgmr.msrb.gmra.mxu2 %vm1019_vm14, %v1525_v3  ;;  %2078 = vmatmul.msk.f32.vlgmr.msra.gmra.mxu3 %vm1019_vm14, %v1525_v3  ;;  %v2168_v3 = vld [vmem:[#allocation10] sm:$0x3] }
 0xf24   :  { %1855 = vmatpush.msrb.mxu1 %v3256_v11  ;;  %1881 = vmatpush.msrb.mxu2 %v3245_v8  ;;  %v922_v4 = vperm.slane %v2168_v3, 1  ;;  %v1826_v8 = vld [vmem:[#allocation30 + $0x58] sm:$0xff]  ;;  %v1929_v3 = vld [vmem:[#allocation33 + $0x20] sm:$0xff] }
 0xf25   :  { %1957 = vmatpush.msra.mxu3 %v1956_v36  ;;  %1835 = vmatpush.msra.mxu0 %v1826_v8  ;;  %v1926_v8 = vld [vmem:[#allocation33 + $0x8] sm:$0xff] }
 0xf26   :  { %1856 = vmatpush.msrb.mxu1 %v3261_v12  ;;  %1882 = vmatpush.msrb.mxu2 %v3247_v9  ;;  %v974_v5 = vadd.f32 %v3168_v53, %v922_v4  ;;  %v1825_v9 = vld [vmem:[#allocation30 + $0x50] sm:$0xff] }
 0xf27   :  { %1958 = vmatpush.msra.mxu3 %v1955_v37  ;;  %1836 = vmatpush.msra.mxu0 %v1825_v9  ;;  %v1821_v53 = vld [vmem:[#allocation30 + $0x30] sm:$0xff] }
 0xf28   :  { %1857 = vmatpush.msrb.mxu1 %v3266_v13  ;;  %1883 = vmatpush.msrb.mxu2 %v3251_v10  ;;  %v1824_v10 = vld [vmem:[#allocation30 + $0x48] sm:$0xff] }
 0xf29   :  { %1959 = vmatpush.msra.mxu3 %v1954_v39  ;;  %1837 = vmatpush.msra.mxu0 %v1824_v10  ;;  %v1925_v10 = vld [vmem:[#allocation33] sm:$0xff] }
 0xf2a   :  { %1858 = vmatpush.msrb.mxu1 %v3271_v14  ;;  %1884 = vmatpush.msrb.mxu2 %v3256_v11  ;;  %v1823_v11 = vld [vmem:[#allocation30 + $0x40] sm:$0xff] }
 0xf2b   :  { %1960 = vmatpush.msra.mxu3 %v1953_v43  ;;  %1838 = vmatpush.msra.mxu0 %v1823_v11 }
 0xf2c   :  { %1859 = vmatpush.msrb.mxu1 %v3276_v15  ;;  %1885 = vmatpush.msrb.mxu2 %v3261_v12  ;;  %v1822_v12 = vld [vmem:[#allocation30 + $0x38] sm:$0xff] }
 0xf2d   :  { %1961 = vmatpush.msra.mxu3 %v1952_v44  ;;  %1839 = vmatpush.msra.mxu0 %v1822_v12 }
 0xf2e   :  { %1860 = vmatpush.msrb.mxu1 %v1660_v16  ;;  %1886 = vmatpush.msrb.mxu2 %v3266_v13  ;;  %v1820_v13 = vld [vmem:[#allocation30 + $0x28] sm:$0xff] }
 0xf2f   :  { %1962 = vmatpush.msra.mxu3 %v1951_v45  ;;  %1840 = vmatpush.msra.mxu0 %v1821_v53 }
 0xf30   :  { %1861 = vmatpush.msrb.mxu1 %v1659_v17  ;;  %1887 = vmatpush.msrb.mxu2 %v3271_v14  ;;  %v1819_v14 = vld [vmem:[#allocation30 + $0x20] sm:$0xff] }
 0xf31   :  { %1963 = vmatpush.msra.mxu3 %v1950_v46  ;;  %1841 = vmatpush.msra.mxu0 %v1820_v13 }
 0xf32   :  { %1862 = vmatpush.msrb.mxu1 %v1658_v19  ;;  %1888 = vmatpush.msrb.mxu2 %v3276_v15 }
 0xf33   :  { %1964 = vmatpush.msra.mxu3 %v1949_v47  ;;  %1842 = vmatpush.msra.mxu0 %v1819_v14 }
 0xf34   :  { %1863 = vmatpush.msrb.mxu1 %v1657_v20  ;;  %1889 = vmatpush.msrb.mxu2 %v1660_v16  ;;  %v1818_v16 = vld [vmem:[#allocation30 + $0x18] sm:$0xff] }
 0xf35   :  { %1965 = vmatpush.msra.mxu3 %v1948_v48  ;;  %1843 = vmatpush.msra.mxu0 %v1818_v16 }
 0xf36   :  { %1864 = vmatpush.msrb.mxu1 %v1656_v21  ;;  %1890 = vmatpush.msrb.mxu2 %v1659_v17 }
 0xf37   :  { %1966 = vmatpush.msra.mxu3 %v1947_v50 }
 0xf38   :  { %1865 = vmatpush.msrb.mxu1 %v1655_v23  ;;  %1891 = vmatpush.msrb.mxu2 %v1658_v19 }
 0xf39   :  { %1967 = vmatpush.msra.mxu3 %v1946_v51 }
 0xf3a   :  { %1866 = vmatpush.msrb.mxu1 %v1654_v34  ;;  %1892 = vmatpush.msrb.mxu2 %v1657_v20  ;;  %v1817_v20 = vld [vmem:[#allocation30 + $0x10] sm:$0xff] }
 0xf3b   :  { %1968 = vmatpush.msra.mxu3 %v1945_v18  ;;  %1844 = vmatpush.msra.mxu0 %v1817_v20  ;;  %v1851_v20 = vld [vmem:[%s2906_s20] sm:$0x3] }
 0xf3c   :  { %1867 = vmatpush.msrb.mxu1 %v1653_v35  ;;  %1893 = vmatpush.msrb.mxu2 %v1656_v21 }
 0xf3d   :  { %1969 = vmatpush.msra.mxu3 %v1944_v52  ;;  %1845 = vmatpush.msra.mxu0 %v1816_v22  ;;  %v1920_v22 = vperm.slane %v1851_v20, 0 }
 0xf3e   :  { %1894 = vmatpush.msrb.mxu2 %v1655_v23 }
 0xf3f   :  { %1970 = vmatpush.msra.mxu3 %v1943_v49 }
 0xf40   :  { %1895 = vmatpush.msrb.mxu2 %v1654_v34  ;;  %v1741_v34 = vld [vmem:[%s3345_s17] sm:$0x3] }
 0xf41   :  { %1971 = vmatpush.msra.mxu3 %v1942_v54  ;;  %v1810_v36 = vperm.slane %v1741_v34, 0 }
 0xf42   :  { %1896 = vmatpush.msrb.mxu2 %v1653_v35 }
 0xf43   :  { %1972 = vmatpush.msra.mxu3 %v1941_v55  ;;  %v1940_v55 = vld [vmem:[#allocation33 + $0x78] sm:$0xff] }
 0xfa6   :  { %v1622_v28 = vpop.f32.mrf.mxu2  ;;  %v1642_v29 = vpop.f32.mrf.mxu3 }
 0xfa7   :  { %v1623_v30 = vadd.f32 %v1622_v28, %v1579_v25  ;;  %v1643_v31 = vadd.f32 %v1642_v29, %v1599_v24  ;;  %v1815_v24 = vld [vmem:[#allocation30] sm:$0xff] }
 0xfa8   :  { %1846 = vmatpush.msra.mxu0 %v1815_v24 }
 0xfa9   :  { %v1651_v32 = vadd.f32 %v1647_v26, %v1623_v30  ;;  %v1652_v33 = vadd.f32 %v1648_v27, %v1643_v31 }
 0xfab   :  { %1717 = vmatmul.f32.vlgmr.msrb.gmra.mxu0 %v1651_v32  ;;  %1737 = vmatmul.f32.vlgmr.msra.gmra.mxu1 %v1652_v33 }
 0xfac   :  { %1977 = vmatpush.msrb.mxu0 %v1940_v55 }
0x1028   :  { %v1718_v40 = vpop.f32.mrf.mxu0  ;;  %v1738_v41 = vpop.f32.mrf.mxu1 }
0x1029   :  { %v1739_v42 = vadd.f32 %v1738_v41, %v1718_v40  ;;  %v1812_v40 = vperm.slane %v1741_v34, 1 }
0x102b   :  { %1758 = vmatmul.f32.vlgmr.msra.gmra.mxu2 %v1739_v42 }
0x10ae   :  { %v1759_v56 = vpop.f32.mrf.mxu2 }
0x10af   :  { %v1762_v57 = vsel %vm929_vm9, %v1759_v56, 0.0  ;;  %v1939_v56 = vld [vmem:[#allocation33 + $0x70] sm:$0xff] }
0x10b0   :  { %v1763_v58 = vrot.slane %v1762_v57, 4  ;;  %1978 = vmatpush.msrb.mxu0 %v1939_v56 }
0x10b2   :  { %v1764_v59 = vadd.f32 %v1763_v58, %v1762_v57  ;;  %v1938_v57 = vld [vmem:[#allocation33 + $0x68] sm:$0xff]  ;;  %v1937_v58 = vld [vmem:[#allocation33 + $0x60] sm:$0xff] }
0x10b3   :  { %1979 = vmatpush.msrb.mxu0 %v1938_v57 }
0x10b4   :  { %v1765_v60 = vrot.slane %v1764_v59, 2 }
0x10b5   :  { %1980 = vmatpush.msrb.mxu0 %v1937_v58 }
0x10b6   :  { %v1766_v61 = vadd.f32 %v1765_v60, %v1764_v59  ;;  %v1936_v59 = vld [vmem:[#allocation33 + $0x58] sm:$0xff]  ;;  %v1935_v60 = vld [vmem:[#allocation33 + $0x50] sm:$0xff] }
0x10b7   :  { %1981 = vmatpush.msrb.mxu0 %v1936_v59 }
0x10b8   :  { %v1767_v62 = vrot.slane %v1766_v61, 1 }
0x10b9   :  { %1982 = vmatpush.msrb.mxu0 %v1935_v60 }
0x10ba   :  { %v1768_v0 = vadd.f32 %v1767_v62, %v1766_v61  ;;  %v1934_v61 = vld [vmem:[#allocation33 + $0x48] sm:$0xff]  ;;  %v1933_v62 = vld [vmem:[#allocation33 + $0x40] sm:$0xff] }
0x10bb   :  { %1983 = vmatpush.msrb.mxu0 %v1934_v61 }
0x10bc   :  { %v1769_v1 = vsub.f32 %v1739_v42, %v1768_v0  ;;  %v1932_v0 = vld [vmem:[#allocation33 + $0x38] sm:$0xff] }
0x10bd   :  { %1984 = vmatpush.msrb.mxu0 %v1933_v62 }
0x10be   :  { %v1770_v2 = vmul.f32 %v1769_v1, %v1769_v1 }
0x10bf   :  { %1985 = vmatpush.msrb.mxu0 %v1932_v0 }
0x10c0   :  { %1787 = vmatmul.f32.vlgmr.msrb.gmra.mxu3 %v1770_v2  ;;  %v1930_v2 = vld [vmem:[#allocation33 + $0x28] sm:$0xff] }
0x10c8   :  { %1973 = vmatmul.f32.vlgmr.msra.gmra.mxu3 %v974_v5  ;;  %v1928_v5 = vld [vmem:[#allocation33 + $0x18] sm:$0xff] }
0x1143   :  { %v1788_v15 = vpop.f32.mrf.mxu3 }
0x1144   :  { %v1791_v17 = vsel %vm929_vm9, %v1788_v15, 0.0 }
0x1145   :  { %v1792_v19 = vrot.slane %v1791_v17, 4 }
0x1147   :  { %v1793_v21 = vadd.f32 %v1792_v19, %v1791_v17 }
0x1149   :  { %v1794_v23 = vrot.slane %v1793_v21, 2 }
0x114b   :  { %v1795_v25 = vadd.f32 %v1794_v23, %v1793_v21 }
0x114d   :  { %v1796_v26 = vrot.slane %v1795_v25, 1 }
0x114f   :  { %v1797_v27 = vadd.f32 %v1796_v26, %v1795_v25  ;;  %v1922_v25 = vperm.slane %v1851_v20, 1 }
0x1151   :  { %v1798_v28 = vadd.f32 1e-05, %v1797_v27 }
0x1153   :  { %2164 = vrsqrt.f32 %v1798_v28  ;;  %vm1805_vm14 = vweird.f32 %v1798_v28 }
0x1159   :  { %v2165_v29 = vpop.eup %2164 }
0x115a   :  { %v1800_v30 = vmul.f32 %v2165_v29, %v1798_v28  ;;  %vm1806_vm13 = vweird.f32 %v2165_v29 }
0x115b   :  { %vm1807_vm15 = vmor %vm1805_vm14, %vm1806_vm13 }
0x115c   :  { %v1801_v31 = vmul.f32 %v2165_v29, %v1800_v30  ;;  %v1974_v30 = vpop.f32.mrf.mxu3 }
0x115e   :  { %v1802_v32 = vmul.f32 0.5, %v1801_v31 }
0x1160   :  { %v1803_v33 = vsub.f32 1.5, %v1802_v32 }
0x1162   :  { %v1804_v35 = vmul.f32 %v2165_v29, %v1803_v33 }
0x1164   :  { %v1808_v37 = vsel %vm1807_vm15, %v2165_v29, %v1804_v35  ;;  %v2139_v29 = vld [vmem:[%s2916_s6] ss:$0 sm:$0xff] }
0x1165   :  { %v1809_v39 = vmul.f32 %v1808_v37, %v1769_v1  ;;  %v1931_v1 = vld [vmem:[#allocation33 + $0x30] sm:$0xff] }
0x1166   :  { %1986 = vmatpush.msrb.mxu0 %v1931_v1 }
0x1167   :  { %v1811_v41 = vmul.f32 %v1810_v36, %v1809_v39 }
0x1168   :  { %1987 = vmatpush.msrb.mxu0 %v1930_v2 }
0x1169   :  { %v1813_v42 = vadd.f32 %v1812_v40, %v1811_v41 }
0x116a   :  { %1988 = vmatpush.msrb.mxu0 %v1929_v3 }
0x116b   :  { %v1814_v43 = vmax.f32 %v1813_v42, 0.0 }
0x116c   :  { %1989 = vmatpush.msrb.mxu0 %v1928_v5 }
0x116d   :  { %1847 = vmatmul.f32.vlgmr.msra.gmra.mxu0 %v1814_v43 }
0x116e   :  { %1990 = vmatpush.msrb.mxu0 %v1927_v7 }
0x1170   :  { %1991 = vmatpush.msrb.mxu0 %v1926_v8 }
0x1172   :  { %1992 = vmatpush.msrb.mxu0 %v1925_v10 }
0x11ea   :  { %v1848_v44 = vpop.f32.mrf.mxu0 }
0x11eb   :  { %1868 = vmatmul.f32.vlgmr.msrb.gmra.mxu1 %v1848_v44 }
0x1268   :  { %v1869_v45 = vpop.f32.mrf.mxu1 }
0x1269   :  { %v1872_v46 = vsel %vm929_vm9, %v1869_v45, 0.0 }
0x126a   :  { %v1873_v47 = vrot.slane %v1872_v46, 4 }
0x126c   :  { %v1874_v48 = vadd.f32 %v1873_v47, %v1872_v46 }
0x126e   :  { %v1875_v50 = vrot.slane %v1874_v48, 2 }
0x1270   :  { %v1876_v51 = vadd.f32 %v1875_v50, %v1874_v48 }
0x1272   :  { %v1877_v18 = vrot.slane %v1876_v51, 1 }
0x1274   :  { %v1878_v52 = vadd.f32 %v1877_v18, %v1876_v51 }
0x1276   :  { %v1879_v49 = vsub.f32 %v1848_v44, %v1878_v52 }
0x1278   :  { %v1880_v54 = vmul.f32 %v1879_v49, %v1879_v49 }
0x127a   :  { %1897 = vmatmul.f32.vlgmr.msrb.gmra.mxu2 %v1880_v54 }
0x12fd   :  { %v1898_v4 = vpop.f32.mrf.mxu2 }
0x12fe   :  { %v1901_v38 = vsel %vm929_vm9, %v1898_v4, 0.0 }
0x12ff   :  { %v1902_v6 = vrot.slane %v1901_v38, 4 }
0x1301   :  { %v1903_v63 = vadd.f32 %v1902_v6, %v1901_v38 }
0x1303   :  { %v1904_v9 = vrot.slane %v1903_v63, 2 }
0x1305   :  { %v1905_v11 = vadd.f32 %v1904_v9, %v1903_v63 }
0x1307   :  { %v1906_v12 = vrot.slane %v1905_v11, 1 }
0x1309   :  { %v1907_v53 = vadd.f32 %v1906_v12, %v1905_v11 }
0x130b   :  { %v1908_v13 = vadd.f32 1e-05, %v1907_v53 }
0x130d   :  { %2166 = vrsqrt.f32 %v1908_v13  ;;  %vm1915_vm0 = vweird.f32 %v1908_v13 }
0x1313   :  { %v2167_v14 = vpop.eup %2166 }
0x1314   :  { %v1910_v15 = vmul.f32 %v2167_v14, %v1908_v13  ;;  %vm1916_vm9 = vweird.f32 %v2167_v14 }
0x1315   :  { %vm1917_vm2 = vmor %vm1915_vm0, %vm1916_vm9 }
0x1316   :  { %v1911_v16 = vmul.f32 %v2167_v14, %v1910_v15 }
0x1318   :  { %v1912_v17 = vmul.f32 0.5, %v1911_v16 }
0x131a   :  { %v1913_v19 = vsub.f32 1.5, %v1912_v17 }
0x131c   :  { %v1914_v21 = vmul.f32 %v2167_v14, %v1913_v19 }
0x131e   :  { %v1918_v23 = vsel %vm1917_vm2, %v2167_v14, %v1914_v21 }
0x131f   :  { %v1919_v24 = vmul.f32 %v1918_v23, %v1879_v49 }
0x1321   :  { %v1921_v26 = vmul.f32 %v1920_v22, %v1919_v24 }
0x1323   :  { %v1923_v27 = vadd.f32 %v1922_v25, %v1921_v26 }
0x1325   :  { %v1924_v28 = vmax.f32 %v1923_v27, 0.0 }
0x1327   :  { %1993 = vmatmul.f32.vlgmr.msrb.gmra.mxu0 %v1924_v28 }
0x13a4   :  { %v1994_v31 = vpop.f32.mrf.mxu0 }
0x13a5   :  { %v1995_v32 = vadd.f32 %v1994_v31, %v1974_v30 }
0x13a7   :  { %v2001_v33 = vadd.f32 %v2139_v29, %v1995_v32 }
0x13a9   :  { %2002 = vst [vmem:[%s2921_s3] sm:$0xf] %v2001_v33 }
0x13aa   :  { %2007 = vsyncpa [#allocation3], 1 }
0x13ab   :  { %2008 = vsyncpa [#allocation5], 1 }
0x13ac   :  { %2009 = vsyncpa [#allocation8], 1 }
0x13ad   :  { %2010 = vsyncpa [#allocation11], 1 }
0x13ae   :  { %2011 = vsyncpa [#allocation14], 1 }
0x13af   :  { %2012 = vsyncpa [#allocation17], 1 }
0x13b0   :  { %2013 = vsyncpa [#allocation20], 1 }
0x13b1   :  { %2014 = vsyncpa [#allocation23], 1 }
0x13b2   :  { %2015 = vsyncpa [#allocation26], 1 }
0x13b3   :  { %2016 = vsyncpa [#allocation29], 1 }
0x13b4   :  { %2017 = vsyncpa [#allocation32], 1 }

</bundles_post_ra>
